<compile_context>
chip_gen: v7x
topology: tpu7x:2x2x1
jax: 0.10.0
libtpu: 0.0.40
codegen_flags: <defaults>
</compile_context>

<pallas_src>
import jax
import jax.numpy as jnp
from jax import lax
from jax.experimental import pallas as pl
from jax.experimental.pallas import tpu as pltpu


# ----------------------------------------------------------------------------
# Fused kernel: squeeze(1x1)+ReLU -> conv3x3+ReLU -> conv3x3+ReLU -> head
# ----------------------------------------------------------------------------
def _fused_pose_decoder_kernel(x_ref, wsq_ref, bsq_ref, w1_ref, b1_ref,
                               w2_hbm, b2_ref, w3_ref, b3_ref, o_ref,
                               w2_vmem, w2_sem):
    # x_ref : (B, H, W, Cin) f32                  (VMEM)
    # wsq   : (Cin, 256) bf16    bsq: (1, 256) f32
    # w1    : (9*256, 256) bf16  b1 : (1, 256) f32   (im2col-flattened HWIO)
    # w2_hbm: (9*256, 256) bf16  b2 : (1, 256) f32   (HBM; manual DMA below)
    # w3    : (256, 6) f32       b3 : (1, 6) f32
    # o_ref : (B, 6) f32
    B, H, W, Cin = x_ref.shape
    C = wsq_ref.shape[1]
    M = B * H * W

    # Kick off the conv_2 weight DMA immediately so its ~1.2 MB transfer is
    # hidden behind the squeeze + conv_1 compute.
    w2_copy = pltpu.make_async_copy(w2_hbm, w2_vmem, w2_sem)
    w2_copy.start()

    # ---- squeeze: 1x1 conv (Cin -> 256) + ReLU, batch folded into M ----
    x = x_ref[...].reshape(M, Cin).astype(jnp.bfloat16)
    h = jnp.dot(x, wsq_ref[...], preferred_element_type=jnp.float32)
    h = jnp.maximum(h + bsq_ref[...], 0.0)                        # (M, C) f32

    def conv3x3_relu(h_flat, w_ref, b_ref):
        # SAME 3x3 conv expressed as 9 accumulating K=256 MXU dots.
        # Taps are built in bf16 (halves the pad/slice traffic); the kernel
        # weight block for tap k = dh*3 + dw is rows [k*C, (k+1)*C) of the
        # (9C, C) flattened HWIO weight, matching the (3,3,C,C) reshape order.
        h4 = h_flat.astype(jnp.bfloat16).reshape(B, H, W, C)
        zh = jnp.zeros((B, 1, W, C), jnp.bfloat16)
        hp = jnp.concatenate([zh, h4, zh], axis=1)                # (B, H+2, W,   C)
        zw = jnp.zeros((B, H + 2, 1, C), jnp.bfloat16)
        hp = jnp.concatenate([zw, hp, zw], axis=2)                # (B, H+2, W+2, C)
        acc = jnp.zeros((M, C), jnp.float32)
        for dh in range(3):
            for dw in range(3):
                k = dh * 3 + dw
                tap = hp[:, dh:dh + H, dw:dw + W, :].reshape(M, C)
                acc = acc + jnp.dot(tap, w_ref[k * C:(k + 1) * C, :],
                                    preferred_element_type=jnp.float32)
        return jnp.maximum(acc + b_ref[...], 0.0)                 # (M, C) f32

    h = conv3x3_relu(h, w1_ref, b1_ref)                           # conv_1 + ReLU

    w2_copy.wait()                                                # w2 now in VMEM
    h = conv3x3_relu(h, w2_vmem, b2_ref)                          # conv_2 + ReLU

    # ---- head: spatial mean first (exact: mean commutes with the affine
    #            1x1 conv_3), then the tiny 256 -> 6 projection in f32 ----
    hm = jnp.mean(h.reshape(B, H * W, C), axis=1)                 # (B, C) f32
    pose = jnp.dot(hm, w3_ref[...],
                   preferred_element_type=jnp.float32) + b3_ref[...]
    o_ref[...] = pose.astype(o_ref.dtype)                         # (B, 6)


# ----------------------------------------------------------------------------
# One-time weight preparation (hoisted OUT of the per-call jitted forward)
# ----------------------------------------------------------------------------
def prepare_params(params):
    C = params["w_sq"].shape[1]
    return {
        "w_sq": params["w_sq"].astype(jnp.bfloat16),
        "b_sq": params["b_sq"].astype(jnp.float32),
        "w1":   params["w1"].reshape(9 * C, C).astype(jnp.bfloat16),
        "b1":   params["b1"].astype(jnp.float32),
        "w2":   params["w2"].reshape(9 * C, C).astype(jnp.bfloat16),
        "b2":   params["b2"].astype(jnp.float32),
        "w3":   params["w3"].astype(jnp.float32),   # (256, 6), unpadded
        "b3":   params["b3"].astype(jnp.float32),   # (1, 6),   unpadded
    }


# ----------------------------------------------------------------------------
# Wrapper (per-call path: one pallas_call + trivial reshape/slice)
# ----------------------------------------------------------------------------
@jax.jit
def pose_decoder_forward(x_nhwc, prepped):
    B = x_nhwc.shape[0]
    C = prepped["w_sq"].shape[1]

    pose = pl.pallas_call(
        _fused_pose_decoder_kernel,
        out_shape=jax.ShapeDtypeStruct((B, 6), jnp.float32),
        in_specs=[
            pl.BlockSpec(memory_space=pltpu.MemorySpace.VMEM),   # x
            pl.BlockSpec(memory_space=pltpu.MemorySpace.VMEM),   # w_sq
            pl.BlockSpec(memory_space=pltpu.MemorySpace.VMEM),   # b_sq
            pl.BlockSpec(memory_space=pltpu.MemorySpace.VMEM),   # w1
            pl.BlockSpec(memory_space=pltpu.MemorySpace.VMEM),   # b1
            pl.BlockSpec(memory_space=pl.ANY),                   # w2 (HBM, manual DMA)
            pl.BlockSpec(memory_space=pltpu.MemorySpace.VMEM),   # b2
            pl.BlockSpec(memory_space=pltpu.MemorySpace.VMEM),   # w3
            pl.BlockSpec(memory_space=pltpu.MemorySpace.VMEM),   # b3
        ],
        out_specs=pl.BlockSpec(memory_space=pltpu.MemorySpace.VMEM),
        scratch_shapes=[
            pltpu.VMEM((9 * C, C), jnp.bfloat16),   # conv_2 weight staging buffer
            pltpu.SemaphoreType.DMA,                 # its completion semaphore
        ],
    )(x_nhwc, prepped["w_sq"], prepped["b_sq"], prepped["w1"], prepped["b1"],
      prepped["w2"], prepped["b2"], prepped["w3"], prepped["b3"])

    pose = pose.reshape(-1, 1, 1, 6)                              # view(-1,1,1,6)
    x_angle = pose[..., :3]
    x_translation = pose[..., 3:]
    return x_angle, x_translation


# ----------------------------------------------------------------------------
# Pure-JAX references (f32 and bf16-matched) for correctness checking
# ----------------------------------------------------------------------------
def ref_forward(x_nhwc, p, use_bf16):
    dn = ("NHWC", "HWIO", "NHWC")
    cdt = jnp.bfloat16 if use_bf16 else jnp.float32

    def mm1x1(a, w):
        return jnp.einsum("bhwc,cd->bhwd", a.astype(cdt), w.astype(cdt),
                          preferred_element_type=jnp.float32)

    def conv3(a, w):
        return lax.conv_general_dilated(a.astype(cdt), w.astype(cdt), (1, 1),
                                        "SAME", dimension_numbers=dn,
                                        preferred_element_type=jnp.float32)

    y = jax.nn.relu(mm1x1(x_nhwc, p["w_sq"]) + p["b_sq"])
    y = jax.nn.relu(conv3(y, p["w1"]) + p["b1"])
    y = jax.nn.relu(conv3(y, p["w2"]) + p["b2"])
    # head stays f32 in the kernel, so keep it f32 here as well
    y = jnp.einsum("bhwc,cd->bhwd", y, p["w3"],
                   preferred_element_type=jnp.float32) + p["b3"]
    pose = jnp.mean(y, axis=(1, 2)).reshape(-1, 1, 1, 6)
    return pose[..., :3], pose[..., 3:]


def init_params(key, input_channels):
    ks = jax.random.split(key, 8)
    scale = 0.05
    return {
        "w_sq": jax.random.normal(ks[0], (input_channels, 256), jnp.float32) * scale,
        "b_sq": jax.random.normal(ks[1], (1, 256), jnp.float32) * scale,
        "w1":   jax.random.normal(ks[2], (3, 3, 256, 256), jnp.float32) * scale,
        "b1":   jax.random.normal(ks[3], (1, 256), jnp.float32) * scale,
        "w2":   jax.random.normal(ks[4], (3, 3, 256, 256), jnp.float32) * scale,
        "b2":   jax.random.normal(ks[5], (1, 256), jnp.float32) * scale,
        # conv_3: weights and bias scaled by 0.01 as in the PyTorch __init__
        "w3":   jax.random.normal(ks[6], (256, 6), jnp.float32) * scale * 0.01,
        "b3":   jax.random.normal(ks[7], (1, 6), jnp.float32) * scale * 0.01,
    }


if __name__ == "__main__":
    B, H, W, Cin = 2, 8, 8, 16
    key = jax.random.PRNGKey(0)
    kx, kp = jax.random.split(key)
    # NHWC input (equivalent to a PyTorch NCHW input of shape (2, 16, 8, 8))
    x = jax.random.normal(kx, (B, H, W, Cin), jnp.float32)
    params = init_params(kp, Cin)

    # one-time weight prep, outside the per-call jitted path
    prepped = jax.block_until_ready(prepare_params(params))

    angle, translation = pose_decoder_forward(x, prepped)
    jax.block_until_ready((angle, translation))

    assert angle.shape == (B, 1, 1, 3) and translation.shape == (B, 1, 1, 3)

    # tight check against a bf16-matched reference (same matmul precision)
    ma, mt = ref_forward(x, params, use_bf16=True)
    assert jnp.allclose(angle, ma, atol=1e-5, rtol=1e-2)
    assert jnp.allclose(translation, mt, atol=1e-5, rtol=1e-2)

    # sanity check against the full-f32 reference (bf16 MXU inputs => looser)
    fa, ft = ref_forward(x, params, use_bf16=False)
    assert jnp.allclose(angle, fa, atol=2e-4, rtol=2e-2)
    assert jnp.allclose(translation, ft, atol=2e-4, rtol=2e-2)

    print("KERNEL_OK")
</pallas_src>

<mosaic_0001>
module attributes {stable_mosaic.version = 11 : i64} {
  func.func @_fused_pose_decoder_kernel(%arg0: memref<2x8x8x16xf32, #tpu.memory_space<vmem>>, %arg1: memref<16x256xbf16, #tpu.memory_space<vmem>>, %arg2: memref<1x256xf32, #tpu.memory_space<vmem>>, %arg3: memref<2304x256xbf16, #tpu.memory_space<vmem>>, %arg4: memref<1x256xf32, #tpu.memory_space<vmem>>, %arg5: memref<2304x256xbf16, #tpu.memory_space<any>>, %arg6: memref<1x256xf32, #tpu.memory_space<vmem>>, %arg7: memref<256x6xf32, #tpu.memory_space<vmem>>, %arg8: memref<1x6xf32, #tpu.memory_space<vmem>>, %arg9: memref<2x6xf32, #tpu.memory_space<vmem>>, %arg10: memref<2304x256xbf16, #tpu.memory_space<vmem>>, %arg11: memref<!tpu.dma_semaphore, #tpu.memory_space<semaphore_mem>>) attributes {dimension_semantics = [], scalar_prefetch = 0 : i64, scratch_operands = 2 : i64, tpu.core_type = #tpu.core_type<tc>} {
    tpu.enqueue_dma source(%arg5 : memref<2304x256xbf16, #tpu.memory_space<any>>) target(%arg10 : memref<2304x256xbf16, #tpu.memory_space<vmem>>) target_semaphore(%arg11 : memref<!tpu.dma_semaphore, #tpu.memory_space<semaphore_mem>>)
    %c0 = arith.constant 0 : index
    %c0_0 = arith.constant 0 : index
    %c0_1 = arith.constant 0 : index
    %c0_2 = arith.constant 0 : index
    %0 = vector.load %arg0[%c0, %c0_0, %c0_1, %c0_2] : memref<2x8x8x16xf32, #tpu.memory_space<vmem>>, vector<2x8x8x16xf32>
    %1 = vector.shape_cast %0 : vector<2x8x8x16xf32> to vector<128x16xf32>
    %2 = arith.truncf %1 : vector<128x16xf32> to vector<128x16xbf16>
    %c0_3 = arith.constant 0 : index
    %c0_4 = arith.constant 0 : index
    %3 = vector.load %arg1[%c0_3, %c0_4] : memref<16x256xbf16, #tpu.memory_space<vmem>>, vector<16x256xbf16>
    %cst = arith.constant dense<0.000000e+00> : vector<128x256xf32>
    %4 = tpu.matmul %2, %3, %cst {dimension_numbers = #tpu.dot_dimension_numbers<[1], [0], [0], [1], [0, 0, 1, 1], [], []>} : vector<128x16xbf16>, vector<16x256xbf16>, vector<128x256xf32> -> vector<128x256xf32>
    %c0_5 = arith.constant 0 : index
    %c0_6 = arith.constant 0 : index
    %5 = vector.load %arg2[%c0_5, %c0_6] : memref<1x256xf32, #tpu.memory_space<vmem>>, vector<1x256xf32>
    %6 = vector.broadcast %5 : vector<1x256xf32> to vector<128x256xf32>
    %7 = arith.addf %4, %6 : vector<128x256xf32>
    %cst_7 = arith.constant 0.000000e+00 : f32
    %8 = vector.broadcast %cst_7 : f32 to vector<128x256xf32>
    %9 = arith.maximumf %7, %8 : vector<128x256xf32>
    %10 = arith.truncf %9 : vector<128x256xf32> to vector<128x256xbf16>
    %11 = vector.shape_cast %10 : vector<128x256xbf16> to vector<2x8x8x256xbf16>
    %cst_8 = arith.constant 0.000000e+00 : bf16
    %12 = vector.broadcast %cst_8 : bf16 to vector<2x1x8x256xbf16>
    %13 = tpu.concatenate %12, %11, %12 in 1 : vector<2x1x8x256xbf16>, vector<2x8x8x256xbf16>, vector<2x1x8x256xbf16> -> vector<2x10x8x256xbf16>
    %cst_9 = arith.constant 0.000000e+00 : bf16
    %14 = vector.broadcast %cst_9 : bf16 to vector<2x10x1x256xbf16>
    %15 = tpu.concatenate %14, %13, %14 in 2 : vector<2x10x1x256xbf16>, vector<2x10x8x256xbf16>, vector<2x10x1x256xbf16> -> vector<2x10x10x256xbf16>
    %cst_10 = arith.constant 0.000000e+00 : f32
    %16 = vector.broadcast %cst_10 : f32 to vector<128x256xf32>
    %17 = vector.extract_strided_slice %15 {offsets = [0, 0, 0, 0], sizes = [2, 8, 8, 256], strides = [1, 1, 1, 1]} : vector<2x10x10x256xbf16> to vector<2x8x8x256xbf16>
    %18 = vector.shape_cast %17 : vector<2x8x8x256xbf16> to vector<128x256xbf16>
    %c0_11 = arith.constant 0 : index
    %c0_12 = arith.constant 0 : index
    %19 = vector.load %arg3[%c0_11, %c0_12] : memref<2304x256xbf16, #tpu.memory_space<vmem>>, vector<256x256xbf16>
    %cst_13 = arith.constant dense<0.000000e+00> : vector<128x256xf32>
    %20 = tpu.matmul %18, %19, %cst_13 {dimension_numbers = #tpu.dot_dimension_numbers<[1], [0], [0], [1], [0, 0, 1, 1], [], []>} : vector<128x256xbf16>, vector<256x256xbf16>, vector<128x256xf32> -> vector<128x256xf32>
    %21 = arith.addf %16, %20 : vector<128x256xf32>
    %22 = vector.extract_strided_slice %15 {offsets = [0, 0, 1, 0], sizes = [2, 8, 8, 256], strides = [1, 1, 1, 1]} : vector<2x10x10x256xbf16> to vector<2x8x8x256xbf16>
    %23 = vector.shape_cast %22 : vector<2x8x8x256xbf16> to vector<128x256xbf16>
    %c256 = arith.constant 256 : index
    %c0_14 = arith.constant 0 : index
    %24 = vector.load %arg3[%c256, %c0_14] : memref<2304x256xbf16, #tpu.memory_space<vmem>>, vector<256x256xbf16>
    %cst_15 = arith.constant dense<0.000000e+00> : vector<128x256xf32>
    %25 = tpu.matmul %23, %24, %cst_15 {dimension_numbers = #tpu.dot_dimension_numbers<[1], [0], [0], [1], [0, 0, 1, 1], [], []>} : vector<128x256xbf16>, vector<256x256xbf16>, vector<128x256xf32> -> vector<128x256xf32>
    %26 = arith.addf %21, %25 : vector<128x256xf32>
    %27 = vector.extract_strided_slice %15 {offsets = [0, 0, 2, 0], sizes = [2, 8, 8, 256], strides = [1, 1, 1, 1]} : vector<2x10x10x256xbf16> to vector<2x8x8x256xbf16>
    %28 = vector.shape_cast %27 : vector<2x8x8x256xbf16> to vector<128x256xbf16>
    %c512 = arith.constant 512 : index
    %c0_16 = arith.constant 0 : index
    %29 = vector.load %arg3[%c512, %c0_16] : memref<2304x256xbf16, #tpu.memory_space<vmem>>, vector<256x256xbf16>
    %cst_17 = arith.constant dense<0.000000e+00> : vector<128x256xf32>
    %30 = tpu.matmul %28, %29, %cst_17 {dimension_numbers = #tpu.dot_dimension_numbers<[1], [0], [0], [1], [0, 0, 1, 1], [], []>} : vector<128x256xbf16>, vector<256x256xbf16>, vector<128x256xf32> -> vector<128x256xf32>
    %31 = arith.addf %26, %30 : vector<128x256xf32>
    %32 = vector.extract_strided_slice %15 {offsets = [0, 1, 0, 0], sizes = [2, 8, 8, 256], strides = [1, 1, 1, 1]} : vector<2x10x10x256xbf16> to vector<2x8x8x256xbf16>
    %33 = vector.shape_cast %32 : vector<2x8x8x256xbf16> to vector<128x256xbf16>
    %c768 = arith.constant 768 : index
    %c0_18 = arith.constant 0 : index
    %34 = vector.load %arg3[%c768, %c0_18] : memref<2304x256xbf16, #tpu.memory_space<vmem>>, vector<256x256xbf16>
    %cst_19 = arith.constant dense<0.000000e+00> : vector<128x256xf32>
    %35 = tpu.matmul %33, %34, %cst_19 {dimension_numbers = #tpu.dot_dimension_numbers<[1], [0], [0], [1], [0, 0, 1, 1], [], []>} : vector<128x256xbf16>, vector<256x256xbf16>, vector<128x256xf32> -> vector<128x256xf32>
    %36 = arith.addf %31, %35 : vector<128x256xf32>
    %37 = vector.extract_strided_slice %15 {offsets = [0, 1, 1, 0], sizes = [2, 8, 8, 256], strides = [1, 1, 1, 1]} : vector<2x10x10x256xbf16> to vector<2x8x8x256xbf16>
    %38 = vector.shape_cast %37 : vector<2x8x8x256xbf16> to vector<128x256xbf16>
    %c1024 = arith.constant 1024 : index
    %c0_20 = arith.constant 0 : index
    %39 = vector.load %arg3[%c1024, %c0_20] : memref<2304x256xbf16, #tpu.memory_space<vmem>>, vector<256x256xbf16>
    %cst_21 = arith.constant dense<0.000000e+00> : vector<128x256xf32>
    %40 = tpu.matmul %38, %39, %cst_21 {dimension_numbers = #tpu.dot_dimension_numbers<[1], [0], [0], [1], [0, 0, 1, 1], [], []>} : vector<128x256xbf16>, vector<256x256xbf16>, vector<128x256xf32> -> vector<128x256xf32>
    %41 = arith.addf %36, %40 : vector<128x256xf32>
    %42 = vector.extract_strided_slice %15 {offsets = [0, 1, 2, 0], sizes = [2, 8, 8, 256], strides = [1, 1, 1, 1]} : vector<2x10x10x256xbf16> to vector<2x8x8x256xbf16>
    %43 = vector.shape_cast %42 : vector<2x8x8x256xbf16> to vector<128x256xbf16>
    %c1280 = arith.constant 1280 : index
    %c0_22 = arith.constant 0 : index
    %44 = vector.load %arg3[%c1280, %c0_22] : memref<2304x256xbf16, #tpu.memory_space<vmem>>, vector<256x256xbf16>
    %cst_23 = arith.constant dense<0.000000e+00> : vector<128x256xf32>
    %45 = tpu.matmul %43, %44, %cst_23 {dimension_numbers = #tpu.dot_dimension_numbers<[1], [0], [0], [1], [0, 0, 1, 1], [], []>} : vector<128x256xbf16>, vector<256x256xbf16>, vector<128x256xf32> -> vector<128x256xf32>
    %46 = arith.addf %41, %45 : vector<128x256xf32>
    %47 = vector.extract_strided_slice %15 {offsets = [0, 2, 0, 0], sizes = [2, 8, 8, 256], strides = [1, 1, 1, 1]} : vector<2x10x10x256xbf16> to vector<2x8x8x256xbf16>
    %48 = vector.shape_cast %47 : vector<2x8x8x256xbf16> to vector<128x256xbf16>
    %c1536 = arith.constant 1536 : index
    %c0_24 = arith.constant 0 : index
    %49 = vector.load %arg3[%c1536, %c0_24] : memref<2304x256xbf16, #tpu.memory_space<vmem>>, vector<256x256xbf16>
    %cst_25 = arith.constant dense<0.000000e+00> : vector<128x256xf32>
    %50 = tpu.matmul %48, %49, %cst_25 {dimension_numbers = #tpu.dot_dimension_numbers<[1], [0], [0], [1], [0, 0, 1, 1], [], []>} : vector<128x256xbf16>, vector<256x256xbf16>, vector<128x256xf32> -> vector<128x256xf32>
    %51 = arith.addf %46, %50 : vector<128x256xf32>
    %52 = vector.extract_strided_slice %15 {offsets = [0, 2, 1, 0], sizes = [2, 8, 8, 256], strides = [1, 1, 1, 1]} : vector<2x10x10x256xbf16> to vector<2x8x8x256xbf16>
    %53 = vector.shape_cast %52 : vector<2x8x8x256xbf16> to vector<128x256xbf16>
    %c1792 = arith.constant 1792 : index
    %c0_26 = arith.constant 0 : index
    %54 = vector.load %arg3[%c1792, %c0_26] : memref<2304x256xbf16, #tpu.memory_space<vmem>>, vector<256x256xbf16>
    %cst_27 = arith.constant dense<0.000000e+00> : vector<128x256xf32>
    %55 = tpu.matmul %53, %54, %cst_27 {dimension_numbers = #tpu.dot_dimension_numbers<[1], [0], [0], [1], [0, 0, 1, 1], [], []>} : vector<128x256xbf16>, vector<256x256xbf16>, vector<128x256xf32> -> vector<128x256xf32>
    %56 = arith.addf %51, %55 : vector<128x256xf32>
    %57 = vector.extract_strided_slice %15 {offsets = [0, 2, 2, 0], sizes = [2, 8, 8, 256], strides = [1, 1, 1, 1]} : vector<2x10x10x256xbf16> to vector<2x8x8x256xbf16>
    %58 = vector.shape_cast %57 : vector<2x8x8x256xbf16> to vector<128x256xbf16>
    %c2048 = arith.constant 2048 : index
    %c0_28 = arith.constant 0 : index
    %59 = vector.load %arg3[%c2048, %c0_28] : memref<2304x256xbf16, #tpu.memory_space<vmem>>, vector<256x256xbf16>
    %cst_29 = arith.constant dense<0.000000e+00> : vector<128x256xf32>
    %60 = tpu.matmul %58, %59, %cst_29 {dimension_numbers = #tpu.dot_dimension_numbers<[1], [0], [0], [1], [0, 0, 1, 1], [], []>} : vector<128x256xbf16>, vector<256x256xbf16>, vector<128x256xf32> -> vector<128x256xf32>
    %61 = arith.addf %56, %60 : vector<128x256xf32>
    %c0_30 = arith.constant 0 : index
    %c0_31 = arith.constant 0 : index
    %62 = vector.load %arg4[%c0_30, %c0_31] : memref<1x256xf32, #tpu.memory_space<vmem>>, vector<1x256xf32>
    %63 = vector.broadcast %62 : vector<1x256xf32> to vector<128x256xf32>
    %64 = arith.addf %61, %63 : vector<128x256xf32>
    %cst_32 = arith.constant 0.000000e+00 : f32
    %65 = vector.broadcast %cst_32 : f32 to vector<128x256xf32>
    %66 = arith.maximumf %64, %65 : vector<128x256xf32>
    tpu.wait_dma2 semaphore(%arg11 : memref<!tpu.dma_semaphore, #tpu.memory_space<semaphore_mem>>) src(%arg5 : memref<2304x256xbf16, #tpu.memory_space<any>>) dst(%arg10 : memref<2304x256xbf16, #tpu.memory_space<vmem>>)
    %67 = arith.truncf %66 : vector<128x256xf32> to vector<128x256xbf16>
    %68 = vector.shape_cast %67 : vector<128x256xbf16> to vector<2x8x8x256xbf16>
    %cst_33 = arith.constant 0.000000e+00 : bf16
    %69 = vector.broadcast %cst_33 : bf16 to vector<2x1x8x256xbf16>
    %70 = tpu.concatenate %69, %68, %69 in 1 : vector<2x1x8x256xbf16>, vector<2x8x8x256xbf16>, vector<2x1x8x256xbf16> -> vector<2x10x8x256xbf16>
    %cst_34 = arith.constant 0.000000e+00 : bf16
    %71 = vector.broadcast %cst_34 : bf16 to vector<2x10x1x256xbf16>
    %72 = tpu.concatenate %71, %70, %71 in 2 : vector<2x10x1x256xbf16>, vector<2x10x8x256xbf16>, vector<2x10x1x256xbf16> -> vector<2x10x10x256xbf16>
    %cst_35 = arith.constant 0.000000e+00 : f32
    %73 = vector.broadcast %cst_35 : f32 to vector<128x256xf32>
    %74 = vector.extract_strided_slice %72 {offsets = [0, 0, 0, 0], sizes = [2, 8, 8, 256], strides = [1, 1, 1, 1]} : vector<2x10x10x256xbf16> to vector<2x8x8x256xbf16>
    %75 = vector.shape_cast %74 : vector<2x8x8x256xbf16> to vector<128x256xbf16>
    %c0_36 = arith.constant 0 : index
    %c0_37 = arith.constant 0 : index
    %76 = vector.load %arg10[%c0_36, %c0_37] : memref<2304x256xbf16, #tpu.memory_space<vmem>>, vector<256x256xbf16>
    %cst_38 = arith.constant dense<0.000000e+00> : vector<128x256xf32>
    %77 = tpu.matmul %75, %76, %cst_38 {dimension_numbers = #tpu.dot_dimension_numbers<[1], [0], [0], [1], [0, 0, 1, 1], [], []>} : vector<128x256xbf16>, vector<256x256xbf16>, vector<128x256xf32> -> vector<128x256xf32>
    %78 = arith.addf %73, %77 : vector<128x256xf32>
    %79 = vector.extract_strided_slice %72 {offsets = [0, 0, 1, 0], sizes = [2, 8, 8, 256], strides = [1, 1, 1, 1]} : vector<2x10x10x256xbf16> to vector<2x8x8x256xbf16>
    %80 = vector.shape_cast %79 : vector<2x8x8x256xbf16> to vector<128x256xbf16>
    %c256_39 = arith.constant 256 : index
    %c0_40 = arith.constant 0 : index
    %81 = vector.load %arg10[%c256_39, %c0_40] : memref<2304x256xbf16, #tpu.memory_space<vmem>>, vector<256x256xbf16>
    %cst_41 = arith.constant dense<0.000000e+00> : vector<128x256xf32>
    %82 = tpu.matmul %80, %81, %cst_41 {dimension_numbers = #tpu.dot_dimension_numbers<[1], [0], [0], [1], [0, 0, 1, 1], [], []>} : vector<128x256xbf16>, vector<256x256xbf16>, vector<128x256xf32> -> vector<128x256xf32>
    %83 = arith.addf %78, %82 : vector<128x256xf32>
    %84 = vector.extract_strided_slice %72 {offsets = [0, 0, 2, 0], sizes = [2, 8, 8, 256], strides = [1, 1, 1, 1]} : vector<2x10x10x256xbf16> to vector<2x8x8x256xbf16>
    %85 = vector.shape_cast %84 : vector<2x8x8x256xbf16> to vector<128x256xbf16>
    %c512_42 = arith.constant 512 : index
    %c0_43 = arith.constant 0 : index
    %86 = vector.load %arg10[%c512_42, %c0_43] : memref<2304x256xbf16, #tpu.memory_space<vmem>>, vector<256x256xbf16>
    %cst_44 = arith.constant dense<0.000000e+00> : vector<128x256xf32>
    %87 = tpu.matmul %85, %86, %cst_44 {dimension_numbers = #tpu.dot_dimension_numbers<[1], [0], [0], [1], [0, 0, 1, 1], [], []>} : vector<128x256xbf16>, vector<256x256xbf16>, vector<128x256xf32> -> vector<128x256xf32>
    %88 = arith.addf %83, %87 : vector<128x256xf32>
    %89 = vector.extract_strided_slice %72 {offsets = [0, 1, 0, 0], sizes = [2, 8, 8, 256], strides = [1, 1, 1, 1]} : vector<2x10x10x256xbf16> to vector<2x8x8x256xbf16>
    %90 = vector.shape_cast %89 : vector<2x8x8x256xbf16> to vector<128x256xbf16>
    %c768_45 = arith.constant 768 : index
    %c0_46 = arith.constant 0 : index
    %91 = vector.load %arg10[%c768_45, %c0_46] : memref<2304x256xbf16, #tpu.memory_space<vmem>>, vector<256x256xbf16>
    %cst_47 = arith.constant dense<0.000000e+00> : vector<128x256xf32>
    %92 = tpu.matmul %90, %91, %cst_47 {dimension_numbers = #tpu.dot_dimension_numbers<[1], [0], [0], [1], [0, 0, 1, 1], [], []>} : vector<128x256xbf16>, vector<256x256xbf16>, vector<128x256xf32> -> vector<128x256xf32>
    %93 = arith.addf %88, %92 : vector<128x256xf32>
    %94 = vector.extract_strided_slice %72 {offsets = [0, 1, 1, 0], sizes = [2, 8, 8, 256], strides = [1, 1, 1, 1]} : vector<2x10x10x256xbf16> to vector<2x8x8x256xbf16>
    %95 = vector.shape_cast %94 : vector<2x8x8x256xbf16> to vector<128x256xbf16>
    %c1024_48 = arith.constant 1024 : index
    %c0_49 = arith.constant 0 : index
    %96 = vector.load %arg10[%c1024_48, %c0_49] : memref<2304x256xbf16, #tpu.memory_space<vmem>>, vector<256x256xbf16>
    %cst_50 = arith.constant dense<0.000000e+00> : vector<128x256xf32>
    %97 = tpu.matmul %95, %96, %cst_50 {dimension_numbers = #tpu.dot_dimension_numbers<[1], [0], [0], [1], [0, 0, 1, 1], [], []>} : vector<128x256xbf16>, vector<256x256xbf16>, vector<128x256xf32> -> vector<128x256xf32>
    %98 = arith.addf %93, %97 : vector<128x256xf32>
    %99 = vector.extract_strided_slice %72 {offsets = [0, 1, 2, 0], sizes = [2, 8, 8, 256], strides = [1, 1, 1, 1]} : vector<2x10x10x256xbf16> to vector<2x8x8x256xbf16>
    %100 = vector.shape_cast %99 : vector<2x8x8x256xbf16> to vector<128x256xbf16>
    %c1280_51 = arith.constant 1280 : index
    %c0_52 = arith.constant 0 : index
    %101 = vector.load %arg10[%c1280_51, %c0_52] : memref<2304x256xbf16, #tpu.memory_space<vmem>>, vector<256x256xbf16>
    %cst_53 = arith.constant dense<0.000000e+00> : vector<128x256xf32>
    %102 = tpu.matmul %100, %101, %cst_53 {dimension_numbers = #tpu.dot_dimension_numbers<[1], [0], [0], [1], [0, 0, 1, 1], [], []>} : vector<128x256xbf16>, vector<256x256xbf16>, vector<128x256xf32> -> vector<128x256xf32>
    %103 = arith.addf %98, %102 : vector<128x256xf32>
    %104 = vector.extract_strided_slice %72 {offsets = [0, 2, 0, 0], sizes = [2, 8, 8, 256], strides = [1, 1, 1, 1]} : vector<2x10x10x256xbf16> to vector<2x8x8x256xbf16>
    %105 = vector.shape_cast %104 : vector<2x8x8x256xbf16> to vector<128x256xbf16>
    %c1536_54 = arith.constant 1536 : index
    %c0_55 = arith.constant 0 : index
    %106 = vector.load %arg10[%c1536_54, %c0_55] : memref<2304x256xbf16, #tpu.memory_space<vmem>>, vector<256x256xbf16>
    %cst_56 = arith.constant dense<0.000000e+00> : vector<128x256xf32>
    %107 = tpu.matmul %105, %106, %cst_56 {dimension_numbers = #tpu.dot_dimension_numbers<[1], [0], [0], [1], [0, 0, 1, 1], [], []>} : vector<128x256xbf16>, vector<256x256xbf16>, vector<128x256xf32> -> vector<128x256xf32>
    %108 = arith.addf %103, %107 : vector<128x256xf32>
    %109 = vector.extract_strided_slice %72 {offsets = [0, 2, 1, 0], sizes = [2, 8, 8, 256], strides = [1, 1, 1, 1]} : vector<2x10x10x256xbf16> to vector<2x8x8x256xbf16>
    %110 = vector.shape_cast %109 : vector<2x8x8x256xbf16> to vector<128x256xbf16>
    %c1792_57 = arith.constant 1792 : index
    %c0_58 = arith.constant 0 : index
    %111 = vector.load %arg10[%c1792_57, %c0_58] : memref<2304x256xbf16, #tpu.memory_space<vmem>>, vector<256x256xbf16>
    %cst_59 = arith.constant dense<0.000000e+00> : vector<128x256xf32>
    %112 = tpu.matmul %110, %111, %cst_59 {dimension_numbers = #tpu.dot_dimension_numbers<[1], [0], [0], [1], [0, 0, 1, 1], [], []>} : vector<128x256xbf16>, vector<256x256xbf16>, vector<128x256xf32> -> vector<128x256xf32>
    %113 = arith.addf %108, %112 : vector<128x256xf32>
    %114 = vector.extract_strided_slice %72 {offsets = [0, 2, 2, 0], sizes = [2, 8, 8, 256], strides = [1, 1, 1, 1]} : vector<2x10x10x256xbf16> to vector<2x8x8x256xbf16>
    %115 = vector.shape_cast %114 : vector<2x8x8x256xbf16> to vector<128x256xbf16>
    %c2048_60 = arith.constant 2048 : index
    %c0_61 = arith.constant 0 : index
    %116 = vector.load %arg10[%c2048_60, %c0_61] : memref<2304x256xbf16, #tpu.memory_space<vmem>>, vector<256x256xbf16>
    %cst_62 = arith.constant dense<0.000000e+00> : vector<128x256xf32>
    %117 = tpu.matmul %115, %116, %cst_62 {dimension_numbers = #tpu.dot_dimension_numbers<[1], [0], [0], [1], [0, 0, 1, 1], [], []>} : vector<128x256xbf16>, vector<256x256xbf16>, vector<128x256xf32> -> vector<128x256xf32>
    %118 = arith.addf %113, %117 : vector<128x256xf32>
    %c0_63 = arith.constant 0 : index
    %c0_64 = arith.constant 0 : index
    %119 = vector.load %arg6[%c0_63, %c0_64] : memref<1x256xf32, #tpu.memory_space<vmem>>, vector<1x256xf32>
    %120 = vector.broadcast %119 : vector<1x256xf32> to vector<128x256xf32>
    %121 = arith.addf %118, %120 : vector<128x256xf32>
    %cst_65 = arith.constant 0.000000e+00 : f32
    %122 = vector.broadcast %cst_65 : f32 to vector<128x256xf32>
    %123 = arith.maximumf %121, %122 : vector<128x256xf32>
    %124 = vector.shape_cast %123 : vector<128x256xf32> to vector<2x64x256xf32>
    %cst_66 = arith.constant dense<0.000000e+00> : vector<2x256xf32>
    %125 = vector.multi_reduction <add>, %124, %cst_66 [1] : vector<2x64x256xf32> to vector<2x256xf32>
    %cst_67 = arith.constant 6.400000e+01 : f32
    %126 = vector.broadcast %cst_67 : f32 to vector<2x256xf32>
    %127 = arith.divf %125, %126 : vector<2x256xf32>
    %c0_68 = arith.constant 0 : index
    %c0_69 = arith.constant 0 : index
    %128 = vector.load %arg7[%c0_68, %c0_69] : memref<256x6xf32, #tpu.memory_space<vmem>>, vector<256x6xf32>
    %cst_70 = arith.constant dense<0.000000e+00> : vector<2x6xf32>
    %129 = tpu.matmul %127, %128, %cst_70 {dimension_numbers = #tpu.dot_dimension_numbers<[1], [0], [0], [1], [0, 0, 1, 1], [], []>} : vector<2x256xf32>, vector<256x6xf32>, vector<2x6xf32> -> vector<2x6xf32>
    %c0_71 = arith.constant 0 : index
    %c0_72 = arith.constant 0 : index
    %130 = vector.load %arg8[%c0_71, %c0_72] : memref<1x6xf32, #tpu.memory_space<vmem>>, vector<1x6xf32>
    %131 = vector.broadcast %130 : vector<1x6xf32> to vector<2x6xf32>
    %132 = arith.addf %129, %131 : vector<2x6xf32>
    %c0_73 = arith.constant 0 : index
    %c0_74 = arith.constant 0 : index
    %133 = vector.load %arg9[%c0_73, %c0_74] : memref<2x6xf32, #tpu.memory_space<vmem>>, vector<2x6xf32>
    tpu.vector_store %arg9[%c0_73, %c0_74], %132 {strides = array<i32>} : memref<2x6xf32, #tpu.memory_space<vmem>>, vector<2x6xf32>,
    return
  }
}

</mosaic_0001>

<bundles_post_ra>
// kernel: pose_decoder_forward.1
= control target key start
LH: loop header
LB: loop body
LE: loop exit
PB: predicated region body
PF: predicated region fallthrough
CT: control target
= control target key end

     0   :  { %14 = vsyncpa [#allocation5], 0  ;;  %s12081_s0 = inlined_call_operand.hbm [shape: f32[2,8,8,16], index: 0, kind: input, shape index: {}]   ;;  %s12082_s1 = inlined_call_operand.hbm [shape: bf16[16,256], index: 1, kind: input, shape index: {}]   ;;  %s12083_s2 = inlined_call_operand.hbm [shape: f32[1,256], index: 2, kind: input, shape index: {}]   ;;  %s12084_s3 = inlined_call_operand.hbm [shape: bf16[2304,256], index: 3, kind: input, shape index: {}]   ;;  %s12085_s4 = inlined_call_operand.hbm [shape: f32[1,256], index: 4, kind: input, shape index: {}]   ;;  %s12086_s5 = inlined_call_operand.hbm [shape: bf16[2304,256], index: 5, kind: input, shape index: {}]   ;;  %s12087_s6 = inlined_call_operand.hbm [shape: f32[1,256], index: 6, kind: input, shape index: {}]   ;;  %s12088_s7 = inlined_call_operand.vmem [shape: f32[256,6], index: 7, kind: input, shape index: {}]   ;;  %s12089_s8 = inlined_call_operand.hbm [shape: f32[1,6], index: 8, kind: input, shape index: {}]   ;;  %s12090_s9 = inlined_call_operand.vmem [shape: f32[2,6], index: 9, kind: output, shape index: {}]  }
   0x1   :  { %15 = vsyncpa [#allocation7], 0 }
   0x2   :  { %16 = vsyncpa [#allocation10], 0 }
   0x3   :  { %17 = vsyncpa [#allocation13], 0  ;;  %s9429_s30 = smov [#allocation6]   ;;  %s9430_s11 = smov [#allocation9]  }
   0x4   :  { %s35_s10 = sshll.u32 %s9429_s30, 4  ;;  %s57_s12 = sshll.u32 %s9430_s11, 4  ;;  %s36_s10 = int_to_ptr.vmem [resolvable:$true] %s35_s10  ;;  %s9496_s12 = int_to_ptr.vmem [resolvable:$true] %s57_s12 }
   0x5   :  { %s9265_s15 = scalar_lea.hbm %s12082_s1, 256 }
   0x6   :  { %p9266_p0 = scmp.ne.s32.totalorder %s12082_s1, %s9265_s15  ;;  %p9269_p1 = scmp.lt.u32.totalorder %s9265_s15, %s12082_s1 }
   0x8   :  { %p9271_p2 = pnand %p9269_p1, %p9266_p0 }
   0xa   :  { %9274 = shalt.err (!%p9271_p2)
}
   0xb   :  { %s9275_s20 = scalar_lea.vmem %s36_s10, 256  ;;  %p9280_p4 = scmp.lt.s32.totalorder %s36_s10, %s36_s10 }
   0xc   :  { %p9276_p3 = scmp.ne.s32.totalorder %s36_s10, %s9275_s20  ;;  %p9281_p5 = scmp.lt.s32.totalorder %s9275_s20, %s9275_s20 }
   0xe   :  { %p9282_p6 = por %p9281_p5, %p9280_p4 }
  0x10   :  { %p9283_p7 = pnand %p9282_p6, %p9276_p3 }
  0x12   :  { %9286 = shalt.err (!%p9283_p7)
}
  0x13   :  { %s9431_s21 = smov 128   ;;  %s9432_s22 = smov 8  }
  0x14   :  { %41 = dma.hbm_to_vmem [thread:$0]  %s12082_s1, 256, %s36_s10, [#allocation7], %s9431_s21, %s9431_s21, %s9432_s22  }
  0x15   :  { %s9287_s27 = scalar_lea.hbm %s12084_s3, 36864 }
  0x16   :  { %p9288_p8 = scmp.ne.s32.totalorder %s12084_s3, %s9287_s27  ;;  %p9291_p9 = scmp.lt.u32.totalorder %s9287_s27, %s12084_s3 }
  0x18   :  { %p9293_p10 = pnand %p9291_p9, %p9288_p8 }
  0x1a   :  { %9296 = shalt.err (!%p9293_p10)
}
  0x1b   :  { %s9297_s13 = scalar_lea.vmem %s9496_s12, 36864  ;;  %p9302_p12 = scmp.lt.s32.totalorder %s9496_s12, %s9496_s12 }
  0x1c   :  { %p9298_p11 = scmp.ne.s32.totalorder %s9496_s12, %s9297_s13  ;;  %p9303_p13 = scmp.lt.s32.totalorder %s9297_s13, %s9297_s13 }
  0x1e   :  { %p9304_p0 = por %p9303_p13, %p9302_p12 }
  0x20   :  { %p9305_p1 = pnand %p9304_p0, %p9298_p11 }
  0x22   :  { %9308 = shalt.err (!%p9305_p1)
}
  0x23   :  { %63 = dma.hbm_to_vmem [thread:$0]  %s12084_s3, 36864, %s9496_s12, [#allocation10], %s9431_s21, %s9431_s21, %s9432_s22  }
  0x24   :  { %s9433_s14 = smov [#allocation12]   ;;  %s9434_s16 = smov [#allocation4]  }
  0x25   :  { %s80_s15 = sshll.u32 %s9433_s14, 4  ;;  %s23_s17 = sshll.u32 %s9434_s16, 4  ;;  %s81_s15 = int_to_ptr.vmem [resolvable:$true] %s80_s15  ;;  %s9533_s17 = int_to_ptr.vmem [resolvable:$true] %s23_s17 }
  0x26   :  { %s9309_s20 = scalar_lea.hbm %s12087_s6, 32 }
  0x27   :  { %p9310_p2 = scmp.ne.s32.totalorder %s12087_s6, %s9309_s20  ;;  %p9313_p3 = scmp.lt.u32.totalorder %s9309_s20, %s12087_s6 }
  0x29   :  { %p9315_p4 = pnand %p9313_p3, %p9310_p2 }
  0x2b   :  { %9318 = shalt.err (!%p9315_p4)
}
  0x2c   :  { %s9319_s3 = scalar_lea.vmem %s81_s15, 32  ;;  %p9324_p6 = scmp.lt.s32.totalorder %s81_s15, %s81_s15 }
  0x2d   :  { %p9320_p5 = scmp.ne.s32.totalorder %s81_s15, %s9319_s3  ;;  %p9325_p7 = scmp.lt.s32.totalorder %s9319_s3, %s9319_s3 }
  0x2f   :  { %p9326_p8 = por %p9325_p7, %p9324_p6 }
  0x31   :  { %p9327_p9 = pnand %p9326_p8, %p9320_p5 }
  0x33   :  { %9330 = shalt.err (!%p9327_p9)
}
  0x34   :  { %83 = dma.hbm_to_vmem [thread:$0]  %s12087_s6, 32, %s81_s15, [#allocation13]  }
  0x35   :  { %s9331_s30 = scalar_lea.hbm %s12081_s0, 2048 }
  0x36   :  { %p9332_p10 = scmp.ne.s32.totalorder %s12081_s0, %s9331_s30  ;;  %p9335_p11 = scmp.lt.u32.totalorder %s9331_s30, %s12081_s0 }
  0x38   :  { %p9337_p12 = pnand %p9335_p11, %p9332_p10 }
  0x3a   :  { %9340 = shalt.err (!%p9337_p12)
}
  0x3b   :  { %s9341_s14 = scalar_lea.vmem %s9533_s17, 2048  ;;  %p9346_p0 = scmp.lt.s32.totalorder %s9533_s17, %s9533_s17 }
  0x3c   :  { %p9342_p13 = scmp.ne.s32.totalorder %s9533_s17, %s9341_s14  ;;  %p9347_p1 = scmp.lt.s32.totalorder %s9341_s14, %s9341_s14 }
  0x3e   :  { %p9348_p2 = por %p9347_p1, %p9346_p0 }
  0x40   :  { %p9349_p3 = pnand %p9348_p2, %p9342_p13 }
  0x42   :  { %9352 = shalt.err (!%p9349_p3)
}
  0x43   :  { %29 = dma.hbm_to_vmem [thread:$0]  %s12081_s0, 2048, %s9533_s17, [#allocation5], %s9431_s21, %s9431_s21, %s9432_s22  }
  0x44   :  { %s9435_s16 = smov [#allocation8]   ;;  %s9436_s19 = smov [#allocation11]  }
  0x45   :  { %s48_s18 = sshll.u32 %s9435_s16, 4  ;;  %s70_s20 = sshll.u32 %s9436_s19, 4  ;;  %s49_s18 = int_to_ptr.vmem [resolvable:$true] %s48_s18  ;;  %s71_s20 = int_to_ptr.vmem [resolvable:$true] %s70_s20 }
  0x46   :  { %s9353_s25 = scalar_lea.hbm %s12083_s2, 32 }
  0x47   :  { %p9354_p4 = scmp.ne.s32.totalorder %s12083_s2, %s9353_s25  ;;  %p9357_p5 = scmp.lt.u32.totalorder %s9353_s25, %s12083_s2 }
  0x49   :  { %p9359_p6 = pnand %p9357_p5, %p9354_p4 }
  0x4b   :  { %9362 = shalt.err (!%p9359_p6)
}
  0x4c   :  { %s9363_s0 = scalar_lea.vmem %s49_s18, 32  ;;  %p9368_p8 = scmp.lt.s32.totalorder %s49_s18, %s49_s18 }
  0x4d   :  { %p9364_p7 = scmp.ne.s32.totalorder %s49_s18, %s9363_s0  ;;  %p9369_p9 = scmp.lt.s32.totalorder %s9363_s0, %s9363_s0 }
  0x4f   :  { %p9370_p10 = por %p9369_p9, %p9368_p8 }
  0x51   :  { %p9371_p11 = pnand %p9370_p10, %p9364_p7 }
  0x53   :  { %9374 = shalt.err (!%p9371_p11)
}
  0x54   :  { %51 = dma.hbm_to_vmem [thread:$0]  %s12083_s2, 32, %s49_s18, [#allocation7]  }
  0x55   :  { %s9375_s30 = scalar_lea.hbm %s12085_s4, 32 }
  0x56   :  { %p9376_p12 = scmp.ne.s32.totalorder %s12085_s4, %s9375_s30  ;;  %p9379_p13 = scmp.lt.u32.totalorder %s9375_s30, %s12085_s4 }
  0x58   :  { %p9381_p0 = pnand %p9379_p13, %p9376_p12 }
  0x5a   :  { %9384 = shalt.err (!%p9381_p0)
}
  0x5b   :  { %s9385_s14 = scalar_lea.vmem %s71_s20, 32  ;;  %p9390_p2 = scmp.lt.s32.totalorder %s71_s20, %s71_s20 }
  0x5c   :  { %p9386_p1 = scmp.ne.s32.totalorder %s71_s20, %s9385_s14  ;;  %p9391_p3 = scmp.lt.s32.totalorder %s9385_s14, %s9385_s14 }
  0x5e   :  { %p9392_p4 = por %p9391_p3, %p9390_p2 }
  0x60   :  { %p9393_p5 = pnand %p9392_p4, %p9386_p1 }
  0x62   :  { %9396 = shalt.err (!%p9393_p5)
}
  0x63   :  { %73 = dma.hbm_to_vmem [thread:$0]  %s12085_s4, 32, %s71_s20, [#allocation10]  }
  0x64   :  { %s9437_s15 = smov [#allocation14]   ;;  %s9397_s23 = scalar_lea.hbm %s12089_s8, 16 }
  0x65   :  { %s92_s16 = sshll.u32 %s9437_s15, 4  ;;  %p9398_p6 = scmp.ne.s32.totalorder %s12089_s8, %s9397_s23  ;;  %s93_s16 = int_to_ptr.vmem [resolvable:$true] %s92_s16 }
  0x66   :  { %p9401_p7 = scmp.lt.u32.totalorder %s9397_s23, %s12089_s8 }
  0x68   :  { %p9403_p8 = pnand %p9401_p7, %p9398_p6 }
  0x6a   :  { %9406 = shalt.err (!%p9403_p8)
}
  0x6b   :  { %s9407_s12 = scalar_lea.vmem %s93_s16, 16  ;;  %s9411_s4 = scalar_lea.vmem %s93_s16, 32 }
  0x6c   :  { %p9408_p9 = scmp.ne.s32.totalorder %s93_s16, %s9407_s12  ;;  %p9412_p10 = scmp.lt.s32.totalorder %s93_s16, %s93_s16 }
  0x6d   :  { %p9413_p11 = scmp.lt.s32.totalorder %s9411_s4, %s9407_s12 }
  0x6f   :  { %p9414_p12 = por %p9413_p11, %p9412_p10 }
  0x71   :  { %p9415_p13 = pnand %p9414_p12, %p9408_p9 }
  0x73   :  { %9418 = shalt.err (!%p9415_p13)
}
  0x74   :  { %95 = dma.hbm_to_vmem [thread:$0]  %s12089_s8, 16, %s93_s16, [#allocation13]  }
  0x75   :  { %9419 = dma.done.wait [#allocation5], 2048  }
  0x76   :  { %9420 = vsyncadd [#allocation5], 4294965248 }
  0x77   :  { %9421 = dma.done.wait [#allocation7], 288  }
  0x78   :  { %9422 = vsyncadd [#allocation7], 4294967008 }
  0x79   :  { %9423 = dma.done.wait [#allocation10], 36896  }
  0x7a   :  { %9424 = vsyncadd [#allocation10], 4294930400 }
  0x7b   :  { %9425 = dma.done.wait [#allocation13], 48  }
  0x7c   :  { %9426 = vsyncadd [#allocation13], 4294967248  ;;  %s122_s0 = sld [smem:[#allocation0]]   ;;  %s9438_s22 = smov 256   ;;  %v9439_v0 = vmov 0   ;;  %vm201_vm0 = vcmask 130048   ;;  %v181_v60 = vlaneseq }
  0x7d   :  { %134 = sst [smem:[#allocation16]] %s9438_s22  ;;  %258 = vmatprep.mubr.bf16.mxu0 %v9439_v0  ;;  %s9440_s17 = smov 2   ;;  %vm731_vm1 = vcmask 1040384   ;;  %vm732_vm2 = vsmask.f32 256  ;;  %v470_v62 = vrot.slane %v9439_v0, 7 }
  0x7e   :  { %136 = sst [smem:[#allocation16 + $0x1]] %s9438_s22  ;;  %s9441_s28 = smov 64   ;;  %v182_v61 = vshrl.u32 %v181_v60, 7  ;;  %vm9625_vm3 = vmand %vm731_vm1, %vm732_vm2  ;;  %v12310_v63 = vmov 0  ;;  %vm767_vm4 = vcmask 1044480   ;;  %vm1837_vm10 = vcmask 1042432  }
  0x7f   :  { %138 = sst [smem:[#allocation16 + $0x2]] %s9440_s17  ;;  %s9442_s8 = smov [#allocation2]   ;;  %v12311_v63 = vsel %vm9625_vm3, 4294967295, %v12310_v63  ;;  %vm768_vm5 = vsmask.f32 4352  ;;  %vm1838_vm11 = vcmask 1046532  }
  0x80   :  { %140 = sst [smem:[#allocation16 + $0x3]] %s9441_s28  ;;  %s130_s29 = sshll.u32 %s9442_s8, 4  ;;  %vm9633_vm6 = vmand %vm767_vm4, %vm768_vm5  ;;  %vm952_vm7 = vsmask.f32 3328  ;;  %vm953_vm8 = vsmask.f32 7440  ;;  %s131_s29 = int_to_ptr.vmem [resolvable:$true] %s130_s29 }
  0x81   :  { %142 = sst [smem:[#allocation16 + $0x4]] %s9431_s21  ;;  %s9443_s13 = smov 4   ;;  %vm9678_vm9 = vmor %vm952_vm7, %vm953_vm8 }
  0x82   :  { %144 = sst [smem:[#allocation16 + $0x5]] %s9440_s17  ;;  %s7489_s30 = sshll.u32 %s122_s0, 26  ;;  %vm10260_vm12 = vmor %vm1837_vm10, %vm1838_vm11 }
  0x83   :  { %146 = sst [smem:[#allocation16 + $0x6]] %s9431_s21  ;;  %s7490_s11 = sadd.s32 134217728, %s7489_s30 }
  0x84   :  { %148 = sst [smem:[#allocation16 + $0x7]] %s9441_s28  ;;  %s9444_s1 = smov [#allocation3]  }
  0x85   :  { %150 = sst [smem:[#allocation16 + $0x8]] %s9443_s13  ;;  %s9445_s10 = smov [#allocation15]  }
  0x86   :  { %152 = dma.general %s12086_s5, 36864, %s131_s29, %s9444_s1, %s9445_s10, [#allocation16], %s7490_s11, 0  }
  0x87   :  { %v8830_v1 = vld [vmem:[#allocation6 + $0x4] ss:$8 sps:$4 sm:$0xff]   ;;  %v8832_v2 = vld [vmem:[#allocation6] ss:$8 sps:$4 sm:$0xff]   ;;  %v155_v6 = vld [vmem:[#allocation4 + $0x10] sm:$0xff]  ;;  %12312 = vst [vmem:[#allocation22_spill] sm:$0xff] %v12311_v63 }
  0x88   :  { %v153_v3 = vld [vmem:[#allocation4] sm:$0xff]  ;;  %v154_v4 = vld [vmem:[#allocation4 + $0x8] sm:$0xff]  ;;  %226 = vmatprep.subr.bf16.mxu0 %v8830_v1  ;;  %v156_v7 = vld [vmem:[#allocation4 + $0x18] sm:$0xff]  ;;  %v9629_v1 = vsub.s32 0, %v182_v61 }
  0x89   :  { %v169_v5 = vpack.c.bf16 %v154_v4, %v153_v3  ;;  %227 = vmatpush1.bf16.msra.mxu0 %v8832_v2  ;;  %v8833_v8 = vld [vmem:[#allocation9 + $0x104] ss:$8 sps:$4 sm:$0xff]   ;;  %v8835_v9 = vld [vmem:[#allocation9 + $0x100] ss:$8 sps:$4 sm:$0xff]   ;;  %v8836_v10 = vld [vmem:[#allocation9 + $0x114] ss:$8 sps:$4 sm:$0xff]   ;;  %v170_v11 = vpack.c.bf16 %v156_v7, %v155_v6 }
  0x8a   :  { %1419 = vmatprep.subr.bf16.mxu1 %v8833_v8  ;;  %v8838_v12 = vld [vmem:[#allocation9 + $0x110] ss:$8 sps:$4 sm:$0xff]   ;;  %v8839_v13 = vld [vmem:[#allocation9 + $0x124] ss:$8 sps:$4 sm:$0xff]   ;;  %v8841_v15 = vld [vmem:[#allocation9 + $0x120] ss:$8 sps:$4 sm:$0xff]  }
  0x8b   :  { %1420 = vmatpush1.bf16.msra.mxu1 %v8835_v9  ;;  %v157_v14 = vld [vmem:[#allocation4 + $0x20] sm:$0xff]  ;;  %v158_v16 = vld [vmem:[#allocation4 + $0x28] sm:$0xff]  ;;  %v8847_v21 = vld [vmem:[#allocation9 + $0x140] ss:$8 sps:$4 sm:$0xff]   ;;  %12313 = vst [vmem:[#allocation23_spill] sm:$0xff] %v9629_v1  ;;  %v734_v2 = vsel %vm9625_vm3, 0, %v470_v62 }
  0x8c   :  { %7493 = vmatmul.mubr.msk.bf16.vlgmr.msra.gmra.mrb[0].mxu0 %vm201_vm0, %v169_v5  ;;  %1421 = vmatprep.subr.bf16.mxu1 %v8836_v10  ;;  %v8842_v17 = vld [vmem:[#allocation9 + $0x134] ss:$8 sps:$4 sm:$0xff]   ;;  %v171_v18 = vpack.c.bf16 %v158_v16, %v157_v14  ;;  %v8844_v19 = vld [vmem:[#allocation9 + $0x130] ss:$8 sps:$4 sm:$0xff]   ;;  %v8845_v20 = vld [vmem:[#allocation9 + $0x144] ss:$8 sps:$4 sm:$0xff]  }
  0x8d   :  { %268 = vmatprep.mubr.bf16.mxu0 %v9439_v0  ;;  %v159_v22 = vld [vmem:[#allocation4 + $0x30] sm:$0xff]  ;;  %v160_v23 = vld [vmem:[#allocation4 + $0x38] sm:$0xff]  ;;  %v8850_v25 = vld [vmem:[#allocation9 + $0x150] ss:$8 sps:$4 sm:$0xff]   ;;  %v12314_v3 = vmov 0  ;;  %v9637_v5 = vsub.s32 1, %v182_v61 }
  0x8e   :  { %v8848_v24 = vld [vmem:[#allocation9 + $0x154] ss:$8 sps:$4 sm:$0xff]   ;;  %v8851_v26 = vld [vmem:[#allocation9 + $0x164] ss:$8 sps:$4 sm:$0xff]   ;;  %v172_v27 = vpack.c.bf16 %v160_v23, %v159_v22  ;;  %v8853_v28 = vld [vmem:[#allocation9 + $0x160] ss:$8 sps:$4 sm:$0xff]  }
  0x8f   :  { %1422 = vmatpush1.bf16.msra.mxu1 %v8838_v12  ;;  %v161_v29 = vld [vmem:[#allocation4 + $0x40] sm:$0xff]  ;;  %v162_v30 = vld [vmem:[#allocation4 + $0x48] sm:$0xff]  ;;  %v8859_v35 = vld [vmem:[#allocation9 + $0x180] ss:$8 sps:$4 sm:$0xff]   ;;  %v12315_v3 = vsel %vm9633_vm6, 4294967295, %v12314_v3  ;;  %12317 = vst [vmem:[#allocation25_spill] sm:$0xff] %v9637_v5 }
  0x90   :  { %1423 = vmatprep.subr.bf16.mxu1 %v8839_v13  ;;  %v8854_v31 = vld [vmem:[#allocation9 + $0x174] ss:$8 sps:$4 sm:$0xff]   ;;  %v8856_v32 = vld [vmem:[#allocation9 + $0x170] ss:$8 sps:$4 sm:$0xff]   ;;  %v8857_v33 = vld [vmem:[#allocation9 + $0x184] ss:$8 sps:$4 sm:$0xff]   ;;  %v173_v34 = vpack.c.bf16 %v162_v30, %v161_v29 }
  0x91   :  { %v163_v36 = vld [vmem:[#allocation4 + $0x50] sm:$0xff]  ;;  %v164_v37 = vld [vmem:[#allocation4 + $0x58] sm:$0xff]  ;;  %v165_v39 = vld [vmem:[#allocation4 + $0x60] sm:$0xff]  ;;  %12316 = vst [vmem:[#allocation24_spill] sm:$0xff] %v12315_v3 }
  0x92   :  { %v174_v38 = vpack.c.bf16 %v164_v37, %v163_v36  ;;  %v166_v40 = vld [vmem:[#allocation4 + $0x68] sm:$0xff]  ;;  %v167_v42 = vld [vmem:[#allocation4 + $0x70] sm:$0xff]  ;;  %v168_v43 = vld [vmem:[#allocation4 + $0x78] sm:$0xff] }
  0x93   :  { %1424 = vmatpush1.bf16.msra.mxu1 %v8841_v15  ;;  %v175_v41 = vpack.c.bf16 %v166_v40, %v165_v39  ;;  %v176_v44 = vpack.c.bf16 %v168_v43, %v167_v42  ;;  %v8860_v45 = vld [vmem:[#allocation9 + $0x194] ss:$8 sps:$4 sm:$0xff]   ;;  %v8862_v46 = vld [vmem:[#allocation9 + $0x190] ss:$8 sps:$4 sm:$0xff]   ;;  %v8863_v47 = vld [vmem:[#allocation9 + $0x1a4] ss:$8 sps:$4 sm:$0xff]  }
  0x94   :  { %7494 = vmatmul.mubr.msk.bf16.gmra.mrb[4].mxu0 %vm201_vm0, %v170_v11  ;;  %1425 = vmatprep.subr.bf16.mxu1 %v8842_v17  ;;  %v8865_v48 = vld [vmem:[#allocation9 + $0x1a0] ss:$8 sps:$4 sm:$0xff]   ;;  %v8866_v49 = vld [vmem:[#allocation9 + $0x1b4] ss:$8 sps:$4 sm:$0xff]   ;;  %v8868_v50 = vld [vmem:[#allocation9 + $0x1b0] ss:$8 sps:$4 sm:$0xff]  }
  0x95   :  { %278 = vmatprep.mubr.bf16.mxu0 %v9439_v0  ;;  %v8869_v51 = vld [vmem:[#allocation9 + $0x1c4] ss:$8 sps:$4 sm:$0xff]   ;;  %v8871_v52 = vld [vmem:[#allocation9 + $0x1c0] ss:$8 sps:$4 sm:$0xff]   ;;  %v8872_v53 = vld [vmem:[#allocation9 + $0x1d4] ss:$8 sps:$4 sm:$0xff]  }
  0x96   :  { %v8874_v54 = vld [vmem:[#allocation9 + $0x1d0] ss:$8 sps:$4 sm:$0xff]   ;;  %v8875_v55 = vld [vmem:[#allocation9 + $0x1e4] ss:$8 sps:$4 sm:$0xff]   ;;  %v8877_v56 = vld [vmem:[#allocation9 + $0x1e0] ss:$8 sps:$4 sm:$0xff]  }
  0x97   :  { %1426 = vmatpush1.bf16.msra.mxu1 %v8844_v19  ;;  %v8878_v57 = vld [vmem:[#allocation9 + $0x1f4] ss:$8 sps:$4 sm:$0xff]   ;;  %v8880_v58 = vld [vmem:[#allocation9 + $0x1f0] ss:$8 sps:$4 sm:$0xff]   ;;  %v8883_v59 = vld [vmem:[#allocation9 + $0x4] ss:$8 sps:$4 sm:$0xff]  }
  0x98   :  { %1427 = vmatprep.subr.bf16.mxu1 %v8845_v20  ;;  %v179_v4 = vld [vmem:[#allocation8] sm:$0x3] }
  0x99   :  { %v9644_v6 = vrot.slane %v179_v4, %v9629_v1  ;;  %v9647_v7 = vrot.slane %v179_v4, %v9637_v5  ;;  %v8934_v63 = vld [vmem:[#allocation9 + $0x214] ss:$8 sps:$4 sm:$0xff]  }
  0x9b   :  { %1428 = vmatpush1.bf16.msra.mxu1 %v8847_v21 }
  0x9c   :  { %7495 = vmatmul.mubr.msk.bf16.gmra.mrb[8].mxu0 %vm201_vm0, %v171_v18  ;;  %1429 = vmatprep.subr.bf16.mxu1 %v8848_v24 }
  0x9d   :  { %288 = vmatprep.mubr.bf16.mxu0 %v9439_v0 }
  0x9f   :  { %1430 = vmatpush1.bf16.msra.mxu1 %v8850_v25 }
  0xa0   :  { %1431 = vmatprep.subr.bf16.mxu1 %v8851_v26 }
  0xa3   :  { %1432 = vmatpush1.bf16.msra.mxu1 %v8853_v28 }
  0xa4   :  { %7496 = vmatmul.mubr.msk.bf16.gmra.mrb[12].mxu0 %vm201_vm0, %v172_v27  ;;  %1433 = vmatprep.subr.bf16.mxu1 %v8854_v31 }
  0xa5   :  { %298 = vmatprep.mubr.bf16.mxu0 %v9439_v0 }
  0xa7   :  { %1434 = vmatpush1.bf16.msra.mxu1 %v8856_v32 }
  0xa8   :  { %1435 = vmatprep.subr.bf16.mxu1 %v8857_v33 }
  0xab   :  { %1436 = vmatpush1.bf16.msra.mxu1 %v8859_v35 }
  0xac   :  { %7497 = vmatmul.mubr.msk.bf16.gmra.mrb[16].mxu0 %vm201_vm0, %v173_v34  ;;  %1437 = vmatprep.subr.bf16.mxu1 %v8860_v45 }
  0xad   :  { %308 = vmatprep.mubr.bf16.mxu0 %v9439_v0 }
  0xaf   :  { %1438 = vmatpush1.bf16.msra.mxu1 %v8862_v46 }
  0xb0   :  { %1439 = vmatprep.subr.bf16.mxu1 %v8863_v47 }
  0xb3   :  { %1440 = vmatpush1.bf16.msra.mxu1 %v8865_v48 }
  0xb4   :  { %7498 = vmatmul.mubr.msk.bf16.gmra.mrb[20].mxu0 %vm201_vm0, %v174_v38  ;;  %1441 = vmatprep.subr.bf16.mxu1 %v8866_v49 }
  0xb5   :  { %318 = vmatprep.mubr.bf16.mxu0 %v9439_v0 }
  0xb7   :  { %1442 = vmatpush1.bf16.msra.mxu1 %v8868_v50 }
  0xb8   :  { %1443 = vmatprep.subr.bf16.mxu1 %v8869_v51 }
  0xbb   :  { %1444 = vmatpush1.bf16.msra.mxu1 %v8871_v52 }
  0xbc   :  { %7499 = vmatmul.mubr.msk.bf16.gmra.mrb[24].mxu0 %vm201_vm0, %v175_v41  ;;  %1445 = vmatprep.subr.bf16.mxu1 %v8872_v53 }
  0xbd   :  { %328 = vmatprep.mubr.bf16.mxu0 %v9439_v0  ;;  %v9641_v0 = vsel %vm9633_vm6, %v734_v2, 0 }
  0xbe   :  { %12318 = vst [vmem:[#allocation26_spill] sm:$0xff] %v9641_v0  ;;  %v9651_v9 = vcombine.low %v9641_v0, %v9641_v0  ;;  %v9664_v47 = vcombine.high %v9641_v0, %v9641_v0 }
  0xbf   :  { %1446 = vmatpush1.bf16.msra.mxu1 %v8874_v54 }
  0xc0   :  { %1447 = vmatprep.subr.bf16.mxu1 %v8875_v55  ;;  %v956_v19 = vshrl.u32 %v9651_v9, 16  ;;  %v959_v22 = vshll.u32 %v9651_v9, 16  ;;  %12319 = vst [vmem:[#allocation27_spill] sm:$0xff] %v9664_v47 }
  0xc2   :  { %v958_v30 = vrot.slane %v956_v19, 4  ;;  %v961_v35 = vrot.slane %v959_v22, 5  ;;  %v12320_v19 = vmov 0 }
  0xc3   :  { %1448 = vmatpush1.bf16.msra.mxu1 %v8877_v56  ;;  %v12321_v19 = vsel %vm9678_vm9, 4294967295, %v12320_v19 }
  0xc4   :  { %7500 = vmatmul.mubr.msk.bf16.gmra.mrb[28].mxu0 %vm201_vm0, %v176_v44  ;;  %1449 = vmatprep.subr.bf16.mxu1 %v8878_v57  ;;  %v962_v51 = vor.u32 %v961_v35, %v958_v30  ;;  %12322 = vst [vmem:[#allocation28_spill] sm:$0xff] %v12321_v19  ;;  %v8958_v19 = vld [vmem:[#allocation9 + $0x294] ss:$8 sps:$4 sm:$0xff]  }
  0xc6   :  { %v963_v2 = vrot.slane %v962_v51, 4 }
  0xc7   :  { %1450 = vmatpush1.bf16.msra.mxu1 %v8880_v58  ;;  %v965_v58 = vshll.u32 %v9664_v47, 16 }
  0xc8   :  { %1724 = vmatprep.subr.bf16.mxu1 %v8883_v59 }
 0x15f   :  { %v260_v8 = vpop.f32.mrb[0].mxu0 }
 0x160   :  { %v261_v10 = vadd.f32 %v260_v8, %v9644_v6  ;;  %v262_v11 = vpop.f32.mrb[1].mxu0 }
 0x161   :  { %v263_v12 = vadd.f32 %v262_v11, %v9647_v7  ;;  %v264_v13 = vpop.f32.mrb[2].mxu0 }
 0x162   :  { %v339_v14 = vmax.f32 %v261_v10, 0.0  ;;  %v265_v15 = vadd.f32 %v264_v13, %v9644_v6  ;;  %v266_v16 = vpop.f32.mrb[3].mxu0 }
 0x163   :  { %v340_v17 = vmax.f32 %v263_v12, 0.0  ;;  %v267_v18 = vadd.f32 %v266_v16, %v9647_v7 }
 0x164   :  { %v8170_v20 = vpack.c.bf16 %v339_v14, %v339_v14  ;;  %v341_v21 = vmax.f32 %v265_v15, 0.0 }
 0x165   :  { %v8171_v23 = vpack.c.bf16 %v340_v17, %v340_v17  ;;  %v342_v24 = vmax.f32 %v267_v18, 0.0  ;;  %v967_v17 = vrot.slane %v965_v58, 5 }
 0x166   :  { %v475_v25 = vshrl.u32 %v8170_v20, 16  ;;  %v8172_v26 = vpack.c.bf16 %v341_v21, %v341_v21  ;;  %v478_v40 = vshll.u32 %v8170_v20, 16 }
 0x167   :  { %v482_v27 = vshrl.u32 %v8171_v23, 16  ;;  %v8173_v28 = vpack.c.bf16 %v342_v24, %v342_v24  ;;  %v270_v29 = vpop.f32.mrb[4].mxu0  ;;  %v485_v44 = vshll.u32 %v8171_v23, 16 }
 0x168   :  { %v477_v31 = vrot.slane %v475_v25, 7  ;;  %v489_v32 = vshrl.u32 %v8172_v26, 16  ;;  %v271_v33 = vadd.f32 %v270_v29, %v9644_v6  ;;  %v272_v34 = vpop.f32.mrb[5].mxu0  ;;  %v492_v49 = vshll.u32 %v8172_v26, 16 }
 0x169   :  { %v484_v36 = vrot.slane %v482_v27, 7  ;;  %v496_v37 = vshrl.u32 %v8173_v28, 16  ;;  %v273_v38 = vadd.f32 %v272_v34, %v9647_v7  ;;  %v274_v39 = vpop.f32.mrb[6].mxu0  ;;  %v499_v50 = vshll.u32 %v8173_v28, 16 }
 0x16a   :  { %v491_v41 = vrot.slane %v489_v32, 7  ;;  %v275_v42 = vadd.f32 %v274_v39, %v9644_v6  ;;  %v276_v43 = vpop.f32.mrb[7].mxu0  ;;  %v343_v46 = vmax.f32 %v271_v33, 0.0  ;;  %v480_v48 = vor.u32 %v478_v40, %v477_v31 }
 0x16b   :  { %v498_v45 = vrot.slane %v496_v37, 7  ;;  %v487_v52 = vor.u32 %v485_v44, %v484_v36  ;;  %v344_v53 = vmax.f32 %v273_v38, 0.0  ;;  %v277_v55 = vadd.f32 %v276_v43, %v9647_v7 }
 0x16c   :  { %v345_v54 = vmax.f32 %v275_v42, 0.0  ;;  %v494_v56 = vor.u32 %v492_v49, %v491_v41  ;;  %v8174_v59 = vpack.c.bf16 %v343_v46, %v343_v46  ;;  %v735_v61 = vsel %vm9625_vm3, 0, %v480_v48 }
 0x16d   :  { %v501_v57 = vor.u32 %v499_v50, %v498_v45  ;;  %v736_v4 = vsel %vm9625_vm3, 0, %v487_v52  ;;  %v8175_v8 = vpack.c.bf16 %v344_v53, %v344_v53  ;;  %v346_v11 = vmax.f32 %v277_v55, 0.0 }
 0x16e   :  { %v8176_v10 = vpack.c.bf16 %v345_v54, %v345_v54  ;;  %v737_v13 = vsel %vm9625_vm3, 0, %v494_v56  ;;  %v503_v18 = vshrl.u32 %v8174_v59, 16  ;;  %v9684_v20 = vsel %vm9633_vm6, %v735_v61, 0 }
 0x16f   :  { %v280_v60 = vpop.f32.mrb[8].mxu0  ;;  %v738_v14 = vsel %vm9625_vm3, 0, %v501_v57  ;;  %12323 = vst [vmem:[#allocation29_spill] sm:$0xff] %v9684_v20  ;;  %v9688_v21 = vsel %vm9633_vm6, %v736_v4, 0  ;;  %v8177_v22 = vpack.c.bf16 %v346_v11, %v346_v11  ;;  %v9692_v24 = vsel %vm9633_vm6, %v737_v13, 0 }
 0x170   :  { %v282_v62 = vpop.f32.mrb[9].mxu0  ;;  %v281_v15 = vadd.f32 %v280_v60, %v9644_v6  ;;  %12324 = vst [vmem:[#allocation30_spill] sm:$0xff] %v9688_v21  ;;  %12325 = vst [vmem:[#allocation31_spill] sm:$0xff] %v9692_v24  ;;  %v9696_v25 = vsel %vm9633_vm6, %v738_v14, 0  ;;  %v510_v26 = vshrl.u32 %v8175_v8, 16  ;;  %v517_v27 = vshrl.u32 %v8176_v10, 16 }
 0x171   :  { %v284_v12 = vpop.f32.mrb[10].mxu0  ;;  %12326 = vst [vmem:[#allocation32_spill] sm:$0xff] %v9696_v25  ;;  %v524_v28 = vshrl.u32 %v8177_v22, 16  ;;  %v9700_v29 = vsel %vm9678_vm9, %v963_v2, %v967_v17  ;;  %v505_v30 = vrot.slane %v503_v18, 7  ;;  %v283_v32 = vadd.f32 %v282_v62, %v9647_v7 }
 0x172   :  { %v286_v16 = vpop.f32.mrb[11].mxu0  ;;  %v347_v23 = vmax.f32 %v281_v15, 0.0  ;;  %12327 = vst [vmem:[#allocation33_spill] sm:$0xff] %v9700_v29  ;;  %v285_v33 = vadd.f32 %v284_v12, %v9644_v6  ;;  %v9706_v35 = vcombine.low %v9684_v20, %v9688_v21  ;;  %v9710_v36 = vcombine.low %v9692_v24, %v9696_v25 }
 0x173   :  { %v506_v37 = vshll.u32 %v8174_v59, 16  ;;  %v513_v38 = vshll.u32 %v8175_v8, 16  ;;  %v512_v40 = vrot.slane %v510_v26, 7  ;;  %v519_v41 = vrot.slane %v517_v27, 7 }
 0x174   :  { %v8178_v31 = vpack.c.bf16 %v347_v23, %v347_v23  ;;  %12328 = vst [vmem:[#allocation34_spill] sm:$0xff] %v9706_v35  ;;  %12329 = vst [vmem:[#allocation35_spill] sm:$0xff] %v9710_v36  ;;  %v348_v43 = vmax.f32 %v283_v32, 0.0  ;;  %v526_v45 = vrot.slane %v524_v28, 7  ;;  %v349_v46 = vmax.f32 %v285_v33, 0.0 }
 0x175   :  { %v287_v48 = vadd.f32 %v286_v16, %v9647_v7  ;;  %v508_v51 = vor.u32 %v506_v37, %v505_v30  ;;  %v520_v52 = vshll.u32 %v8176_v10, 16  ;;  %v527_v53 = vshll.u32 %v8177_v22, 16 }
 0x176   :  { %v531_v42 = vshrl.u32 %v8178_v31, 16  ;;  %v8179_v54 = vpack.c.bf16 %v348_v43, %v348_v43  ;;  %v8180_v55 = vpack.c.bf16 %v349_v46, %v349_v46  ;;  %v515_v59 = vor.u32 %v513_v38, %v512_v40 }
 0x177   :  { %v290_v34 = vpop.f32.mrb[12].mxu0  ;;  %v350_v56 = vmax.f32 %v287_v48, 0.0  ;;  %v522_v60 = vor.u32 %v520_v52, %v519_v41  ;;  %v9719_v2 = vcombine.high %v9692_v24, %v9696_v25  ;;  %v984_v4 = vshrl.u32 %v9710_v36, 16 }
 0x178   :  { %v292_v39 = vpop.f32.mrb[13].mxu0  ;;  %v291_v49 = vadd.f32 %v290_v34, %v9644_v6  ;;  %v533_v61 = vrot.slane %v531_v42, 7  ;;  %v538_v62 = vshrl.u32 %v8179_v54, 16  ;;  %v529_v8 = vor.u32 %v527_v53, %v526_v45 }
 0x179   :  { %v294_v44 = vpop.f32.mrb[14].mxu0  ;;  %v293_v58 = vadd.f32 %v292_v39, %v9647_v7  ;;  %12330 = vst [vmem:[#allocation36_spill] sm:$0xff] %v9719_v2  ;;  %v545_v11 = vshrl.u32 %v8180_v55, 16  ;;  %v534_v10 = vshll.u32 %v8178_v31, 16  ;;  %v8181_v13 = vpack.c.bf16 %v350_v56, %v350_v56 }
 0x17a   :  { %v9714_v50 = vpop.f32.mrb[15].mxu0  ;;  %v351_v57 = vmax.f32 %v291_v49, 0.0  ;;  %v540_v12 = vrot.slane %v538_v62, 7  ;;  %v987_v16 = vshll.u32 %v9710_v36, 16  ;;  %v739_v17 = vsel %vm9625_vm3, 0, %v508_v51 }
 0x17b   :  { %v541_v18 = vshll.u32 %v8179_v54, 16  ;;  %v352_v22 = vmax.f32 %v293_v58, 0.0  ;;  %v740_v26 = vsel %vm9625_vm3, 0, %v515_v59  ;;  %v741_v27 = vsel %vm9625_vm3, 0, %v522_v60 }
 0x17c   :  { %v8182_v14 = vpack.c.bf16 %v351_v57, %v351_v57  ;;  %v536_v28 = vor.u32 %v534_v10, %v533_v61  ;;  %v552_v30 = vshrl.u32 %v8181_v13, 16  ;;  %v742_v32 = vsel %vm9625_vm3, 0, %v529_v8 }
 0x17d   :  { %v543_v33 = vor.u32 %v541_v18, %v540_v12  ;;  %v547_v34 = vrot.slane %v545_v11, 7  ;;  %v295_v37 = vadd.f32 %v294_v44, %v9644_v6  ;;  %v9734_v39 = vrot.slane %v984_v4, 4 }
 0x17e   :  { %v993_v40 = vshll.u32 %v9719_v2, 16  ;;  %v559_v41 = vshrl.u32 %v8182_v14, 16  ;;  %v8183_v42 = vpack.c.bf16 %v352_v22, %v352_v22  ;;  %v9737_v43 = vrot.slane %v987_v16, 5 }
 0x17f   :  { %v9722_v15 = vpop.f32.mrb[16].mxu0  ;;  %v9741_v45 = vsel %vm9633_vm6, %v739_v17, 0  ;;  %v9745_v46 = vsel %vm9633_vm6, %v740_v26, 0  ;;  %v548_v48 = vshll.u32 %v8180_v55, 16  ;;  %v9749_v44 = vsel %vm9633_vm6, %v741_v27, 0 }
 0x180   :  { %v302_v23 = vpop.f32.mrb[17].mxu0  ;;  %12331 = vst [vmem:[#allocation37_spill] sm:$0xff] %v9741_v45  ;;  %12332 = vst [vmem:[#allocation38_spill] sm:$0xff] %v9745_v46  ;;  %v9753_v49 = vsel %vm9633_vm6, %v742_v32, 0  ;;  %v743_v51 = vsel %vm9625_vm3, 0, %v536_v28  ;;  %v554_v52 = vrot.slane %v552_v30, 7  ;;  %v9761_v59 = vcombine.high %v9684_v20, %v9688_v21 }
 0x181   :  { %v304_v31 = vpop.f32.mrb[18].mxu0  ;;  %12333 = vst [vmem:[#allocation39_spill] sm:$0xff] %v9749_v44  ;;  %12334 = vst [vmem:[#allocation40_spill] sm:$0xff] %v9753_v49  ;;  %v744_v53 = vsel %vm9625_vm3, 0, %v543_v33  ;;  %v550_v54 = vor.u32 %v548_v48, %v547_v34  ;;  %v555_v56 = vshll.u32 %v8181_v13, 16  ;;  %v353_v57 = vmax.f32 %v295_v37, 0.0 }
 0x182   :  { %v306_v38 = vpop.f32.mrb[19].mxu0  ;;  %v561_v58 = vrot.slane %v559_v41, 7  ;;  %v566_v55 = vshrl.u32 %v8183_v42, 16  ;;  %12335 = vst [vmem:[#allocation41_spill] sm:$0xff] %v9761_v59  ;;  %v970_v60 = vshrl.u32 %v9706_v35, 16  ;;  %v9766_v62 = vrot.slane %v993_v40, 5 }
 0x183   :  { %v9770_v4 = vcombine.low %v9741_v45, %v9745_v46  ;;  %v9774_v8 = vcombine.high %v9741_v45, %v9745_v46  ;;  %v9778_v11 = vcombine.low %v9749_v44, %v9753_v49  ;;  %v9784_v12 = vsel %vm9633_vm6, %v743_v51, 0  ;;  %v8887_v45 = vld [vmem:[#allocation9 + $0x20] ss:$8 sps:$4 sm:$0xff]  }
 0x184   :  { %12338 = vst [vmem:[#allocation44_spill] sm:$0xff] %v9784_v12  ;;  %v9788_v13 = vsel %vm9633_vm6, %v744_v53, 0  ;;  %v557_v16 = vor.u32 %v555_v56, %v554_v52  ;;  %v562_v17 = vshll.u32 %v8182_v14, 16  ;;  %v9794_v22 = vcombine.high %v9749_v44, %v9753_v49  ;;  %v8923_v46 = vld [vmem:[#allocation9 + $0xe0] ss:$8 sps:$4 sm:$0xff]  }
 0x185   :  { %12336 = vst [vmem:[#allocation42_spill] sm:$0xff] %v9770_v4  ;;  %12337 = vst [vmem:[#allocation43_spill] sm:$0xff] %v9774_v8  ;;  %v745_v26 = vsel %vm9625_vm3, 0, %v550_v54  ;;  %v972_v27 = vrot.slane %v970_v60, 4  ;;  %v973_v28 = vshll.u32 %v9706_v35, 16  ;;  %v568_v33 = vrot.slane %v566_v55, 7 }
 0x186   :  { %12339 = vst [vmem:[#allocation45_spill] sm:$0xff] %v9788_v13  ;;  %v564_v32 = vor.u32 %v562_v17, %v561_v58  ;;  %v9801_v34 = vpack.c.bf16 %v353_v57, %v353_v57  ;;  %v979_v14 = vshll.u32 %v9761_v59, 16  ;;  %v9806_v37 = vcombine.low %v9784_v12, %v9788_v13 }
 0x187   :  { %v9764_v61 = vpop.f32.mrb[20].mxu0  ;;  %v569_v40 = vshll.u32 %v8183_v42, 16  ;;  %v9810_v41 = vadd.f32 %v9714_v50, %v9647_v7  ;;  %v975_v48 = vrot.slane %v973_v28, 5  ;;  %v9814_v51 = vcombine.high %v9784_v12, %v9788_v13 }
 0x188   :  { %v9780_v10 = vpop.f32.mrb[21].mxu0  ;;  %v9818_v52 = vsel %vm9633_vm6, %v745_v26, 0  ;;  %v746_v53 = vsel %vm9625_vm3, 0, %v557_v16  ;;  %v301_v54 = vadd.f32 %v9722_v15, %v9644_v6  ;;  %v303_v56 = vadd.f32 %v302_v23, %v9647_v7 }
 0x189   :  { %v9790_v18 = vpop.f32.mrb[22].mxu0  ;;  %12340 = vst [vmem:[#allocation46_spill] sm:$0xff] %v9818_v52  ;;  %v976_v42 = vor.u32 %v975_v48, %v972_v27  ;;  %v305_v50 = vadd.f32 %v304_v31, %v9644_v6  ;;  %v307_v57 = vadd.f32 %v306_v38, %v9647_v7  ;;  %v747_v58 = vsel %vm9625_vm3, 0, %v564_v32 }
 0x18a   :  { %v9799_v30 = vpop.f32.mrb[23].mxu0  ;;  %v571_v55 = vor.u32 %v569_v40, %v568_v33  ;;  %v981_v60 = vrot.slane %v979_v14, 5  ;;  %v355_v17 = vmax.f32 %v301_v54, 0.0  ;;  %v356_v16 = vmax.f32 %v303_v56, 0.0 }
 0x18b   :  { %v977_v28 = vrot.slane %v976_v42, 4  ;;  %v357_v5 = vmax.f32 %v305_v50, 0.0  ;;  %v358_v1 = vmax.f32 %v307_v57, 0.0  ;;  %v9835_v23 = vsel %vm9633_vm6, %v746_v53, 0  ;;  %v8881_v42 = vld [vmem:[#allocation9] ss:$8 sps:$4 sm:$0xff]  }
 0x18c   :  { %12341 = vst [vmem:[#allocation47_spill] sm:$0xff] %v9835_v23  ;;  %v354_v31 = vmax.f32 %v9810_v41, 0.0  ;;  %v8186_v38 = vpack.c.bf16 %v355_v17, %v355_v17  ;;  %v998_v27 = vshrl.u32 %v9770_v4, 16  ;;  %v8187_v14 = vpack.c.bf16 %v356_v16, %v356_v16 }
 0x18d   :  { %v9843_v33 = vsel %vm9678_vm9, %v977_v28, %v981_v60  ;;  %v8188_v40 = vpack.c.bf16 %v357_v5, %v357_v5  ;;  %v8189_v48 = vpack.c.bf16 %v358_v1, %v358_v1  ;;  %v9849_v53 = vsel %vm9633_vm6, %v747_v58, 0  ;;  %v8886_v60 = vld [vmem:[#allocation9 + $0x14] ss:$8 sps:$4 sm:$0xff]  }
 0x18e   :  { %12342 = vst [vmem:[#allocation48_spill] sm:$0xff] %v9843_v33  ;;  %12343 = vst [vmem:[#allocation49_spill] sm:$0xff] %v9849_v53  ;;  %v7564_v41 = vcombine.high %v9700_v29, %v9843_v33  ;;  %v7563_v56 = vcombine.low %v9700_v29, %v9843_v33  ;;  %v587_v50 = vshrl.u32 %v8186_v38, 16  ;;  %v748_v57 = vsel %vm9625_vm3, 0, %v571_v55 }
 0x18f   :  { %v9829_v26 = vpop.f32.mrb[24].mxu0  ;;  %v990_v1 = vor.u32 %v9737_v43, %v9734_v39  ;;  %v594_v5 = vshrl.u32 %v8187_v14, 16  ;;  %v601_v17 = vshrl.u32 %v8188_v40, 16  ;;  %v590_v28 = vshll.u32 %v8186_v38, 16  ;;  %v8884_v43 = vld [vmem:[#allocation9 + $0x10] ss:$8 sps:$4 sm:$0xff]  }
 0x190   :  { %v9831_v15 = vpop.f32.mrb[25].mxu0  ;;  %1451 = vmatprep.mubr.bf16.mxu1 %v7564_v41  ;;  %v589_v58 = vrot.slane %v587_v50, 7  ;;  %v608_v16 = vshrl.u32 %v8189_v48, 16  ;;  %v1000_v44 = vrot.slane %v998_v27, 4  ;;  %v597_v49 = vshll.u32 %v8187_v14, 16 }
 0x191   :  { %v9839_v32 = vpop.f32.mrb[26].mxu0  ;;  %1452 = vmatmul.mubr.bf16.vlgmr.msra.gmra.mrb[0].mxu1 %v7563_v56  ;;  %v596_v12 = vrot.slane %v594_v5, 7  ;;  %v603_v13 = vrot.slane %v601_v17, 7  ;;  %v1001_v33 = vshll.u32 %v9770_v4, 16  ;;  %v9862_v55 = vsel %vm9633_vm6, %v748_v57, 0 }
 0x192   :  { %v9845_v54 = vpop.f32.mrb[27].mxu0  ;;  %12344 = vst [vmem:[#allocation50_spill] sm:$0xff] %v9862_v55  ;;  %1725 = vmatpush1.bf16.msra.mxu1 %v8881_v42  ;;  %v592_v39 = vor.u32 %v590_v28, %v589_v58  ;;  %v1007_v24 = vshll.u32 %v9774_v8, 16  ;;  %v311_v38 = vadd.f32 %v9764_v61, %v9644_v6  ;;  %v604_v14 = vshll.u32 %v8188_v40, 16  ;;  %v8889_v5 = vld [vmem:[#allocation9 + $0x24] ss:$8 sps:$4 sm:$0xff]  }
 0x193   :  { %v599_v27 = vor.u32 %v597_v49, %v596_v12  ;;  %1726 = vmatprep.subr.bf16.mxu1 %v8886_v60  ;;  %v610_v56 = vrot.slane %v608_v16, 7  ;;  %v1003_v50 = vrot.slane %v1001_v33, 5  ;;  %v9873_v42 = vcombine.low %v9818_v52, %v9835_v23 }
 0x194   :  { %v991_v57 = vrot.slane %v990_v1, 4  ;;  %v359_v58 = vmax.f32 %v311_v38, 0.0  ;;  %v313_v28 = vadd.f32 %v9780_v10, %v9647_v7  ;;  %v751_v49 = vsel %vm9625_vm3, 0, %v592_v39 }
 0x195   :  { %v606_v12 = vor.u32 %v604_v14, %v603_v13  ;;  %v611_v40 = vshll.u32 %v8189_v48, 16  ;;  %v1004_v33 = vor.u32 %v1003_v50, %v1000_v44  ;;  %v9885_v16 = vcombine.high %v9818_v52, %v9835_v23  ;;  %v8892_v14 = vld [vmem:[#allocation9 + $0x34] ss:$8 sps:$4 sm:$0xff]   ;;  %v8893_v52 = vld [vmem:[#allocation9 + $0x40] ss:$8 sps:$4 sm:$0xff]  }
 0x196   :  { %v9889_v1 = vcombine.low %v9849_v53, %v9862_v55  ;;  %v9891_v38 = vpack.c.bf16 %v354_v31, %v354_v31  ;;  %1727 = vmatpush1.bf16.msra.mxu1 %v8884_v43  ;;  %v1009_v10 = vrot.slane %v1007_v24, 5  ;;  %v752_v13 = vsel %vm9625_vm3, 0, %v599_v27  ;;  %v8898_v23 = vld [vmem:[#allocation9 + $0x54] ss:$8 sps:$4 sm:$0xff]  }
 0x197   :  { %v9867_v41 = vpop.f32.mrb[28].mxu0  ;;  %v613_v48 = vor.u32 %v611_v40, %v610_v56  ;;  %v1005_v44 = vrot.slane %v1004_v33, 4  ;;  %1728 = vmatprep.subr.bf16.mxu1 %v8889_v5  ;;  %v9895_v39 = vpack.c.bf16 %v359_v58, %v359_v58  ;;  %v9899_v50 = vcombine.high %v9849_v53, %v9862_v55 }
 0x198   :  { %v9869_v17 = vpop.f32.mrb[29].mxu0  ;;  %v9904_v31 = vsel %vm9678_vm9, %v991_v57, %v9766_v62  ;;  %v9908_v24 = vsel %vm9633_vm6, %v751_v49, 0  ;;  %v360_v43 = vmax.f32 %v313_v28, 0.0  ;;  %v753_v27 = vsel %vm9625_vm3, 0, %v606_v12  ;;  %v8890_v49 = vld [vmem:[#allocation9 + $0x30] ss:$8 sps:$4 sm:$0xff]  }
 0x199   :  { %v9877_v61 = vpop.f32.mrb[30].mxu0  ;;  %12345 = vst [vmem:[#allocation51_spill] sm:$0xff] %v9904_v31  ;;  %12346 = vst [vmem:[#allocation52_spill] sm:$0xff] %v9908_v24  ;;  %v9914_v56 = vsel %vm9678_vm9, %v1005_v44, %v1009_v10  ;;  %v315_v5 = vadd.f32 %v9790_v18, %v9644_v6  ;;  %v317_v58 = vadd.f32 %v9799_v30, %v9647_v7  ;;  %v9922_v62 = vsel %vm9633_vm6, %v752_v13, 0  ;;  %v8895_v10 = vld [vmem:[#allocation9 + $0x44] ss:$8 sps:$4 sm:$0xff]  }
 0x19a   :  { %v9881_v60 = vpop.f32.mrb[31].mxu0  ;;  %12347 = vst [vmem:[#allocation53_spill] sm:$0xff] %v9914_v56  ;;  %12348 = vst [vmem:[#allocation54_spill] sm:$0xff] %v9922_v62  ;;  %v9926_v57 = vcombine.high %v9904_v31, %v9914_v56  ;;  %v9930_v28 = vcombine.low %v9904_v31, %v9914_v56  ;;  %1729 = vmatpush1.bf16.msra.mxu1 %v8887_v45  ;;  %v1012_v12 = vshrl.u32 %v9778_v11, 16  ;;  %v754_v18 = vsel %vm9625_vm3, 0, %v613_v48 }
 0x19b   :  { %v615_v30 = vshrl.u32 %v9895_v39, 16  ;;  %1730 = vmatprep.subr.bf16.mxu1 %v8892_v14  ;;  %v361_v40 = vmax.f32 %v315_v5, 0.0  ;;  %v362_v33 = vmax.f32 %v317_v58, 0.0  ;;  %v9938_v13 = vsel %vm9633_vm6, %v753_v27, 0 }
 0x19c   :  { %12349 = vst [vmem:[#allocation55_spill] sm:$0xff] %v9926_v57  ;;  %12350 = vst [vmem:[#allocation56_spill] sm:$0xff] %v9930_v28  ;;  %1461 = vmatprep.mubr.bf16.mxu1 %v9926_v57  ;;  %v1014_v44 = vrot.slane %v1012_v12, 4  ;;  %v1015_v45 = vshll.u32 %v9778_v11, 16  ;;  %v1021_v56 = vshll.u32 %v9794_v22, 16  ;;  %v9945_v48 = vcombine.low %v9908_v24, %v9922_v62 }
 0x19d   :  { %12351 = vst [vmem:[#allocation57_spill] sm:$0xff] %v9938_v13  ;;  %1462 = vmatmul.mubr.bf16.gmra.mrb[4].mxu1 %v9930_v28  ;;  %v8192_v14 = vpack.c.bf16 %v361_v40, %v361_v40  ;;  %v8193_v5 = vpack.c.bf16 %v362_v33, %v362_v33  ;;  %v1026_v58 = vshrl.u32 %v9806_v37, 16  ;;  %v9951_v27 = vcombine.high %v9908_v24, %v9922_v62 }
 0x19e   :  { %v9955_v12 = vsel %vm9633_vm6, %v754_v18, 0  ;;  %1731 = vmatpush1.bf16.msra.mxu1 %v8890_v49  ;;  %v1017_v57 = vrot.slane %v1015_v45, 5  ;;  %v1029_v31 = vshll.u32 %v9806_v37, 16  ;;  %v617_v53 = vrot.slane %v615_v30, 7 }
 0x19f   :  { %12352 = vst [vmem:[#allocation58_spill] sm:$0xff] %v9955_v12  ;;  %v618_v28 = vshll.u32 %v9895_v39, 16  ;;  %v9959_v40 = vpack.c.bf16 %v360_v43, %v360_v43  ;;  %v629_v33 = vshrl.u32 %v8192_v14, 16  ;;  %1732 = vmatprep.subr.bf16.mxu1 %v8895_v10  ;;  %v636_v55 = vshrl.u32 %v8193_v5, 16  ;;  %v8896_v43 = vld [vmem:[#allocation9 + $0x50] ss:$8 sps:$4 sm:$0xff]  }
 0x1a0   :  { %v1018_v24 = vor.u32 %v1017_v57, %v1014_v44  ;;  %v1023_v62 = vrot.slane %v1021_v56, 5  ;;  %v1028_v47 = vrot.slane %v1026_v58, 4  ;;  %v632_v18 = vshll.u32 %v8192_v14, 16  ;;  %v8901_v44 = vld [vmem:[#allocation9 + $0x64] ss:$8 sps:$4 sm:$0xff]  }
 0x1a1   :  { %v631_v8 = vrot.slane %v629_v33, 7  ;;  %v1031_v4 = vrot.slane %v1029_v31, 5  ;;  %v1035_v49 = vshll.u32 %v9814_v51, 16  ;;  %v638_v45 = vrot.slane %v636_v55, 7  ;;  %v8904_v33 = vld [vmem:[#allocation9 + $0x74] ss:$8 sps:$4 sm:$0xff]  }
 0x1a2   :  { %v639_v2 = vshll.u32 %v8193_v5, 16  ;;  %v1019_v36 = vrot.slane %v1018_v24, 4  ;;  %1733 = vmatpush1.bf16.msra.mxu1 %v8893_v52  ;;  %v321_v39 = vadd.f32 %v9829_v26, %v9644_v6  ;;  %v622_v30 = vshrl.u32 %v9959_v40, 16 }
 0x1a3   :  { %v634_v57 = vor.u32 %v632_v18, %v631_v8  ;;  %v1032_v56 = vor.u32 %v1031_v4, %v1028_v47  ;;  %1734 = vmatprep.subr.bf16.mxu1 %v8898_v23  ;;  %v1037_v55 = vrot.slane %v1035_v49, 5  ;;  %v323_v5 = vadd.f32 %v9831_v15, %v9647_v7  ;;  %v8899_v23 = vld [vmem:[#allocation9 + $0x60] ss:$8 sps:$4 sm:$0xff]  }
 0x1a4   :  { %v641_v14 = vor.u32 %v639_v2, %v638_v45  ;;  %v9968_v31 = vsel %vm9678_vm9, %v1019_v36, %v1023_v62  ;;  %v363_v24 = vmax.f32 %v321_v39, 0.0  ;;  %v325_v8 = vadd.f32 %v9839_v32, %v9644_v6 }
 0x1a5   :  { %12353 = vst [vmem:[#allocation59_spill] sm:$0xff] %v9968_v31  ;;  %v757_v52 = vsel %vm9625_vm3, 0, %v634_v57  ;;  %v1033_v26 = vrot.slane %v1032_v56, 4  ;;  %v327_v4 = vadd.f32 %v9845_v54, %v9647_v7  ;;  %v364_v32 = vmax.f32 %v323_v5, 0.0 }
 0x1a6   :  { %v9978_v47 = vsel %vm9633_vm6, %v757_v52, 0  ;;  %v758_v36 = vsel %vm9625_vm3, 0, %v641_v14  ;;  %v8194_v2 = vpack.c.bf16 %v363_v24, %v363_v24  ;;  %1735 = vmatpush1.bf16.msra.mxu1 %v8896_v43  ;;  %v365_v58 = vmax.f32 %v325_v8, 0.0  ;;  %v8902_v52 = vld [vmem:[#allocation9 + $0x70] ss:$8 sps:$4 sm:$0xff]  }
 0x1a7   :  { %12354 = vst [vmem:[#allocation60_spill] sm:$0xff] %v9978_v47  ;;  %v9986_v62 = vsel %vm9633_vm6, %v758_v36, 0  ;;  %v9990_v15 = vsel %vm9678_vm9, %v1033_v26, %v1037_v55  ;;  %1736 = vmatprep.subr.bf16.mxu1 %v8901_v44  ;;  %v10008_v39 = vor.u32 %v618_v28, %v617_v53  ;;  %v8195_v57 = vpack.c.bf16 %v364_v32, %v364_v32  ;;  %v8907_v28 = vld [vmem:[#allocation9 + $0x84] ss:$8 sps:$4 sm:$0xff]  }
 0x1a8   :  { %12355 = vst [vmem:[#allocation61_spill] sm:$0xff] %v9986_v62  ;;  %12356 = vst [vmem:[#allocation62_spill] sm:$0xff] %v9990_v15  ;;  %v9994_v18 = vcombine.low %v9978_v47, %v9986_v62  ;;  %v9998_v54 = vcombine.high %v9978_v47, %v9986_v62  ;;  %v10002_v49 = vcombine.high %v9968_v31, %v9990_v15  ;;  %v643_v43 = vshrl.u32 %v8194_v2, 16 }
 0x1a9   :  { %v10006_v45 = vcombine.low %v9968_v31, %v9990_v15  ;;  %v8196_v56 = vpack.c.bf16 %v365_v58, %v365_v58  ;;  %v624_v44 = vrot.slane %v622_v30, 7  ;;  %v366_v14 = vmax.f32 %v327_v4, 0.0 }
 0x1aa   :  { %12357 = vst [vmem:[#allocation63_spill] sm:$0xff] %v9998_v54  ;;  %12358 = vst [vmem:[#allocation64_spill] sm:$0xff] %v10002_v49  ;;  %1471 = vmatprep.mubr.bf16.mxu1 %v10002_v49  ;;  %v1040_v55 = vshrl.u32 %v9873_v42, 16  ;;  %v1043_v24 = vshll.u32 %v9873_v42, 16  ;;  %1737 = vmatpush1.bf16.msra.mxu1 %v8899_v23  ;;  %v645_v26 = vrot.slane %v643_v43, 7  ;;  %v646_v5 = vshll.u32 %v8194_v2, 16 }
 0x1ab   :  { %12359 = vst [vmem:[#allocation65_spill] sm:$0xff] %v10006_v45  ;;  %1472 = vmatmul.mubr.bf16.gmra.mrb[8].mxu1 %v10006_v45  ;;  %v650_v8 = vshrl.u32 %v8195_v57, 16  ;;  %v657_v53 = vshrl.u32 %v8196_v56, 16  ;;  %1738 = vmatprep.subr.bf16.mxu1 %v8904_v33  ;;  %v653_v36 = vshll.u32 %v8195_v57, 16  ;;  %v8197_v32 = vpack.c.bf16 %v366_v14, %v366_v14  ;;  %v8905_v2 = vld [vmem:[#allocation9 + $0x80] ss:$8 sps:$4 sm:$0xff]  }
 0x1ac   :  { %v1042_v30 = vrot.slane %v1040_v55, 4  ;;  %v1045_v58 = vrot.slane %v1043_v24, 5  ;;  %v648_v10 = vor.u32 %v646_v5, %v645_v26  ;;  %v660_v15 = vshll.u32 %v8196_v56, 16  ;;  %v8910_v55 = vld [vmem:[#allocation9 + $0x94] ss:$8 sps:$4 sm:$0xff]  }
 0x1ad   :  { %v652_v4 = vrot.slane %v650_v8, 7  ;;  %v659_v49 = vrot.slane %v657_v53, 7  ;;  %v664_v31 = vshrl.u32 %v8197_v32, 16  ;;  %v1049_v23 = vshll.u32 %v9885_v16, 16 }
 0x1ae   :  { %v1046_v59 = vor.u32 %v1045_v58, %v1042_v30  ;;  %v1054_v45 = vshrl.u32 %v9889_v1, 16  ;;  %1739 = vmatpush1.bf16.msra.mxu1 %v8902_v52  ;;  %v759_v33 = vsel %vm9625_vm3, 0, %v648_v10  ;;  %v1057_v14 = vshll.u32 %v9889_v1, 16  ;;  %v8913_v58 = vld [vmem:[#allocation9 + $0xa4] ss:$8 sps:$4 sm:$0xff]  }
 0x1af   :  { %v655_v43 = vor.u32 %v653_v36, %v652_v4  ;;  %v662_v57 = vor.u32 %v660_v15, %v659_v49  ;;  %1740 = vmatprep.subr.bf16.mxu1 %v8907_v28  ;;  %v10021_v56 = vsel %vm9633_vm6, %v759_v33, 0  ;;  %v666_v24 = vrot.slane %v664_v31, 7 }
 0x1b0   :  { %12360 = vst [vmem:[#allocation66_spill] sm:$0xff] %v10021_v56  ;;  %v667_v26 = vshll.u32 %v8197_v32, 16  ;;  %v1056_v5 = vrot.slane %v1054_v45, 4  ;;  %v1059_v10 = vrot.slane %v1057_v14, 5  ;;  %v1063_v15 = vshll.u32 %v9899_v50, 16 }
 0x1b1   :  { %v760_v52 = vsel %vm9625_vm3, 0, %v655_v43  ;;  %v761_v8 = vsel %vm9625_vm3, 0, %v662_v57  ;;  %v12361_v49 = vshll.u32 %v9959_v40, 16  ;;  %v1047_v31 = vrot.slane %v1046_v59, 4  ;;  %v8908_v45 = vld [vmem:[#allocation9 + $0x90] ss:$8 sps:$4 sm:$0xff]  }
 0x1b2   :  { %v10032_v28 = vsel %vm9633_vm6, %v760_v52, 0  ;;  %v669_v36 = vor.u32 %v667_v26, %v666_v24  ;;  %1741 = vmatpush1.bf16.msra.mxu1 %v8905_v2  ;;  %v10044_v40 = vsel %vm9633_vm6, %v761_v8, 0  ;;  %v1051_v4 = vrot.slane %v1049_v23, 5 }
 0x1b3   :  { %v627_v53 = vor.u32 %v12361_v49, %v624_v44  ;;  %v10036_v32 = vcombine.low %v10021_v56, %v10032_v28  ;;  %v10040_v30 = vcombine.high %v10021_v56, %v10032_v28  ;;  %12362 = vst [vmem:[#allocation67_spill] sm:$0xff] %v10044_v40  ;;  %v1060_v44 = vor.u32 %v1059_v10, %v1056_v5 }
 0x1b4   :  { %1742 = vmatprep.subr.bf16.mxu1 %v8910_v55  ;;  %v762_v59 = vsel %vm9625_vm3, 0, %v669_v36  ;;  %v331_v2 = vadd.f32 %v9867_v41, %v9644_v6  ;;  %v333_v33 = vadd.f32 %v9869_v17, %v9647_v7  ;;  %v1065_v14 = vrot.slane %v1063_v15, 5  ;;  %v8911_v17 = vld [vmem:[#allocation9 + $0xa0] ss:$8 sps:$4 sm:$0xff]   ;;  %v8916_v15 = vld [vmem:[#allocation9 + $0xb4] ss:$8 sps:$4 sm:$0xff]  }
 0x1b5   :  { %v10054_v43 = vsel %vm9633_vm6, %v762_v59, 0  ;;  %v1061_v57 = vrot.slane %v1060_v44, 4  ;;  %v1068_v24 = vshrl.u32 %v9945_v48, 16  ;;  %v755_v5 = vsel %vm9625_vm3, 0, %v10008_v39 }
 0x1b6   :  { %12363 = vst [vmem:[#allocation68_spill] sm:$0xff] %v10054_v43  ;;  %v10059_v55 = vcombine.low %v10044_v40, %v10054_v43  ;;  %v10063_v23 = vcombine.high %v10044_v40, %v10054_v43  ;;  %v367_v41 = vmax.f32 %v331_v2, 0.0  ;;  %v368_v26 = vmax.f32 %v333_v33, 0.0  ;;  %1743 = vmatpush1.bf16.msra.mxu1 %v8908_v45  ;;  %v8914_v33 = vld [vmem:[#allocation9 + $0xb0] ss:$8 sps:$4 sm:$0xff]  }
 0x1b7   :  { %v756_v52 = vsel %vm9625_vm3, 0, %v627_v53  ;;  %v10072_v8 = vsel %vm9678_vm9, %v1047_v31, %v1051_v4  ;;  %v10076_v10 = vsel %vm9678_vm9, %v1061_v57, %v1065_v14  ;;  %1744 = vmatprep.subr.bf16.mxu1 %v8913_v58  ;;  %v10089_v31 = vcombine.low %v9938_v13, %v9955_v12  ;;  %v8919_v45 = vld [vmem:[#allocation9 + $0xc4] ss:$8 sps:$4 sm:$0xff]  }
 0x1b8   :  { %12364 = vst [vmem:[#allocation69_spill] sm:$0xff] %v10072_v8  ;;  %12365 = vst [vmem:[#allocation70_spill] sm:$0xff] %v10076_v10  ;;  %v10080_v49 = vcombine.high %v10072_v8, %v10076_v10  ;;  %v10084_v39 = vcombine.low %v10072_v8, %v10076_v10  ;;  %v8198_v36 = vpack.c.bf16 %v367_v41, %v367_v41  ;;  %v1071_v44 = vshll.u32 %v9945_v48, 16 }
 0x1b9   :  { %v8199_v53 = vpack.c.bf16 %v368_v26, %v368_v26  ;;  %v1070_v2 = vrot.slane %v1068_v24, 4  ;;  %v10096_v57 = vsel %vm9633_vm6, %v755_v5, 0  ;;  %v10100_v14 = vsel %vm9633_vm6, %v756_v52, 0 }
 0x1ba   :  { %12366 = vst [vmem:[#allocation71_spill] sm:$0xff] %v10080_v49  ;;  %12367 = vst [vmem:[#allocation72_spill] sm:$0xff] %v10084_v39  ;;  %1481 = vmatprep.mubr.bf16.mxu1 %v10080_v49  ;;  %v671_v59 = vshrl.u32 %v8198_v36, 16  ;;  %1745 = vmatpush1.bf16.msra.mxu1 %v8911_v17  ;;  %v674_v41 = vshll.u32 %v8198_v36, 16  ;;  %v1077_v26 = vshll.u32 %v9951_v27, 16  ;;  %v1073_v17 = vrot.slane %v1071_v44, 5 }
 0x1bb   :  { %v678_v4 = vshrl.u32 %v8199_v53, 16  ;;  %12368 = vst [vmem:[#allocation73_spill] sm:$0xff] %v10096_v57  ;;  %12369 = vst [vmem:[#allocation74_spill] sm:$0xff] %v10100_v14  ;;  %1482 = vmatmul.mubr.bf16.gmra.mrb[12].mxu1 %v10084_v39  ;;  %1746 = vmatprep.subr.bf16.mxu1 %v8916_v15  ;;  %v681_v24 = vshll.u32 %v8199_v53, 16  ;;  %v10106_v8 = vcombine.high %v9938_v13, %v9955_v12  ;;  %v1082_v52 = vshrl.u32 %v10089_v31, 16 }
 0x1bc   :  { %v673_v58 = vrot.slane %v671_v59, 7  ;;  %v10110_v5 = vadd.f32 %v9877_v61, %v9644_v6  ;;  %v1085_v36 = vshll.u32 %v10089_v31, 16  ;;  %v10116_v15 = vcombine.low %v10096_v57, %v10100_v14  ;;  %v8917_v44 = vld [vmem:[#allocation9 + $0xc0] ss:$8 sps:$4 sm:$0xff]   ;;  %v8922_v12 = vld [vmem:[#allocation9 + $0xd4] ss:$8 sps:$4 sm:$0xff]  }
 0x1bd   :  { %v680_v49 = vrot.slane %v678_v4, 7  ;;  %v1074_v53 = vor.u32 %v1073_v17, %v1070_v2  ;;  %v10120_v39 = vcombine.high %v10096_v57, %v10100_v14  ;;  %v10124_v6 = vadd.f32 %v9881_v60, %v9647_v7 }
 0x1be   :  { %v676_v59 = vor.u32 %v674_v41, %v673_v58  ;;  %1747 = vmatpush1.bf16.msra.mxu1 %v8914_v33  ;;  %v1084_v61 = vrot.slane %v1082_v52, 4  ;;  %v1087_v13 = vrot.slane %v1085_v36, 5  ;;  %v1079_v2 = vrot.slane %v1077_v26, 5 }
 0x1bf   :  { %v683_v4 = vor.u32 %v681_v24, %v680_v49  ;;  %1748 = vmatprep.subr.bf16.mxu1 %v8919_v45  ;;  %v1075_v58 = vrot.slane %v1074_v53, 4  ;;  %v369_v60 = vmax.f32 %v10110_v5, 0.0  ;;  %v1091_v45 = vshll.u32 %v10106_v8, 16 }
 0x1c0   :  { %v763_v10 = vsel %vm9625_vm3, 0, %v676_v59  ;;  %v1088_v26 = vor.u32 %v1087_v13, %v1084_v61  ;;  %v1096_v52 = vshrl.u32 %v10116_v15, 16  ;;  %v1099_v36 = vshll.u32 %v10116_v15, 16  ;;  %v8920_v59 = vld [vmem:[#allocation9 + $0xd0] ss:$8 sps:$4 sm:$0xff]  }
 0x1c1   :  { %v764_v49 = vsel %vm9625_vm3, 0, %v683_v4  ;;  %v10132_v33 = vsel %vm9633_vm6, %v763_v10, 0  ;;  %v10150_v10 = vsel %vm9678_vm9, %v1075_v58, %v1079_v2  ;;  %v370_v4 = vmax.f32 %v10124_v6, 0.0 }
 0x1c2   :  { %12370 = vst [vmem:[#allocation75_spill] sm:$0xff] %v10132_v33  ;;  %v10136_v7 = vsel %vm9633_vm6, %v764_v49, 0  ;;  %12372 = vst [vmem:[#allocation77_spill] sm:$0xff] %v10150_v10  ;;  %1749 = vmatpush1.bf16.msra.mxu1 %v8917_v44  ;;  %v7572_v17 = vcombine.high %v9700_v29, %v10150_v10  ;;  %v7571_v5 = vcombine.low %v9700_v29, %v10150_v10  ;;  %v1105_v53 = vshll.u32 %v10120_v39, 16  ;;  %v8925_v44 = vld [vmem:[#allocation9 + $0xe4] ss:$8 sps:$4 sm:$0xff]  }
 0x1c3   :  { %12371 = vst [vmem:[#allocation76_spill] sm:$0xff] %v10136_v7  ;;  %v10142_v41 = vcombine.low %v10132_v33, %v10136_v7  ;;  %v10146_v24 = vcombine.high %v10132_v33, %v10136_v7  ;;  %1750 = vmatprep.subr.bf16.mxu1 %v8922_v12  ;;  %v1110_v49 = vshrl.u32 %v9994_v18, 16  ;;  %v1113_v13 = vshll.u32 %v9994_v18, 16 }
 0x1c4   :  { %1491 = vmatprep.mubr.bf16.mxu1 %v7572_v17  ;;  %v1098_v61 = vrot.slane %v1096_v52, 4  ;;  %v1101_v58 = vrot.slane %v1099_v36, 5  ;;  %v1119_v2 = vshll.u32 %v9998_v54, 16  ;;  %v1124_v29 = vshrl.u32 %v10036_v32, 16  ;;  %v8928_v54 = vld [vmem:[#allocation9 + $0xf4] ss:$8 sps:$4 sm:$0xff]  }
 0x1c5   :  { %1492 = vmatmul.mubr.bf16.gmra.mrb[16].mxu1 %v7571_v5  ;;  %v1089_v57 = vrot.slane %v1088_v26, 4  ;;  %v1093_v14 = vrot.slane %v1091_v45, 5  ;;  %v1112_v12 = vrot.slane %v1110_v49, 4  ;;  %v1115_v10 = vrot.slane %v1113_v13, 5 }
 0x1c6   :  { %v1102_v6 = vor.u32 %v1101_v58, %v1098_v61  ;;  %v1107_v3 = vrot.slane %v1105_v53, 5  ;;  %v1126_v35 = vrot.slane %v1124_v29, 4  ;;  %v1127_v25 = vshll.u32 %v10036_v32, 16  ;;  %1751 = vmatpush1.bf16.msra.mxu1 %v8920_v59 }
 0x1c7   :  { %v1116_v20 = vor.u32 %v1115_v10, %v1112_v12  ;;  %v1121_v17 = vrot.slane %v1119_v2, 5  ;;  %v1138_v52 = vshrl.u32 %v10059_v55, 16  ;;  %v1141_v36 = vshll.u32 %v10059_v55, 16  ;;  %1752 = vmatprep.subr.bf16.mxu1 %v8925_v44 }
 0x1c8   :  { %v1103_v5 = vrot.slane %v1102_v6, 4  ;;  %v1129_v26 = vrot.slane %v1127_v25, 5  ;;  %v1133_v45 = vshll.u32 %v10040_v30, 16  ;;  %v1152_v49 = vshrl.u32 %v10142_v41, 16 }
 0x1c9   :  { %v1117_v53 = vrot.slane %v1116_v20, 4  ;;  %v1140_v29 = vrot.slane %v1138_v52, 4  ;;  %v1143_v13 = vrot.slane %v1141_v36, 5  ;;  %v1147_v59 = vshll.u32 %v10063_v23, 16 }
 0x1ca   :  { %v8200_v61 = vpack.c.bf16 %v369_v60, %v369_v60  ;;  %v10172_v10 = vsel %vm9678_vm9, %v1089_v57, %v1093_v14  ;;  %v10176_v44 = vsel %vm9678_vm9, %v1103_v5, %v1107_v3  ;;  %v1130_v58 = vor.u32 %v1129_v26, %v1126_v35  ;;  %1753 = vmatpush1.bf16.msra.mxu1 %v8923_v46  ;;  %v8926_v14 = vld [vmem:[#allocation9 + $0xf0] ss:$8 sps:$4 sm:$0xff]   ;;  %v8931_v46 = vld [vmem:[#allocation9 + $0x204] ss:$8 sps:$4 sm:$0xff]  }
 0x1cb   :  { %v10180_v25 = vcombine.high %v10172_v10, %v10176_v44  ;;  %v10184_v20 = vcombine.low %v10172_v10, %v10176_v44  ;;  %v10188_v60 = vsel %vm9678_vm9, %v1117_v53, %v1121_v17  ;;  %v1144_v57 = vor.u32 %v1143_v13, %v1140_v29  ;;  %1754 = vmatprep.subr.bf16.mxu1 %v8928_v54 }
 0x1cc   :  { %v1131_v2 = vrot.slane %v1130_v58, 4  ;;  %v1135_v3 = vrot.slane %v1133_v45, 5  ;;  %v1154_v12 = vrot.slane %v1152_v49, 4  ;;  %v1155_v35 = vshll.u32 %v10142_v41, 16 }
 0x1cd   :  { %12373 = vst [vmem:[#allocation78_spill] sm:$0xff] %v10180_v25  ;;  %12374 = vst [vmem:[#allocation79_spill] sm:$0xff] %v10184_v20  ;;  %v12375_v6 = vshrl.u32 %v9891_v38, 16  ;;  %1501 = vmatprep.mubr.bf16.mxu1 %v10180_v25  ;;  %v1145_v36 = vrot.slane %v1144_v57, 4  ;;  %v1149_v5 = vrot.slane %v1147_v59, 5  ;;  %v1161_v26 = vshll.u32 %v10146_v24, 16 }
 0x1ce   :  { %v583_v17 = vshll.u32 %v9891_v38, 16  ;;  %v8201_v53 = vpack.c.bf16 %v370_v4, %v370_v4  ;;  %1502 = vmatmul.mubr.bf16.gmra.mrb[20].mxu1 %v10184_v20  ;;  %v10199_v54 = vsel %vm9678_vm9, %v1131_v2, %v1135_v3  ;;  %v1157_v45 = vrot.slane %v1155_v35, 5  ;;  %v12402_v25 = vld [vmem:[#allocation36_spill] sm:$0xff] }
 0x1cf   :  { %v582_v52 = vrot.slane %v12375_v6, 7  ;;  %v685_v49 = vshrl.u32 %v8200_v61, 16  ;;  %v10203_v29 = vcombine.high %v10188_v60, %v10199_v54  ;;  %v10207_v13 = vcombine.low %v10188_v60, %v10199_v54  ;;  %1755 = vmatpush1.bf16.msra.mxu1 %v8926_v14 }
 0x1d0   :  { %v10211_v38 = vsel %vm9678_vm9, %v1145_v36, %v1149_v5  ;;  %v1158_v4 = vor.u32 %v1157_v45, %v1154_v12  ;;  %2154 = vmatprep.subr.bf16.mxu1 %v8931_v46  ;;  %v12379_v59 = vshrl.u32 %v9801_v34, 16  ;;  %v1163_v2 = vrot.slane %v1161_v26, 5 }
 0x1d1   :  { %12376 = vst [vmem:[#allocation80_spill] sm:$0xff] %v10203_v29  ;;  %12377 = vst [vmem:[#allocation81_spill] sm:$0xff] %v10207_v13  ;;  %v10215_v57 = vor.u32 %v583_v17, %v582_v52  ;;  %1511 = vmatprep.mubr.bf16.mxu1 %v10203_v29  ;;  %v10220_v3 = vcombine.low %v9986_v62, %v10032_v28  ;;  %v10224_v6 = vcombine.low %v9978_v47, %v10021_v56  ;;  %v12382_v29 = vmov 0  ;;  %v8940_v56 = vld [vmem:[#allocation9 + $0x234] ss:$8 sps:$4 sm:$0xff]  }
 0x1d2   :  { %12378 = vst [vmem:[#allocation82_spill] sm:$0xff] %v10211_v38  ;;  %v575_v58 = vrot.slane %v12379_v59, 7  ;;  %v1159_v35 = vrot.slane %v1158_v4, 4  ;;  %v10228_v14 = vcombine.low %v10054_v43, %v10136_v7  ;;  %v10232_v12 = vcombine.low %v10044_v40, %v10132_v33 }
 0x1d3   :  { %v687_v46 = vrot.slane %v685_v49, 7  ;;  %v692_v52 = vshrl.u32 %v8201_v53, 16  ;;  %v576_v36 = vshll.u32 %v9801_v34, 16  ;;  %v7663_v26 = vrot.slane %v9778_v11, 9  ;;  %v12415_v49 = vld [vmem:[#allocation77_spill] sm:$0xff] }
 0x1d4   :  { %v10237_v5 = vsel %vm9678_vm9, %v1159_v35, %v1163_v2  ;;  %v688_v17 = vshll.u32 %v8200_v61, 16  ;;  %v750_v34 = vsel %vm9625_vm3, 0, %v10215_v57  ;;  %v695_v2 = vshll.u32 %v8201_v53, 16 }
 0x1d5   :  { %v10242_v45 = vcombine.high %v10211_v38, %v10237_v5  ;;  %v10246_v4 = vcombine.low %v10211_v38, %v10237_v5  ;;  %v10249_v59 = vor.u32 %v576_v36, %v575_v58  ;;  %v1858_v11 = vrot.slane %v9794_v22, 5 }
 0x1d6   :  { %1512 = vmatmul.mubr.bf16.gmra.mrb[24].mxu1 %v10207_v13  ;;  %v10256_v61 = vor.u32 %v688_v17, %v687_v46  ;;  %v694_v35 = vrot.slane %v692_v52, 7  ;;  %v12383_v29 = vsel %vm10260_vm12, 4294967295, %v12382_v29  ;;  %v7664_v58 = vrot.slane %v9806_v37, 9  ;;  %v12401_v13 = vld [vmem:[#allocation35_spill] sm:$0xff] }
 0x1d7   :  { %12380 = vst [vmem:[#allocation83_spill] sm:$0xff] %v10242_v45  ;;  %12381 = vst [vmem:[#allocation84_spill] sm:$0xff] %v10246_v4  ;;  %1521 = vmatprep.mubr.bf16.mxu1 %v10242_v45  ;;  %v1862_v36 = vrot.slane %v9814_v51, 5  ;;  %v10268_v53 = vsel %vm10260_vm12, %v7663_v26, %v1858_v11  ;;  %v7665_v22 = vrot.slane %v9873_v42, 9  ;;  %v1866_v57 = vrot.slane %v9885_v16, 5 }
 0x1d8   :  { %12384 = vst [vmem:[#allocation85_spill] sm:$0xff] %v12383_v29  ;;  %v7666_v46 = vrot.slane %v9889_v1, 9  ;;  %v1870_v17 = vrot.slane %v9899_v50, 5  ;;  %v7667_v37 = vrot.slane %v9945_v48, 9  ;;  %v1874_v51 = vrot.slane %v9951_v27, 5  ;;  %v12429_v29 = vld [vmem:[#allocation54_spill] sm:$0xff] }
 0x1d9   :  { %v10275_v52 = vsel %vm10260_vm12, %v7664_v58, %v1862_v36  ;;  %v10290_v16 = vsel %vm10260_vm12, %v7665_v22, %v1866_v57  ;;  %v7668_v1 = vrot.slane %v10089_v31, 9  ;;  %v1878_v27 = vrot.slane %v10106_v8, 5 }
 0x1da   :  { %v10282_v26 = vcombine.high %v10268_v53, %v10275_v52  ;;  %v10286_v42 = vcombine.low %v10268_v53, %v10275_v52  ;;  %v10295_v50 = vsel %vm10260_vm12, %v7666_v46, %v1870_v17  ;;  %v10299_v48 = vsel %vm10260_vm12, %v7667_v37, %v1874_v51 }
 0x1db   :  { %v7669_v11 = vrot.slane %v10116_v15, 9  ;;  %v697_v58 = vor.u32 %v695_v2, %v694_v35  ;;  %v7612_v36 = vcombine.low %v9641_v0, %v9688_v21  ;;  %v10307_v22 = vcombine.high %v10290_v16, %v10295_v50  ;;  %v12386_v2 = vld [vmem:[#allocation63_spill] sm:$0xff] }
 0x1dc   :  { %v10311_v31 = vcombine.low %v10290_v16, %v10295_v50  ;;  %v10315_v57 = vsel %vm10260_vm12, %v7668_v1, %v1878_v27  ;;  %v1882_v8 = vrot.slane %v10120_v39, 5  ;;  %v7670_v15 = vrot.slane %v9994_v18, 9 }
 0x1dd   :  { %12385 = vst [vmem:[#allocation86_spill] sm:$0xff] %v10307_v22  ;;  %v1886_v35 = vrot.slane %v12386_v2, 5  ;;  %v7671_v46 = vrot.slane %v10036_v32, 9  ;;  %v1890_v17 = vrot.slane %v10040_v30, 5  ;;  %v7672_v37 = vrot.slane %v10059_v55, 9 }
 0x1de   :  { %1522 = vmatmul.mubr.bf16.gmra.mrb[28].mxu1 %v10246_v4  ;;  %v1894_v51 = vrot.slane %v10063_v23, 5  ;;  %v10327_v1 = vsel %vm10260_vm12, %v7669_v11, %v1882_v8  ;;  %v7673_v39 = vrot.slane %v10142_v41, 9  ;;  %v1898_v27 = vrot.slane %v10146_v24, 5  ;;  %v12400_v4 = vld [vmem:[#allocation41_spill] sm:$0xff] }
 0x1df   :  { %1756 = vmatprep.mubr.bf16.mxu1 %v7612_v36  ;;  %v10331_v18 = vsel %vm10260_vm12, %v7670_v15, %v1886_v35  ;;  %v10337_v32 = vcombine.high %v10315_v57, %v10327_v1  ;;  %v10341_v30 = vcombine.low %v10315_v57, %v10327_v1  ;;  %v10345_v55 = vsel %vm10260_vm12, %v7671_v46, %v1890_v17  ;;  %v8929_v35 = vld [vmem:[#allocation9 + $0x200] ss:$8 sps:$4 sm:$0xff]  }
 0x1e0   :  { %v10349_v23 = vsel %vm10260_vm12, %v7672_v37, %v1894_v51  ;;  %v749_v41 = vsel %vm9625_vm3, 0, %v10249_v59  ;;  %v10356_v24 = vcombine.high %v10331_v18, %v10345_v55  ;;  %v10360_v11 = vcombine.low %v10331_v18, %v10345_v55  ;;  %v12393_v46 = vld [vmem:[#allocation29_spill] sm:$0xff]  ;;  %v12394_v37 = vld [vmem:[#allocation38_spill] sm:$0xff]  ;;  %v12395_v51 = vld [vmem:[#allocation32_spill] sm:$0xff] }
 0x1e1   :  { %12387 = vst [vmem:[#allocation63_spill] sm:$0xff] %v10337_v32  ;;  %12388 = vst [vmem:[#allocation87_spill] sm:$0xff] %v10341_v30  ;;  %v10364_v36 = vsel %vm10260_vm12, %v7673_v39, %v1898_v27  ;;  %v765_v8 = vsel %vm9625_vm3, 0, %v10256_v61  ;;  %v766_v15 = vsel %vm9625_vm3, 0, %v697_v58  ;;  %v7611_v17 = vcombine.low %v9641_v0, %v12393_v46  ;;  %v12397_v61 = vld [vmem:[#allocation34_spill] sm:$0xff] }
 0x1e2   :  { %12389 = vst [vmem:[#allocation88_spill] sm:$0xff] %v10356_v24  ;;  %12390 = vst [vmem:[#allocation89_spill] sm:$0xff] %v10360_v11  ;;  %v10373_v59 = vcombine.high %v10349_v23, %v10364_v36  ;;  %v10377_v2 = vcombine.low %v10349_v23, %v10364_v36  ;;  %v10383_v39 = vcombine.low %v12395_v51, %v12394_v37  ;;  %v7660_v27 = vrot.slane %v12397_v61, 9  ;;  %v12404_v46 = vld [vmem:[#allocation42_spill] sm:$0xff]  ;;  %v12408_v51 = vld [vmem:[#allocation37_spill] sm:$0xff] }
 0x1e3   :  { %v10388_v58 = vsel %vm9633_vm6, %v750_v34, 0  ;;  %v1846_v45 = vrot.slane %v12400_v4, 5  ;;  %v7661_v20 = vrot.slane %v12401_v13, 9  ;;  %v1850_v47 = vrot.slane %v12402_v25, 5  ;;  %v12406_v13 = vld [vmem:[#allocation27_spill] sm:$0xff]  ;;  %v12412_v4 = vld [vmem:[#allocation40_spill] sm:$0xff] }
 0x1e4   :  { %12391 = vst [vmem:[#allocation90_spill] sm:$0xff] %v10373_v59  ;;  %12392 = vst [vmem:[#allocation91_spill] sm:$0xff] %v10377_v2  ;;  %v10395_v62 = vsel %vm9633_vm6, %v749_v41, 0  ;;  %v7662_v37 = vrot.slane %v12404_v46, 9  ;;  %v12405_v2 = vld [vmem:[#allocation43_spill] sm:$0xff]  ;;  %v10429_v41 = vsel %vm9633_vm6, %v765_v8, 0 }
 0x1e5   :  { %12396 = vst [vmem:[#allocation92_spill] sm:$0xff] %v10383_v39  ;;  %12399 = vst [vmem:[#allocation34_spill] sm:$0xff] %v10388_v58  ;;  %v1854_v21 = vrot.slane %v12405_v2, 5  ;;  %v10401_v61 = vcombine.low %v10395_v62, %v10388_v58  ;;  %v10405_v34 = vcombine.high %v10395_v62, %v10388_v58  ;;  %v10414_v2 = vsel %vm9633_vm6, %v766_v15, 0  ;;  %v8932_v46 = vld [vmem:[#allocation9 + $0x210] ss:$8 sps:$4 sm:$0xff]  }
 0x1e6   :  { %12403 = vst [vmem:[#allocation41_spill] sm:$0xff] %v10395_v62  ;;  %1757 = vmatmul.mubr.bf16.vlgmr.msra.gmra.mrb[0].mxu1 %v7611_v17  ;;  %12407 = vst [vmem:[#allocation35_spill] sm:$0xff] %v10414_v2  ;;  %v12409_v62 = vld [vmem:[#allocation31_spill] sm:$0xff]  ;;  %v12411_v17 = vld [vmem:[#allocation45_spill] sm:$0xff]  ;;  %v10439_v40 = vcombine.low %v10429_v41, %v10414_v2  ;;  %v10443_v25 = vcombine.high %v10429_v41, %v10414_v2  ;;  %v10447_v8 = vsel %vm10260_vm12, %v7661_v20, %v1850_v47 }
 0x1e7   :  { %2155 = vmatpush1.bf16.msra.mxu1 %v8929_v35  ;;  %1766 = vmatprep.mubr.bf16.mxu1 %v10383_v39  ;;  %v10419_v58 = vcombine.low %v12409_v62, %v12408_v51  ;;  %v10423_v59 = vcombine.low %v12412_v4, %v12411_v17  ;;  %12414 = vst [vmem:[#allocation43_spill] sm:$0xff] %v10429_v41  ;;  %v8937_v15 = vld [vmem:[#allocation9 + $0x224] ss:$8 sps:$4 sm:$0xff]   ;;  %v2694_v39 = vshll.u32 %v10405_v34, 16  ;;  %v8935_v20 = vld [vmem:[#allocation9 + $0x220] ss:$8 sps:$4 sm:$0xff]  }
 0x1e8   :  { %2156 = vmatprep.subr.bf16.mxu1 %v8934_v63  ;;  %v10433_v35 = vsel %vm10260_vm12, %v7660_v27, %v1846_v45  ;;  %v10451_v63 = vsel %vm10260_vm12, %v7662_v37, %v1854_v21  ;;  %v2685_v45 = vshrl.u32 %v10401_v61, 16  ;;  %v2688_v27 = vshll.u32 %v10401_v61, 16 }
 0x1e9   :  { %12410 = vst [vmem:[#allocation36_spill] sm:$0xff] %v10419_v58  ;;  %12413 = vst [vmem:[#allocation42_spill] sm:$0xff] %v10423_v59  ;;  %v2696_v43 = vrot.slane %v2694_v39, 5  ;;  %v2699_v41 = vshrl.u32 %v10439_v40, 16  ;;  %v2702_v47 = vshll.u32 %v10439_v40, 16  ;;  %v7822_v33 = vrot.slane %v10401_v61, 9 }
 0x1ea   :  { %v2687_v2 = vrot.slane %v2685_v45, 4  ;;  %v2690_v21 = vrot.slane %v2688_v27, 5  ;;  %v2708_v45 = vshll.u32 %v10443_v25, 16  ;;  %v12416_v61 = vld [vmem:[#allocation70_spill] sm:$0xff]  ;;  %v12418_v27 = vld [vmem:[#allocation39_spill] sm:$0xff]  ;;  %v3091_v37 = vrot.slane %v10443_v25, 5 }
 0x1eb   :  { %2157 = vmatpush1.bf16.msra.mxu1 %v8932_v46  ;;  %v2704_v39 = vrot.slane %v2702_v47, 5  ;;  %v12423_v25 = vrot.slane %v12406_v13, 5  ;;  %v8950_v13 = vld [vmem:[#allocation9 + $0x270] ss:$8 sps:$4 sm:$0xff]  }
 0x1ec   :  { %2158 = vmatprep.subr.bf16.mxu1 %v8937_v15  ;;  %v2691_v46 = vor.u32 %v2690_v21, %v2687_v2  ;;  %v2701_v15 = vrot.slane %v2699_v41, 4  ;;  %v8938_v2 = vld [vmem:[#allocation9 + $0x230] ss:$8 sps:$4 sm:$0xff]   ;;  %v2710_v38 = vrot.slane %v2708_v45, 5  ;;  %v8943_v41 = vld [vmem:[#allocation9 + $0x244] ss:$8 sps:$4 sm:$0xff]  }
 0x1ed   :  { %v12420_v45 = vld [vmem:[#allocation50_spill] sm:$0xff] }
 0x1ee   :  { %1767 = vmatmul.mubr.bf16.gmra.mrb[4].mxu1 %v10419_v58  ;;  %v2692_v21 = vrot.slane %v2691_v46, 4  ;;  %v2705_v47 = vor.u32 %v2704_v39, %v2701_v15  ;;  %v3087_v58 = vrot.slane %v10405_v34, 5  ;;  %v12421_v34 = vld [vmem:[#allocation47_spill] sm:$0xff] }
 0x1ef   :  { %2159 = vmatpush1.bf16.msra.mxu1 %v8935_v20  ;;  %1776 = vmatprep.mubr.bf16.mxu1 %v10423_v59  ;;  %v12427_v20 = vld [vmem:[#allocation46_spill] sm:$0xff] }
 0x1f0   :  { %2160 = vmatprep.subr.bf16.mxu1 %v8940_v56  ;;  %v10491_v46 = vsel %vm9678_vm9, %v2692_v21, %v2696_v43  ;;  %v2706_v39 = vrot.slane %v2705_v47, 4  ;;  %v10505_v43 = vsel %vm10260_vm12, %v7822_v33, %v3087_v58  ;;  %v8941_v21 = vld [vmem:[#allocation9 + $0x240] ss:$8 sps:$4 sm:$0xff]   ;;  %v12417_v47 = vld [vmem:[#allocation44_spill] sm:$0xff]  ;;  %v10527_v56 = vcombine.low %v12421_v34, %v12420_v45 }
 0x1f1   :  { %v10517_v7 = vcombine.low %v12418_v27, %v12417_v47  ;;  %v8946_v33 = vld [vmem:[#allocation9 + $0x254] ss:$8 sps:$4 sm:$0xff]  }
 0x1f2   :  { %v10521_v58 = vsel %vm9678_vm9, %v2706_v39, %v2710_v38  ;;  %12422 = vst [vmem:[#allocation37_spill] sm:$0xff] %v10527_v56  ;;  %v12424_v39 = vrot.slane %v9651_v9, 9  ;;  %v8955_v9 = vld [vmem:[#allocation9 + $0x284] ss:$8 sps:$4 sm:$0xff]  }
 0x1f3   :  { %2161 = vmatpush1.bf16.msra.mxu1 %v8938_v2  ;;  %12419 = vst [vmem:[#allocation27_spill] sm:$0xff] %v10517_v7  ;;  %v7823_v2 = vrot.slane %v10439_v40, 9  ;;  %v8944_v40 = vld [vmem:[#allocation9 + $0x250] ss:$8 sps:$4 sm:$0xff]  }
 0x1f4   :  { %2162 = vmatprep.subr.bf16.mxu1 %v8943_v41  ;;  %v10545_v41 = vsel %vm10260_vm12, %v12424_v39, %v12423_v25  ;;  %v8947_v25 = vld [vmem:[#allocation9 + $0x260] ss:$8 sps:$4 sm:$0xff]  }
 0x1f5   :  { %v10536_v38 = vsel %vm10260_vm12, %v7823_v2, %v3091_v37  ;;  %12425 = vst [vmem:[#allocation31_spill] sm:$0xff] %v10545_v41  ;;  %v8949_v37 = vld [vmem:[#allocation9 + $0x264] ss:$8 sps:$4 sm:$0xff]   ;;  %v8953_v2 = vld [vmem:[#allocation9 + $0x280] ss:$8 sps:$4 sm:$0xff]  }
 0x1f6   :  { %1777 = vmatmul.mubr.bf16.gmra.mrb[8].mxu1 %v10517_v7  ;;  %v12426_v39 = vld [vmem:[#allocation49_spill] sm:$0xff]  ;;  %v12432_v7 = vld [vmem:[#allocation58_spill] sm:$0xff] }
 0x1f7   :  { %2163 = vmatpush1.bf16.msra.mxu1 %v8941_v21  ;;  %1786 = vmatprep.mubr.bf16.mxu1 %v10527_v56  ;;  %v10561_v15 = vcombine.low %v12427_v20, %v12426_v39  ;;  %v7620_v21 = vcombine.low %v9641_v0, %v12429_v29  ;;  %v12431_v56 = vld [vmem:[#allocation74_spill] sm:$0xff] }
 0x1f8   :  { %2164 = vmatprep.subr.bf16.mxu1 %v8946_v33  ;;  %v8952_v33 = vld [vmem:[#allocation9 + $0x274] ss:$8 sps:$4 sm:$0xff]   ;;  %v10570_v59 = vcombine.low %v12432_v7, %v12431_v56 }
 0x1f9   :  { %12428 = vst [vmem:[#allocation45_spill] sm:$0xff] %v10561_v15 }
 0x1fa   :  { %12433 = vst [vmem:[#allocation40_spill] sm:$0xff] %v10570_v59 }
 0x1fb   :  { %2165 = vmatpush1.bf16.msra.mxu1 %v8944_v40  ;;  %v12430_v40 = vld [vmem:[#allocation52_spill] sm:$0xff] }
 0x1fc   :  { %2166 = vmatprep.subr.bf16.mxu1 %v8949_v37  ;;  %v7619_v37 = vcombine.low %v9641_v0, %v12430_v40  ;;  %v8964_v0 = vld [vmem:[#allocation9 + $0x2b4] ss:$8 sps:$4 sm:$0xff]  }
 0x1fe   :  { %1787 = vmatmul.mubr.bf16.gmra.mrb[12].mxu1 %v10561_v15 }
 0x1ff   :  { %2167 = vmatpush1.bf16.msra.mxu1 %v8947_v25  ;;  %1796 = vmatprep.mubr.bf16.mxu1 %v7620_v21  ;;  %v8956_v25 = vld [vmem:[#allocation9 + $0x290] ss:$8 sps:$4 sm:$0xff]   ;;  %v8961_v21 = vld [vmem:[#allocation9 + $0x2a4] ss:$8 sps:$4 sm:$0xff]  }
 0x200   :  { %2168 = vmatprep.subr.bf16.mxu1 %v8952_v33  ;;  %v8959_v33 = vld [vmem:[#allocation9 + $0x2a0] ss:$8 sps:$4 sm:$0xff]  }
 0x203   :  { %2169 = vmatpush1.bf16.msra.mxu1 %v8950_v13  ;;  %v12434_v13 = vld [vmem:[#allocation73_spill] sm:$0xff] }
 0x204   :  { %2170 = vmatprep.subr.bf16.mxu1 %v8955_v9  ;;  %v12435_v9 = vld [vmem:[#allocation57_spill] sm:$0xff] }
 0x205   :  { %v10575_v15 = vcombine.low %v12435_v9, %v12434_v13 }
 0x206   :  { %1797 = vmatmul.mubr.bf16.gmra.mrb[16].mxu1 %v7619_v37  ;;  %v8962_v37 = vld [vmem:[#allocation9 + $0x2b0] ss:$8 sps:$4 sm:$0xff]  }
 0x207   :  { %2171 = vmatpush1.bf16.msra.mxu1 %v8953_v2  ;;  %1806 = vmatprep.mubr.bf16.mxu1 %v10570_v59  ;;  %12436 = vst [vmem:[#allocation77_spill] sm:$0xff] %v10575_v15  ;;  %v8967_v2 = vld [vmem:[#allocation9 + $0x2c4] ss:$8 sps:$4 sm:$0xff]   ;;  %v8965_v59 = vld [vmem:[#allocation9 + $0x2c0] ss:$8 sps:$4 sm:$0xff]  }
 0x208   :  { %2172 = vmatprep.subr.bf16.mxu1 %v8958_v19  ;;  %v8970_v19 = vld [vmem:[#allocation9 + $0x2d4] ss:$8 sps:$4 sm:$0xff]  }
 0x20b   :  { %2173 = vmatpush1.bf16.msra.mxu1 %v8956_v25  ;;  %v8968_v25 = vld [vmem:[#allocation9 + $0x2d0] ss:$8 sps:$4 sm:$0xff]  }
 0x20c   :  { %2174 = vmatprep.subr.bf16.mxu1 %v8961_v21  ;;  %v8973_v21 = vld [vmem:[#allocation9 + $0x2e4] ss:$8 sps:$4 sm:$0xff]  }
 0x20e   :  { %1807 = vmatmul.mubr.bf16.gmra.mrb[20].mxu1 %v10575_v15  ;;  %v8971_v15 = vld [vmem:[#allocation9 + $0x2e0] ss:$8 sps:$4 sm:$0xff]  }
 0x20f   :  { %2175 = vmatpush1.bf16.msra.mxu1 %v8959_v33  ;;  %1816 = vmatprep.mubr.bf16.mxu1 %v10220_v3  ;;  %v8976_v33 = vld [vmem:[#allocation9 + $0x2f4] ss:$8 sps:$4 sm:$0xff]  }
 0x210   :  { %2176 = vmatprep.subr.bf16.mxu1 %v8964_v0  ;;  %v7675_v0 = vcombine.high %v10545_v41, %v10433_v35 }
 0x213   :  { %2177 = vmatpush1.bf16.msra.mxu1 %v8962_v37  ;;  %v8974_v37 = vld [vmem:[#allocation9 + $0x2f0] ss:$8 sps:$4 sm:$0xff]  }
 0x214   :  { %2178 = vmatprep.subr.bf16.mxu1 %v8967_v2  ;;  %v8979_v2 = vld [vmem:[#allocation9 + $0x304] ss:$8 sps:$4 sm:$0xff]  }
 0x216   :  { %1817 = vmatmul.mubr.bf16.gmra.mrb[24].mxu1 %v10224_v6 }
 0x217   :  { %2179 = vmatpush1.bf16.msra.mxu1 %v8965_v59  ;;  %1826 = vmatprep.mubr.bf16.mxu1 %v10228_v14  ;;  %v8977_v59 = vld [vmem:[#allocation9 + $0x300] ss:$8 sps:$4 sm:$0xff]  }
 0x218   :  { %2180 = vmatprep.subr.bf16.mxu1 %v8970_v19  ;;  %v7674_v19 = vcombine.low %v10545_v41, %v10433_v35 }
 0x21b   :  { %2181 = vmatpush1.bf16.msra.mxu1 %v8968_v25  ;;  %v8982_v25 = vld [vmem:[#allocation9 + $0x314] ss:$8 sps:$4 sm:$0xff]  }
 0x21c   :  { %2182 = vmatprep.subr.bf16.mxu1 %v8973_v21  ;;  %v10588_v21 = vcombine.high %v10447_v8, %v10451_v63 }
 0x21e   :  { %1827 = vmatmul.mubr.bf16.gmra.mrb[28].mxu1 %v10232_v12  ;;  %12437 = vst [vmem:[#allocation70_spill] sm:$0xff] %v10588_v21 }
 0x21f   :  { %2183 = vmatpush1.bf16.msra.mxu1 %v8971_v15  ;;  %2186 = vmatprep.mubr.bf16.mxu1 %v7675_v0  ;;  %v8980_v15 = vld [vmem:[#allocation9 + $0x310] ss:$8 sps:$4 sm:$0xff]   ;;  %v8985_v0 = vld [vmem:[#allocation9 + $0x324] ss:$8 sps:$4 sm:$0xff]  }
 0x220   :  { %2184 = vmatprep.subr.bf16.mxu1 %v8976_v33  ;;  %v8983_v33 = vld [vmem:[#allocation9 + $0x320] ss:$8 sps:$4 sm:$0xff]  }
 0x223   :  { %2185 = vmatpush1.bf16.msra.mxu1 %v8974_v37  ;;  %v10593_v37 = vcombine.low %v10447_v8, %v10451_v63 }
 0x224   :  { %2531 = vmatprep.subr.bf16.mxu1 %v8979_v2  ;;  %v8988_v2 = vld [vmem:[#allocation9 + $0x334] ss:$8 sps:$4 sm:$0xff]  }
 0x225   :  { %12438 = vst [vmem:[#allocation44_spill] sm:$0xff] %v10593_v37 }
 0x226   :  { %2187 = vmatmul.mubr.bf16.vlgmr.msra.gmra.mrb[0].mxu1 %v7674_v19  ;;  %v8986_v19 = vld [vmem:[#allocation9 + $0x330] ss:$8 sps:$4 sm:$0xff]  }
 0x227   :  { %2532 = vmatpush1.bf16.msra.mxu1 %v8977_v59  ;;  %2196 = vmatprep.mubr.bf16.mxu1 %v10588_v21  ;;  %v8991_v59 = vld [vmem:[#allocation9 + $0x344] ss:$8 sps:$4 sm:$0xff]   ;;  %v8989_v21 = vld [vmem:[#allocation9 + $0x340] ss:$8 sps:$4 sm:$0xff]  }
 0x228   :  { %2533 = vmatprep.subr.bf16.mxu1 %v8982_v25  ;;  %v8994_v25 = vld [vmem:[#allocation9 + $0x354] ss:$8 sps:$4 sm:$0xff]  }
 0x22b   :  { %2534 = vmatpush1.bf16.msra.mxu1 %v8980_v15  ;;  %v8992_v15 = vld [vmem:[#allocation9 + $0x350] ss:$8 sps:$4 sm:$0xff]  }
 0x22c   :  { %2535 = vmatprep.subr.bf16.mxu1 %v8985_v0  ;;  %v8997_v0 = vld [vmem:[#allocation9 + $0x364] ss:$8 sps:$4 sm:$0xff]  }
 0x22e   :  { %2197 = vmatmul.mubr.bf16.gmra.mrb[4].mxu1 %v10593_v37  ;;  %v8995_v37 = vld [vmem:[#allocation9 + $0x360] ss:$8 sps:$4 sm:$0xff]  }
 0x22f   :  { %2536 = vmatpush1.bf16.msra.mxu1 %v8983_v33  ;;  %2206 = vmatprep.mubr.bf16.mxu1 %v10282_v26  ;;  %v9000_v33 = vld [vmem:[#allocation9 + $0x374] ss:$8 sps:$4 sm:$0xff]  }
 0x230   :  { %2537 = vmatprep.subr.bf16.mxu1 %v8988_v2  ;;  %v7683_v2 = vcombine.high %v10545_v41, %v10299_v48 }
 0x233   :  { %2538 = vmatpush1.bf16.msra.mxu1 %v8986_v19  ;;  %v8998_v19 = vld [vmem:[#allocation9 + $0x370] ss:$8 sps:$4 sm:$0xff]  }
 0x234   :  { %2539 = vmatprep.subr.bf16.mxu1 %v8991_v59  ;;  %v9003_v59 = vld [vmem:[#allocation9 + $0x384] ss:$8 sps:$4 sm:$0xff]  }
 0x236   :  { %2207 = vmatmul.mubr.bf16.gmra.mrb[8].mxu1 %v10286_v42 }
 0x237   :  { %2540 = vmatpush1.bf16.msra.mxu1 %v8989_v21  ;;  %2216 = vmatprep.mubr.bf16.mxu1 %v10307_v22  ;;  %v9001_v21 = vld [vmem:[#allocation9 + $0x380] ss:$8 sps:$4 sm:$0xff]   ;;  %v9009_v22 = vld [vmem:[#allocation9 + $0x3a4] ss:$8 sps:$4 sm:$0xff]  }
 0x238   :  { %2541 = vmatprep.subr.bf16.mxu1 %v8994_v25  ;;  %v7682_v25 = vcombine.low %v10545_v41, %v10299_v48 }
 0x23b   :  { %2542 = vmatpush1.bf16.msra.mxu1 %v8992_v15  ;;  %v9006_v15 = vld [vmem:[#allocation9 + $0x394] ss:$8 sps:$4 sm:$0xff]  }
 0x23c   :  { %2543 = vmatprep.subr.bf16.mxu1 %v8997_v0  ;;  %v9004_v0 = vld [vmem:[#allocation9 + $0x390] ss:$8 sps:$4 sm:$0xff]  }
 0x23e   :  { %2217 = vmatmul.mubr.bf16.gmra.mrb[12].mxu1 %v10311_v31 }
 0x23f   :  { %2544 = vmatpush1.bf16.msra.mxu1 %v8995_v37  ;;  %2226 = vmatprep.mubr.bf16.mxu1 %v7683_v2  ;;  %v9007_v37 = vld [vmem:[#allocation9 + $0x3a0] ss:$8 sps:$4 sm:$0xff]   ;;  %v9012_v2 = vld [vmem:[#allocation9 + $0x3b4] ss:$8 sps:$4 sm:$0xff]  }
 0x240   :  { %2545 = vmatprep.subr.bf16.mxu1 %v9000_v33  ;;  %v9010_v33 = vld [vmem:[#allocation9 + $0x3b0] ss:$8 sps:$4 sm:$0xff]  }
 0x243   :  { %2546 = vmatpush1.bf16.msra.mxu1 %v8998_v19  ;;  %v9015_v19 = vld [vmem:[#allocation9 + $0x3c4] ss:$8 sps:$4 sm:$0xff]  }
 0x244   :  { %2547 = vmatprep.subr.bf16.mxu1 %v9003_v59  ;;  %v9013_v59 = vld [vmem:[#allocation9 + $0x3c0] ss:$8 sps:$4 sm:$0xff]  }
 0x246   :  { %2227 = vmatmul.mubr.bf16.gmra.mrb[16].mxu1 %v7682_v25  ;;  %v12439_v25 = vld [vmem:[#allocation90_spill] sm:$0xff] }
 0x247   :  { %2548 = vmatpush1.bf16.msra.mxu1 %v9001_v21  ;;  %2236 = vmatprep.mubr.bf16.mxu1 %v10337_v32  ;;  %v9018_v21 = vld [vmem:[#allocation9 + $0x3d4] ss:$8 sps:$4 sm:$0xff]  }
 0x248   :  { %2549 = vmatprep.subr.bf16.mxu1 %v9006_v15  ;;  %v9016_v15 = vld [vmem:[#allocation9 + $0x3d0] ss:$8 sps:$4 sm:$0xff]  }
 0x249   :  { %v12442_v32 = vld [vmem:[#allocation91_spill] sm:$0xff] }
 0x24b   :  { %2550 = vmatpush1.bf16.msra.mxu1 %v9004_v0  ;;  %v9019_v0 = vld [vmem:[#allocation9 + $0x3e0] ss:$8 sps:$4 sm:$0xff]  }
 0x24c   :  { %2551 = vmatprep.subr.bf16.mxu1 %v9009_v22  ;;  %v9021_v22 = vld [vmem:[#allocation9 + $0x3e4] ss:$8 sps:$4 sm:$0xff]  }
 0x24e   :  { %2237 = vmatmul.mubr.bf16.gmra.mrb[20].mxu1 %v10341_v30  ;;  %v12441_v30 = vld [vmem:[#allocation30_spill] sm:$0xff] }
 0x24f   :  { %2552 = vmatpush1.bf16.msra.mxu1 %v9007_v37  ;;  %2246 = vmatprep.mubr.bf16.mxu1 %v10356_v24  ;;  %v9024_v37 = vld [vmem:[#allocation9 + $0x3f4] ss:$8 sps:$4 sm:$0xff]  }
 0x250   :  { %2553 = vmatprep.subr.bf16.mxu1 %v9012_v2  ;;  %v12440_v24 = vld [vmem:[#allocation32_spill] sm:$0xff] }
 0x251   :  { %v7723_v2 = vcombine.low %v12441_v30, %v12440_v24  ;;  %v9028_v30 = vld [vmem:[#allocation9 + $0x410] ss:$8 sps:$4 sm:$0xff]   ;;  %v9033_v24 = vld [vmem:[#allocation9 + $0x424] ss:$8 sps:$4 sm:$0xff]  }
 0x253   :  { %2554 = vmatpush1.bf16.msra.mxu1 %v9010_v33  ;;  %v9022_v33 = vld [vmem:[#allocation9 + $0x3f0] ss:$8 sps:$4 sm:$0xff]  }
 0x254   :  { %2555 = vmatprep.subr.bf16.mxu1 %v9015_v19  ;;  %v9027_v19 = vld [vmem:[#allocation9 + $0x404] ss:$8 sps:$4 sm:$0xff]  }
 0x256   :  { %2247 = vmatmul.mubr.bf16.gmra.mrb[24].mxu1 %v10360_v11 }
 0x257   :  { %2556 = vmatpush1.bf16.msra.mxu1 %v9013_v59  ;;  %2256 = vmatprep.mubr.bf16.mxu1 %v12439_v25  ;;  %v9025_v59 = vld [vmem:[#allocation9 + $0x400] ss:$8 sps:$4 sm:$0xff]  }
 0x258   :  { %2557 = vmatprep.subr.bf16.mxu1 %v9018_v21  ;;  %v12443_v21 = vld [vmem:[#allocation29_spill] sm:$0xff] }
 0x259   :  { %v7722_v25 = vcombine.low %v12443_v21, %v12409_v62  ;;  %v7727_v62 = vcombine.low %v12411_v17, %v12421_v34  ;;  %v9040_v17 = vld [vmem:[#allocation9 + $0x450] ss:$8 sps:$4 sm:$0xff]   ;;  %v9043_v34 = vld [vmem:[#allocation9 + $0x460] ss:$8 sps:$4 sm:$0xff]  }
 0x25a   :  { %v12446_v21 = vld [vmem:[#allocation41_spill] sm:$0xff] }
 0x25b   :  { %2558 = vmatpush1.bf16.msra.mxu1 %v9016_v15  ;;  %v9030_v15 = vld [vmem:[#allocation9 + $0x414] ss:$8 sps:$4 sm:$0xff]  }
 0x25c   :  { %2559 = vmatprep.subr.bf16.mxu1 %v9021_v22  ;;  %v12444_v22 = vld [vmem:[#allocation38_spill] sm:$0xff] }
 0x25d   :  { %v7725_v11 = vcombine.low %v12444_v22, %v12412_v4  ;;  %v9034_v4 = vld [vmem:[#allocation9 + $0x430] ss:$8 sps:$4 sm:$0xff]   ;;  %v9048_v22 = vld [vmem:[#allocation9 + $0x474] ss:$8 sps:$4 sm:$0xff]  }
 0x25e   :  { %2257 = vmatmul.mubr.bf16.gmra.mrb[28].mxu1 %v12442_v32 }
 0x25f   :  { %2560 = vmatpush1.bf16.msra.mxu1 %v9019_v0  ;;  %2563 = vmatprep.mubr.bf16.mxu1 %v7723_v2  ;;  %v9031_v0 = vld [vmem:[#allocation9 + $0x420] ss:$8 sps:$4 sm:$0xff]   ;;  %v9036_v2 = vld [vmem:[#allocation9 + $0x434] ss:$8 sps:$4 sm:$0xff]  }
 0x260   :  { %2561 = vmatprep.subr.bf16.mxu1 %v9024_v37  ;;  %v7724_v37 = vcombine.low %v12408_v51, %v12418_v27  ;;  %v9045_v27 = vld [vmem:[#allocation9 + $0x464] ss:$8 sps:$4 sm:$0xff]  }
 0x263   :  { %2562 = vmatpush1.bf16.msra.mxu1 %v9022_v33  ;;  %v7726_v33 = vcombine.low %v12417_v47, %v12427_v20  ;;  %v7731_v20 = vcombine.low %v12429_v29, %v12432_v7  ;;  %v9051_v47 = vld [vmem:[#allocation9 + $0x484] ss:$8 sps:$4 sm:$0xff]   ;;  %v9052_v7 = vld [vmem:[#allocation9 + $0x490] ss:$8 sps:$4 sm:$0xff]  }
 0x264   :  { %2940 = vmatprep.subr.bf16.mxu1 %v9027_v19  ;;  %v9042_v19 = vld [vmem:[#allocation9 + $0x454] ss:$8 sps:$4 sm:$0xff]   ;;  %v9057_v29 = vld [vmem:[#allocation9 + $0x4a4] ss:$8 sps:$4 sm:$0xff]  }
 0x266   :  { %2564 = vmatmul.mubr.bf16.vlgmr.msra.gmra.mrb[0].mxu1 %v7722_v25  ;;  %v9039_v25 = vld [vmem:[#allocation9 + $0x444] ss:$8 sps:$4 sm:$0xff]  }
 0x267   :  { %2941 = vmatpush1.bf16.msra.mxu1 %v9025_v59  ;;  %2573 = vmatprep.mubr.bf16.mxu1 %v7725_v11  ;;  %v9037_v11 = vld [vmem:[#allocation9 + $0x440] ss:$8 sps:$4 sm:$0xff]  }
 0x268   :  { %2942 = vmatprep.subr.bf16.mxu1 %v9030_v15  ;;  %v12445_v59 = vld [vmem:[#allocation34_spill] sm:$0xff]  ;;  %v7728_v15 = vcombine.low %v12426_v39, %v12446_v21 }
 0x269   :  { %v7729_v51 = vcombine.low %v12420_v45, %v12445_v59  ;;  %v9046_v45 = vld [vmem:[#allocation9 + $0x470] ss:$8 sps:$4 sm:$0xff]  }
 0x26b   :  { %2943 = vmatpush1.bf16.msra.mxu1 %v9028_v30  ;;  %v9049_v30 = vld [vmem:[#allocation9 + $0x480] ss:$8 sps:$4 sm:$0xff]  }
 0x26c   :  { %2944 = vmatprep.subr.bf16.mxu1 %v9033_v24  ;;  %v7730_v24 = vcombine.low %v12430_v40, %v12435_v9  ;;  %v12449_v40 = vld [vmem:[#allocation68_spill] sm:$0xff] }
 0x26d   :  { %v12450_v9 = vcombine.low %v10032_v28, %v12449_v40  ;;  %v9069_v28 = vld [vmem:[#allocation9 + $0x4e4] ss:$8 sps:$4 sm:$0xff]  }
 0x26e   :  { %2574 = vmatmul.mubr.bf16.gmra.mrb[4].mxu1 %v7724_v37  ;;  %v12447_v37 = vld [vmem:[#allocation61_spill] sm:$0xff] }
 0x26f   :  { %2945 = vmatpush1.bf16.msra.mxu1 %v9031_v0  ;;  %2583 = vmatprep.mubr.bf16.mxu1 %v7727_v62  ;;  %v9054_v0 = vld [vmem:[#allocation9 + $0x494] ss:$8 sps:$4 sm:$0xff]   ;;  %v7733_v39 = vcombine.low %v12431_v56, %v12447_v37  ;;  %v9058_v56 = vld [vmem:[#allocation9 + $0x4b0] ss:$8 sps:$4 sm:$0xff]  }
 0x270   :  { %2946 = vmatprep.subr.bf16.mxu1 %v9036_v2  ;;  %v9055_v2 = vld [vmem:[#allocation9 + $0x4a0] ss:$8 sps:$4 sm:$0xff]   ;;  %v12448_v62 = vld [vmem:[#allocation60_spill] sm:$0xff]  ;;  %v12460_v37 = vld [vmem:[#allocation43_spill] sm:$0xff] }
 0x271   :  { %v12463_v40 = vld [vmem:[#allocation53_spill] sm:$0xff] }
 0x273   :  { %2947 = vmatpush1.bf16.msra.mxu1 %v9034_v4  ;;  %v7732_v4 = vcombine.low %v12434_v13, %v12448_v62  ;;  %v12454_v13 = vld [vmem:[#allocation76_spill] sm:$0xff] }
 0x274   :  { %2948 = vmatprep.subr.bf16.mxu1 %v9039_v25  ;;  %v9060_v25 = vld [vmem:[#allocation9 + $0x4b4] ss:$8 sps:$4 sm:$0xff]  }
 0x276   :  { %2584 = vmatmul.mubr.bf16.gmra.mrb[8].mxu1 %v7726_v33  ;;  %v9061_v33 = vld [vmem:[#allocation9 + $0x4c0] ss:$8 sps:$4 sm:$0xff]  }
 0x277   :  { %2949 = vmatpush1.bf16.msra.mxu1 %v9037_v11  ;;  %2593 = vmatprep.mubr.bf16.mxu1 %v7729_v51  ;;  %v9063_v11 = vld [vmem:[#allocation9 + $0x4c4] ss:$8 sps:$4 sm:$0xff]  }
 0x278   :  { %2950 = vmatprep.subr.bf16.mxu1 %v9042_v19  ;;  %v9066_v19 = vld [vmem:[#allocation9 + $0x4d4] ss:$8 sps:$4 sm:$0xff]   ;;  %v12451_v51 = vld [vmem:[#allocation66_spill] sm:$0xff] }
 0x27b   :  { %2951 = vmatpush1.bf16.msra.mxu1 %v9040_v17  ;;  %v12452_v17 = vld [vmem:[#allocation67_spill] sm:$0xff] }
 0x27c   :  { %2952 = vmatprep.subr.bf16.mxu1 %v9045_v27  ;;  %v12453_v27 = vcombine.low %v12451_v51, %v12452_v17  ;;  %v9084_v51 = vld [vmem:[#allocation9 + $0x534] ss:$8 sps:$4 sm:$0xff]  }
 0x27d   :  { %v12464_v17 = vld [vmem:[#allocation69_spill] sm:$0xff] }
 0x27e   :  { %2594 = vmatmul.mubr.bf16.gmra.mrb[12].mxu1 %v7728_v15 }
 0x27f   :  { %2953 = vmatpush1.bf16.msra.mxu1 %v9043_v34  ;;  %2603 = vmatprep.mubr.bf16.mxu1 %v7731_v20  ;;  %v12455_v34 = vld [vmem:[#allocation35_spill] sm:$0xff]  ;;  %v9067_v20 = vld [vmem:[#allocation9 + $0x4e0] ss:$8 sps:$4 sm:$0xff]  }
 0x280   :  { %2954 = vmatprep.subr.bf16.mxu1 %v9048_v22  ;;  %v12456_v15 = vcombine.low %v12454_v13, %v12455_v34  ;;  %v9064_v22 = vld [vmem:[#allocation9 + $0x4d0] ss:$8 sps:$4 sm:$0xff]  }
 0x283   :  { %2955 = vmatpush1.bf16.msra.mxu1 %v9046_v45  ;;  %v9072_v45 = vld [vmem:[#allocation9 + $0x4f4] ss:$8 sps:$4 sm:$0xff]  }
 0x284   :  { %2956 = vmatprep.subr.bf16.mxu1 %v9051_v47  ;;  %v12457_v47 = vld [vmem:[#allocation51_spill] sm:$0xff] }
 0x286   :  { %2604 = vmatmul.mubr.bf16.gmra.mrb[16].mxu1 %v7730_v24 }
 0x287   :  { %2957 = vmatpush1.bf16.msra.mxu1 %v9049_v30  ;;  %2613 = vmatprep.mubr.bf16.mxu1 %v7733_v39  ;;  %v12458_v30 = vld [vmem:[#allocation48_spill] sm:$0xff] }
 0x288   :  { %2958 = vmatprep.subr.bf16.mxu1 %v9054_v0  ;;  %v7775_v24 = vcombine.high %v12458_v30, %v12457_v47  ;;  %v12459_v0 = vld [vmem:[#allocation75_spill] sm:$0xff]  ;;  %v7774_v62 = vcombine.low %v12458_v30, %v12457_v47  ;;  %v12466_v47 = vcombine.high %v12416_v61, %v10491_v46 }
 0x289   :  { %v12461_v39 = vcombine.low %v12459_v0, %v12460_v37  ;;  %v9088_v30 = vld [vmem:[#allocation9 + $0x550] ss:$8 sps:$4 sm:$0xff]   ;;  %v9091_v0 = vld [vmem:[#allocation9 + $0x560] ss:$8 sps:$4 sm:$0xff]  }
 0x28b   :  { %2959 = vmatpush1.bf16.msra.mxu1 %v9052_v7  ;;  %v9070_v7 = vld [vmem:[#allocation9 + $0x4f0] ss:$8 sps:$4 sm:$0xff]  }
 0x28c   :  { %2960 = vmatprep.subr.bf16.mxu1 %v9057_v29  ;;  %v9075_v29 = vld [vmem:[#allocation9 + $0x504] ss:$8 sps:$4 sm:$0xff]  }
 0x28e   :  { %2614 = vmatmul.mubr.bf16.gmra.mrb[20].mxu1 %v7732_v4  ;;  %v9078_v4 = vld [vmem:[#allocation9 + $0x514] ss:$8 sps:$4 sm:$0xff]  }
 0x28f   :  { %2961 = vmatpush1.bf16.msra.mxu1 %v9055_v2  ;;  %2623 = vmatprep.mubr.bf16.mxu1 %v12450_v9  ;;  %v9073_v2 = vld [vmem:[#allocation9 + $0x500] ss:$8 sps:$4 sm:$0xff]  }
 0x290   :  { %2962 = vmatprep.subr.bf16.mxu1 %v9060_v25  ;;  %v12462_v25 = vld [vmem:[#allocation59_spill] sm:$0xff] }
 0x291   :  { %v7777_v9 = vcombine.high %v12463_v40, %v12462_v25 }
 0x293   :  { %2963 = vmatpush1.bf16.msra.mxu1 %v9058_v56  ;;  %v9076_v56 = vld [vmem:[#allocation9 + $0x510] ss:$8 sps:$4 sm:$0xff]  }
 0x294   :  { %2964 = vmatprep.subr.bf16.mxu1 %v9063_v11  ;;  %v9081_v11 = vld [vmem:[#allocation9 + $0x524] ss:$8 sps:$4 sm:$0xff]  }
 0x296   :  { %2624 = vmatmul.mubr.bf16.gmra.mrb[24].mxu1 %v12453_v27  ;;  %v12465_v27 = vld [vmem:[#allocation62_spill] sm:$0xff] }
 0x297   :  { %2965 = vmatpush1.bf16.msra.mxu1 %v9061_v33  ;;  %2633 = vmatprep.mubr.bf16.mxu1 %v12456_v15  ;;  %v9079_v33 = vld [vmem:[#allocation9 + $0x520] ss:$8 sps:$4 sm:$0xff]   ;;  %v7779_v13 = vcombine.high %v12465_v27, %v12464_v17  ;;  %v9082_v15 = vld [vmem:[#allocation9 + $0x530] ss:$8 sps:$4 sm:$0xff]  }
 0x298   :  { %2966 = vmatprep.subr.bf16.mxu1 %v9066_v19  ;;  %v7776_v19 = vcombine.low %v12463_v40, %v12462_v25  ;;  %v9102_v25 = vld [vmem:[#allocation9 + $0x594] ss:$8 sps:$4 sm:$0xff]   ;;  %v12469_v40 = vcombine.low %v12415_v49, %v10172_v10 }
 0x29b   :  { %2967 = vmatpush1.bf16.msra.mxu1 %v9064_v22  ;;  %v9087_v22 = vld [vmem:[#allocation9 + $0x544] ss:$8 sps:$4 sm:$0xff]  }
 0x29c   :  { %2968 = vmatprep.subr.bf16.mxu1 %v9069_v28  ;;  %v9085_v28 = vld [vmem:[#allocation9 + $0x540] ss:$8 sps:$4 sm:$0xff]  }
 0x29e   :  { %2634 = vmatmul.mubr.bf16.gmra.mrb[28].mxu1 %v12461_v39  ;;  %v9096_v39 = vld [vmem:[#allocation9 + $0x574] ss:$8 sps:$4 sm:$0xff]  }
 0x29f   :  { %2969 = vmatpush1.bf16.msra.mxu1 %v9067_v20  ;;  %2972 = vmatprep.mubr.bf16.mxu1 %v7775_v24  ;;  %v7778_v20 = vcombine.low %v12465_v27, %v12464_v17  ;;  %v9093_v24 = vld [vmem:[#allocation9 + $0x564] ss:$8 sps:$4 sm:$0xff]   ;;  %v9109_v27 = vld [vmem:[#allocation9 + $0x5c0] ss:$8 sps:$4 sm:$0xff]  }
 0x2a0   :  { %2970 = vmatprep.subr.bf16.mxu1 %v9072_v45  ;;  %v9090_v45 = vld [vmem:[#allocation9 + $0x554] ss:$8 sps:$4 sm:$0xff]   ;;  %v9111_v17 = vld [vmem:[#allocation9 + $0x5c4] ss:$8 sps:$4 sm:$0xff]  }
 0x2a3   :  { %2971 = vmatpush1.bf16.msra.mxu1 %v9070_v7  ;;  %v12467_v7 = vcombine.low %v12416_v61, %v10491_v46  ;;  %v12470_v61 = vcombine.high %v10176_v44, %v10188_v60 }
 0x2a4   :  { %3321 = vmatprep.subr.bf16.mxu1 %v9075_v29  ;;  %v12468_v29 = vcombine.high %v12415_v49, %v10172_v10  ;;  %v12472_v10 = vld [vmem:[#allocation82_spill] sm:$0xff] }
 0x2a5   :  { %v12473_v49 = vcombine.high %v10199_v54, %v12472_v10 }
 0x2a6   :  { %2973 = vmatmul.mubr.bf16.vlgmr.msra.gmra.mrb[0].mxu1 %v7774_v62  ;;  %v9099_v62 = vld [vmem:[#allocation9 + $0x584] ss:$8 sps:$4 sm:$0xff]  }
 0x2a7   :  { %3322 = vmatpush1.bf16.msra.mxu1 %v9073_v2  ;;  %2982 = vmatprep.mubr.bf16.mxu1 %v7777_v9  ;;  %v9094_v2 = vld [vmem:[#allocation9 + $0x570] ss:$8 sps:$4 sm:$0xff]  }
 0x2a8   :  { %3323 = vmatprep.subr.bf16.mxu1 %v9078_v4  ;;  %v9097_v4 = vld [vmem:[#allocation9 + $0x580] ss:$8 sps:$4 sm:$0xff]   ;;  %v9100_v9 = vld [vmem:[#allocation9 + $0x590] ss:$8 sps:$4 sm:$0xff]  }
 0x2ab   :  { %3324 = vmatpush1.bf16.msra.mxu1 %v9076_v56  ;;  %v9105_v56 = vld [vmem:[#allocation9 + $0x5a4] ss:$8 sps:$4 sm:$0xff]  }
 0x2ac   :  { %3325 = vmatprep.subr.bf16.mxu1 %v9081_v11  ;;  %v9103_v11 = vld [vmem:[#allocation9 + $0x5a0] ss:$8 sps:$4 sm:$0xff]  }
 0x2ae   :  { %2983 = vmatmul.mubr.bf16.gmra.mrb[4].mxu1 %v7776_v19  ;;  %v12471_v19 = vcombine.low %v10176_v44, %v10188_v60  ;;  %v12475_v44 = vcombine.high %v10237_v5, %v10521_v58  ;;  %v9112_v60 = vld [vmem:[#allocation9 + $0x5d0] ss:$8 sps:$4 sm:$0xff]  }
 0x2af   :  { %3326 = vmatpush1.bf16.msra.mxu1 %v9079_v33  ;;  %2992 = vmatprep.mubr.bf16.mxu1 %v7779_v13  ;;  %v9108_v33 = vld [vmem:[#allocation9 + $0x5b4] ss:$8 sps:$4 sm:$0xff]  }
 0x2b0   :  { %3327 = vmatprep.subr.bf16.mxu1 %v9084_v51  ;;  %v9106_v51 = vld [vmem:[#allocation9 + $0x5b0] ss:$8 sps:$4 sm:$0xff]   ;;  %v9114_v13 = vld [vmem:[#allocation9 + $0x5d4] ss:$8 sps:$4 sm:$0xff]  }
 0x2b3   :  { %3328 = vmatpush1.bf16.msra.mxu1 %v9082_v15  ;;  %v12474_v15 = vcombine.low %v10199_v54, %v12472_v10  ;;  %v12477_v54 = vcombine.high %v10433_v35, %v10447_v8  ;;  %v9147_v10 = vld [vmem:[#allocation9 + $0x684] ss:$8 sps:$4 sm:$0xff]  }
 0x2b4   :  { %3329 = vmatprep.subr.bf16.mxu1 %v9087_v22  ;;  %v9117_v22 = vld [vmem:[#allocation9 + $0x5e4] ss:$8 sps:$4 sm:$0xff]  }
 0x2b6   :  { %2993 = vmatmul.mubr.bf16.gmra.mrb[8].mxu1 %v7778_v20  ;;  %v9120_v20 = vld [vmem:[#allocation9 + $0x5f4] ss:$8 sps:$4 sm:$0xff]  }
 0x2b7   :  { %3330 = vmatpush1.bf16.msra.mxu1 %v9085_v28  ;;  %3002 = vmatprep.mubr.bf16.mxu1 %v12466_v47  ;;  %v9115_v28 = vld [vmem:[#allocation9 + $0x5e0] ss:$8 sps:$4 sm:$0xff]   ;;  %v9118_v47 = vld [vmem:[#allocation9 + $0x5f0] ss:$8 sps:$4 sm:$0xff]  }
 0x2b8   :  { %3331 = vmatprep.subr.bf16.mxu1 %v9090_v45  ;;  %v12476_v45 = vcombine.low %v10237_v5, %v10521_v58  ;;  %v12479_v5 = vcombine.high %v10451_v63, %v10268_v53 }
 0x2bb   :  { %3332 = vmatpush1.bf16.msra.mxu1 %v9088_v30  ;;  %v9123_v30 = vld [vmem:[#allocation9 + $0x604] ss:$8 sps:$4 sm:$0xff]  }
 0x2bc   :  { %3333 = vmatprep.subr.bf16.mxu1 %v9093_v24  ;;  %v9121_v24 = vld [vmem:[#allocation9 + $0x600] ss:$8 sps:$4 sm:$0xff]  }
 0x2be   :  { %3003 = vmatmul.mubr.bf16.gmra.mrb[12].mxu1 %v12467_v7  ;;  %v9124_v7 = vld [vmem:[#allocation9 + $0x610] ss:$8 sps:$4 sm:$0xff]  }
 0x2bf   :  { %3334 = vmatpush1.bf16.msra.mxu1 %v9091_v0  ;;  %3012 = vmatprep.mubr.bf16.mxu1 %v12468_v29  ;;  %v9126_v0 = vld [vmem:[#allocation9 + $0x614] ss:$8 sps:$4 sm:$0xff]   ;;  %v9129_v29 = vld [vmem:[#allocation9 + $0x624] ss:$8 sps:$4 sm:$0xff]  }
 0x2c0   :  { %3335 = vmatprep.subr.bf16.mxu1 %v9096_v39  ;;  %v12478_v39 = vcombine.low %v10433_v35, %v10447_v8  ;;  %v12481_v35 = vcombine.high %v10275_v52, %v10290_v16  ;;  %v9130_v8 = vld [vmem:[#allocation9 + $0x630] ss:$8 sps:$4 sm:$0xff]  }
 0x2c3   :  { %3336 = vmatpush1.bf16.msra.mxu1 %v9094_v2  ;;  %v9127_v2 = vld [vmem:[#allocation9 + $0x620] ss:$8 sps:$4 sm:$0xff]  }
 0x2c4   :  { %3337 = vmatprep.subr.bf16.mxu1 %v9099_v62  ;;  %v9132_v62 = vld [vmem:[#allocation9 + $0x634] ss:$8 sps:$4 sm:$0xff]  }
 0x2c6   :  { %3013 = vmatmul.mubr.bf16.gmra.mrb[16].mxu1 %v12469_v40  ;;  %v9133_v40 = vld [vmem:[#allocation9 + $0x640] ss:$8 sps:$4 sm:$0xff]  }
 0x2c7   :  { %3338 = vmatpush1.bf16.msra.mxu1 %v9097_v4  ;;  %3022 = vmatprep.mubr.bf16.mxu1 %v12470_v61  ;;  %v12480_v4 = vcombine.low %v10451_v63, %v10268_v53  ;;  %v9138_v61 = vld [vmem:[#allocation9 + $0x654] ss:$8 sps:$4 sm:$0xff]   ;;  %v12483_v53 = vcombine.high %v10295_v50, %v10505_v43  ;;  %v9136_v63 = vld [vmem:[#allocation9 + $0x650] ss:$8 sps:$4 sm:$0xff]  }
 0x2c8   :  { %3339 = vmatprep.subr.bf16.mxu1 %v9102_v25  ;;  %v9135_v25 = vld [vmem:[#allocation9 + $0x644] ss:$8 sps:$4 sm:$0xff]  }
 0x2cb   :  { %3340 = vmatpush1.bf16.msra.mxu1 %v9100_v9  ;;  %v12482_v9 = vcombine.low %v10275_v52, %v10290_v16  ;;  %v12485_v52 = vcombine.high %v10299_v48, %v10315_v57  ;;  %v9142_v16 = vld [vmem:[#allocation9 + $0x670] ss:$8 sps:$4 sm:$0xff]  }
 0x2cc   :  { %3341 = vmatprep.subr.bf16.mxu1 %v9105_v56  ;;  %v9141_v56 = vld [vmem:[#allocation9 + $0x664] ss:$8 sps:$4 sm:$0xff]  }
 0x2ce   :  { %3023 = vmatmul.mubr.bf16.gmra.mrb[20].mxu1 %v12471_v19  ;;  %v12484_v19 = vcombine.low %v10295_v50, %v10505_v43  ;;  %v12487_v50 = vcombine.high %v10327_v1, %v10331_v18 }
 0x2cf   :  { %3342 = vmatpush1.bf16.msra.mxu1 %v9103_v11  ;;  %3032 = vmatprep.mubr.bf16.mxu1 %v12473_v49  ;;  %v9139_v11 = vld [vmem:[#allocation9 + $0x660] ss:$8 sps:$4 sm:$0xff]  }
 0x2d0   :  { %3343 = vmatprep.subr.bf16.mxu1 %v9108_v33  ;;  %v9144_v33 = vld [vmem:[#allocation9 + $0x674] ss:$8 sps:$4 sm:$0xff]   ;;  %v9145_v49 = vld [vmem:[#allocation9 + $0x680] ss:$8 sps:$4 sm:$0xff]  }
 0x2d3   :  { %3344 = vmatpush1.bf16.msra.mxu1 %v9106_v51  ;;  %v9150_v51 = vld [vmem:[#allocation9 + $0x694] ss:$8 sps:$4 sm:$0xff]  }
 0x2d4   :  { %3345 = vmatprep.subr.bf16.mxu1 %v9111_v17  ;;  %v12486_v17 = vcombine.low %v10299_v48, %v10315_v57  ;;  %v12489_v48 = vcombine.high %v10345_v55, %v10349_v23  ;;  %v9154_v57 = vld [vmem:[#allocation9 + $0x6b0] ss:$8 sps:$4 sm:$0xff]  }
 0x2d6   :  { %3033 = vmatmul.mubr.bf16.gmra.mrb[24].mxu1 %v12474_v15  ;;  %v9151_v15 = vld [vmem:[#allocation9 + $0x6a0] ss:$8 sps:$4 sm:$0xff]  }
 0x2d7   :  { %3346 = vmatpush1.bf16.msra.mxu1 %v9109_v27  ;;  %3042 = vmatprep.mubr.bf16.mxu1 %v12475_v44  ;;  %v9148_v27 = vld [vmem:[#allocation9 + $0x690] ss:$8 sps:$4 sm:$0xff]   ;;  %v9156_v44 = vld [vmem:[#allocation9 + $0x6b4] ss:$8 sps:$4 sm:$0xff]  }
 0x2d8   :  { %3347 = vmatprep.subr.bf16.mxu1 %v9114_v13  ;;  %v9153_v13 = vld [vmem:[#allocation9 + $0x6a4] ss:$8 sps:$4 sm:$0xff]  }
 0x2db   :  { %3348 = vmatpush1.bf16.msra.mxu1 %v9112_v60  ;;  %v12488_v60 = vcombine.low %v10327_v1, %v10331_v18  ;;  %v12491_v1 = vcombine.high %v10364_v36, %v10536_v38  ;;  %v9160_v18 = vld [vmem:[#allocation9 + $0x6d0] ss:$8 sps:$4 sm:$0xff]  }
 0x2dc   :  { %3349 = vmatprep.subr.bf16.mxu1 %v9117_v22  ;;  %v9159_v22 = vld [vmem:[#allocation9 + $0x6c4] ss:$8 sps:$4 sm:$0xff]  }
 0x2de   :  { %3043 = vmatmul.mubr.bf16.gmra.mrb[28].mxu1 %v12476_v45  ;;  %v12490_v45 = vcombine.low %v10345_v55, %v10349_v23  ;;  %v9166_v55 = vld [vmem:[#allocation9 + $0x6f0] ss:$8 sps:$4 sm:$0xff]   ;;  %v9171_v23 = vld [vmem:[#allocation9 + $0x704] ss:$8 sps:$4 sm:$0xff]  }
 0x2df   :  { %3350 = vmatpush1.bf16.msra.mxu1 %v9115_v28  ;;  %3353 = vmatprep.mubr.bf16.mxu1 %v12477_v54  ;;  %v9157_v28 = vld [vmem:[#allocation9 + $0x6c0] ss:$8 sps:$4 sm:$0xff]   ;;  %v9165_v54 = vld [vmem:[#allocation9 + $0x6e4] ss:$8 sps:$4 sm:$0xff]  }
 0x2e0   :  { %3351 = vmatprep.subr.bf16.mxu1 %v9120_v20  ;;  %v9162_v20 = vld [vmem:[#allocation9 + $0x6d4] ss:$8 sps:$4 sm:$0xff]  }
 0x2e3   :  { %3352 = vmatpush1.bf16.msra.mxu1 %v9118_v47  ;;  %v9163_v47 = vld [vmem:[#allocation9 + $0x6e0] ss:$8 sps:$4 sm:$0xff]  }
 0x2e4   :  { %3666 = vmatprep.subr.bf16.mxu1 %v9123_v30  ;;  %v9168_v30 = vld [vmem:[#allocation9 + $0x6f4] ss:$8 sps:$4 sm:$0xff]  }
 0x2e6   :  { %3354 = vmatmul.mubr.bf16.vlgmr.msra.gmra.mrb[0].mxu1 %v12478_v39  ;;  %v9169_v39 = vld [vmem:[#allocation9 + $0x700] ss:$8 sps:$4 sm:$0xff]  }
 0x2e7   :  { %3667 = vmatpush1.bf16.msra.mxu1 %v9121_v24  ;;  %3363 = vmatprep.mubr.bf16.mxu1 %v12479_v5  ;;  %v12492_v24 = vcombine.low %v10364_v36, %v10536_v38  ;;  %v9174_v5 = vld [vmem:[#allocation9 + $0x714] ss:$8 sps:$4 sm:$0xff]   ;;  %v9175_v36 = vld [vmem:[#allocation9 + $0x720] ss:$8 sps:$4 sm:$0xff]  }
 0x2e8   :  { %3668 = vmatprep.subr.bf16.mxu1 %v9126_v0  ;;  %v12493_v0 = vld [vmem:[#allocation92_spill] sm:$0xff] }
 0x2eb   :  { %3669 = vmatpush1.bf16.msra.mxu1 %v9124_v7  ;;  %v12494_v7 = vld [vmem:[#allocation36_spill] sm:$0xff] }
 0x2ec   :  { %3670 = vmatprep.subr.bf16.mxu1 %v9129_v29  ;;  %v12495_v29 = vld [vmem:[#allocation42_spill] sm:$0xff] }
 0x2ee   :  { %3364 = vmatmul.mubr.bf16.gmra.mrb[4].mxu1 %v12480_v4  ;;  %v9180_v4 = vld [vmem:[#allocation9 + $0x734] ss:$8 sps:$4 sm:$0xff]  }
 0x2ef   :  { %3671 = vmatpush1.bf16.msra.mxu1 %v9127_v2  ;;  %3373 = vmatprep.mubr.bf16.mxu1 %v12481_v35  ;;  %v9172_v2 = vld [vmem:[#allocation9 + $0x710] ss:$8 sps:$4 sm:$0xff]  }
 0x2f0   :  { %3672 = vmatprep.subr.bf16.mxu1 %v9132_v62  ;;  %v9177_v62 = vld [vmem:[#allocation9 + $0x724] ss:$8 sps:$4 sm:$0xff]  }
 0x2f1   :  { %v12496_v35 = vld [vmem:[#allocation27_spill] sm:$0xff] }
 0x2f3   :  { %3673 = vmatpush1.bf16.msra.mxu1 %v9130_v8  ;;  %v12497_v8 = vld [vmem:[#allocation37_spill] sm:$0xff] }
 0x2f4   :  { %3674 = vmatprep.subr.bf16.mxu1 %v9135_v25  ;;  %v9178_v25 = vld [vmem:[#allocation9 + $0x730] ss:$8 sps:$4 sm:$0xff]  }
 0x2f6   :  { %3374 = vmatmul.mubr.bf16.gmra.mrb[8].mxu1 %v12482_v9  ;;  %v9186_v9 = vld [vmem:[#allocation9 + $0x754] ss:$8 sps:$4 sm:$0xff]  }
 0x2f7   :  { %3675 = vmatpush1.bf16.msra.mxu1 %v9133_v40  ;;  %3383 = vmatprep.mubr.bf16.mxu1 %v12483_v53  ;;  %v9183_v40 = vld [vmem:[#allocation9 + $0x744] ss:$8 sps:$4 sm:$0xff]  }
 0x2f8   :  { %3676 = vmatprep.subr.bf16.mxu1 %v9138_v61  ;;  %v9181_v61 = vld [vmem:[#allocation9 + $0x740] ss:$8 sps:$4 sm:$0xff]  }
 0x2f9   :  { %v12498_v53 = vld [vmem:[#allocation26_spill] sm:$0xff] }
 0x2fb   :  { %3677 = vmatpush1.bf16.msra.mxu1 %v9136_v63  ;;  %v7873_v63 = vcombine.low %v12445_v59, %v12498_v53  ;;  %v9195_v59 = vld [vmem:[#allocation9 + $0x784] ss:$8 sps:$4 sm:$0xff]  }
 0x2fc   :  { %3678 = vmatprep.subr.bf16.mxu1 %v9141_v56  ;;  %v12499_v56 = vld [vmem:[#allocation45_spill] sm:$0xff] }
 0x2fe   :  { %3384 = vmatmul.mubr.bf16.gmra.mrb[12].mxu1 %v12484_v19  ;;  %v9187_v19 = vld [vmem:[#allocation9 + $0x760] ss:$8 sps:$4 sm:$0xff]  }
 0x2ff   :  { %3679 = vmatpush1.bf16.msra.mxu1 %v9139_v11  ;;  %3393 = vmatprep.mubr.bf16.mxu1 %v12485_v52  ;;  %v9184_v11 = vld [vmem:[#allocation9 + $0x750] ss:$8 sps:$4 sm:$0xff]   ;;  %v7872_v52 = vcombine.low %v12446_v21, %v12498_v53  ;;  %v9201_v21 = vld [vmem:[#allocation9 + $0x7a4] ss:$8 sps:$4 sm:$0xff]  }
 0x300   :  { %3680 = vmatprep.subr.bf16.mxu1 %v9144_v33  ;;  %v9189_v33 = vld [vmem:[#allocation9 + $0x764] ss:$8 sps:$4 sm:$0xff]  }
 0x303   :  { %3681 = vmatpush1.bf16.msra.mxu1 %v9142_v16  ;;  %v9192_v16 = vld [vmem:[#allocation9 + $0x774] ss:$8 sps:$4 sm:$0xff]  }
 0x304   :  { %3682 = vmatprep.subr.bf16.mxu1 %v9147_v10  ;;  %v12500_v10 = vld [vmem:[#allocation40_spill] sm:$0xff] }
 0x306   :  { %3394 = vmatmul.mubr.bf16.gmra.mrb[16].mxu1 %v12486_v17  ;;  %v9198_v17 = vld [vmem:[#allocation9 + $0x794] ss:$8 sps:$4 sm:$0xff]  }
 0x307   :  { %3683 = vmatpush1.bf16.msra.mxu1 %v9145_v49  ;;  %3403 = vmatprep.mubr.bf16.mxu1 %v12487_v50  ;;  %v9190_v49 = vld [vmem:[#allocation9 + $0x770] ss:$8 sps:$4 sm:$0xff]   ;;  %v12501_v50 = vld [vmem:[#allocation77_spill] sm:$0xff] }
 0x308   :  { %3684 = vmatprep.subr.bf16.mxu1 %v9150_v51  ;;  %v9193_v51 = vld [vmem:[#allocation9 + $0x780] ss:$8 sps:$4 sm:$0xff]  }
 0x30b   :  { %3685 = vmatpush1.bf16.msra.mxu1 %v9148_v27  ;;  %v9196_v27 = vld [vmem:[#allocation9 + $0x790] ss:$8 sps:$4 sm:$0xff]  }
 0x30c   :  { %3686 = vmatprep.subr.bf16.mxu1 %v9153_v13  ;;  %v9199_v13 = vld [vmem:[#allocation9 + $0x7a0] ss:$8 sps:$4 sm:$0xff]  }
 0x30e   :  { %3404 = vmatmul.mubr.bf16.gmra.mrb[20].mxu1 %v12488_v60  ;;  %v9207_v60 = vld [vmem:[#allocation9 + $0x7c4] ss:$8 sps:$4 sm:$0xff]  }
 0x30f   :  { %3687 = vmatpush1.bf16.msra.mxu1 %v9151_v15  ;;  %3413 = vmatprep.mubr.bf16.mxu1 %v12489_v48  ;;  %v9204_v15 = vld [vmem:[#allocation9 + $0x7b4] ss:$8 sps:$4 sm:$0xff]   ;;  %v9205_v48 = vld [vmem:[#allocation9 + $0x7c0] ss:$8 sps:$4 sm:$0xff]  }
 0x310   :  { %3688 = vmatprep.subr.bf16.mxu1 %v9156_v44  ;;  %v9202_v44 = vld [vmem:[#allocation9 + $0x7b0] ss:$8 sps:$4 sm:$0xff]  }
 0x313   :  { %3689 = vmatpush1.bf16.msra.mxu1 %v9154_v57  ;;  %v9210_v57 = vld [vmem:[#allocation9 + $0x7d4] ss:$8 sps:$4 sm:$0xff]  }
 0x314   :  { %3690 = vmatprep.subr.bf16.mxu1 %v9159_v22  ;;  %v9208_v22 = vld [vmem:[#allocation9 + $0x7d0] ss:$8 sps:$4 sm:$0xff]  }
 0x316   :  { %3414 = vmatmul.mubr.bf16.gmra.mrb[24].mxu1 %v12490_v45  ;;  %v12502_v45 = vld [vmem:[#allocation55_spill] sm:$0xff] }
 0x317   :  { %3691 = vmatpush1.bf16.msra.mxu1 %v9157_v28  ;;  %3423 = vmatprep.mubr.bf16.mxu1 %v12491_v1  ;;  %v9211_v28 = vld [vmem:[#allocation9 + $0x7e0] ss:$8 sps:$4 sm:$0xff]   ;;  %v9214_v1 = vld [vmem:[#allocation9 + $0x7f0] ss:$8 sps:$4 sm:$0xff]  }
 0x318   :  { %3692 = vmatprep.subr.bf16.mxu1 %v9162_v20  ;;  %v9216_v20 = vld [vmem:[#allocation9 + $0x7f4] ss:$8 sps:$4 sm:$0xff]  }
 0x31b   :  { %3693 = vmatpush1.bf16.msra.mxu1 %v9160_v18  ;;  %v9222_v18 = vld [vmem:[#allocation9 + $0x814] ss:$8 sps:$4 sm:$0xff]  }
 0x31c   :  { %3694 = vmatprep.subr.bf16.mxu1 %v9165_v54  ;;  %v12503_v54 = vld [vmem:[#allocation56_spill] sm:$0xff] }
 0x31e   :  { %3424 = vmatmul.mubr.bf16.gmra.mrb[28].mxu1 %v12492_v24  ;;  %v9223_v24 = vld [vmem:[#allocation9 + $0x820] ss:$8 sps:$4 sm:$0xff]  }
 0x31f   :  { %3695 = vmatpush1.bf16.msra.mxu1 %v9163_v47  ;;  %3698 = vmatprep.mubr.bf16.mxu1 %v12493_v0  ;;  %v12504_v47 = vld [vmem:[#allocation64_spill] sm:$0xff] }
 0x320   :  { %3696 = vmatprep.subr.bf16.mxu1 %v9168_v30  ;;  %v9220_v30 = vld [vmem:[#allocation9 + $0x810] ss:$8 sps:$4 sm:$0xff]   ;;  %v9228_v0 = vld [vmem:[#allocation9 + $0x834] ss:$8 sps:$4 sm:$0xff]  }
 0x323   :  { %3697 = vmatpush1.bf16.msra.mxu1 %v9166_v55  ;;  %v12505_v55 = vld [vmem:[#allocation65_spill] sm:$0xff] }
 0x324   :  { %4011 = vmatprep.subr.bf16.mxu1 %v9171_v23  ;;  %v12506_v23 = vld [vmem:[#allocation71_spill] sm:$0xff] }
 0x326   :  { %3699 = vmatmul.mubr.bf16.vlgmr.msra.gmra.mrb[0].mxu1 %v12494_v7  ;;  %v9229_v7 = vld [vmem:[#allocation9 + $0x840] ss:$8 sps:$4 sm:$0xff]  }
 0x327   :  { %4012 = vmatpush1.bf16.msra.mxu1 %v9169_v39  ;;  %3708 = vmatprep.mubr.bf16.mxu1 %v12495_v29  ;;  %v9226_v39 = vld [vmem:[#allocation9 + $0x830] ss:$8 sps:$4 sm:$0xff]   ;;  %v9234_v29 = vld [vmem:[#allocation9 + $0x854] ss:$8 sps:$4 sm:$0xff]  }
 0x328   :  { %4013 = vmatprep.subr.bf16.mxu1 %v9174_v5  ;;  %v9231_v5 = vld [vmem:[#allocation9 + $0x844] ss:$8 sps:$4 sm:$0xff]  }
 0x32b   :  { %4014 = vmatpush1.bf16.msra.mxu1 %v9172_v2  ;;  %v12507_v2 = vld [vmem:[#allocation33_spill] sm:$0xff] }
 0x32c   :  { %4015 = vmatprep.subr.bf16.mxu1 %v9177_v62  ;;  %v7909_v62 = vcombine.high %v10491_v46, %v12507_v2 }
 0x32e   :  { %3709 = vmatmul.mubr.bf16.gmra.mrb[4].mxu1 %v12496_v35  ;;  %v9237_v35 = vld [vmem:[#allocation9 + $0x864] ss:$8 sps:$4 sm:$0xff]  }
 0x32f   :  { %4016 = vmatpush1.bf16.msra.mxu1 %v9175_v36  ;;  %3718 = vmatprep.mubr.bf16.mxu1 %v12497_v8  ;;  %v12508_v36 = vld [vmem:[#allocation72_spill] sm:$0xff]  ;;  %v9235_v8 = vld [vmem:[#allocation9 + $0x860] ss:$8 sps:$4 sm:$0xff]  }
 0x330   :  { %4017 = vmatprep.subr.bf16.mxu1 %v9180_v4  ;;  %v9232_v4 = vld [vmem:[#allocation9 + $0x850] ss:$8 sps:$4 sm:$0xff]  }
 0x333   :  { %4018 = vmatpush1.bf16.msra.mxu1 %v9178_v25  ;;  %v7908_v25 = vcombine.low %v10491_v46, %v12507_v2  ;;  %v9249_v46 = vld [vmem:[#allocation9 + $0x8a4] ss:$8 sps:$4 sm:$0xff]  }
 0x334   :  { %4019 = vmatprep.subr.bf16.mxu1 %v9183_v40  ;;  %v9240_v40 = vld [vmem:[#allocation9 + $0x874] ss:$8 sps:$4 sm:$0xff]  }
 0x336   :  { %3719 = vmatmul.mubr.bf16.gmra.mrb[8].mxu1 %v12499_v56  ;;  %v9241_v56 = vld [vmem:[#allocation9 + $0x880] ss:$8 sps:$4 sm:$0xff]  }
 0x337   :  { %4020 = vmatpush1.bf16.msra.mxu1 %v9181_v61  ;;  %3728 = vmatprep.mubr.bf16.mxu1 %v7873_v63  ;;  %v12509_v61 = vld [vmem:[#allocation78_spill] sm:$0xff] }
 0x338   :  { %4021 = vmatprep.subr.bf16.mxu1 %v9186_v9  ;;  %v9238_v9 = vld [vmem:[#allocation9 + $0x870] ss:$8 sps:$4 sm:$0xff]   ;;  %v9243_v63 = vld [vmem:[#allocation9 + $0x884] ss:$8 sps:$4 sm:$0xff]  }
 0x33b   :  { %4022 = vmatpush1.bf16.msra.mxu1 %v9184_v11  ;;  %v9246_v11 = vld [vmem:[#allocation9 + $0x894] ss:$8 sps:$4 sm:$0xff]  }
 0x33c   :  { %4023 = vmatprep.subr.bf16.mxu1 %v9189_v33  ;;  %v12510_v33 = vld [vmem:[#allocation79_spill] sm:$0xff] }
 0x33e   :  { %3729 = vmatmul.mubr.bf16.gmra.mrb[12].mxu1 %v7872_v52  ;;  %v9244_v52 = vld [vmem:[#allocation9 + $0x890] ss:$8 sps:$4 sm:$0xff]  }
 0x33f   :  { %4024 = vmatpush1.bf16.msra.mxu1 %v9187_v19  ;;  %3738 = vmatprep.mubr.bf16.mxu1 %v12500_v10  ;;  %v12511_v19 = vld [vmem:[#allocation80_spill] sm:$0xff] }
 0x340   :  { %4025 = vmatprep.subr.bf16.mxu1 %v9192_v16  ;;  %v9247_v16 = vld [vmem:[#allocation9 + $0x8a0] ss:$8 sps:$4 sm:$0xff]   ;;  %v9252_v10 = vld [vmem:[#allocation9 + $0x8b4] ss:$8 sps:$4 sm:$0xff]  }
 0x343   :  { %4026 = vmatpush1.bf16.msra.mxu1 %v9190_v49  ;;  %v12512_v49 = vld [vmem:[#allocation81_spill] sm:$0xff] }
 0x344   :  { %4027 = vmatprep.subr.bf16.mxu1 %v9195_v59  ;;  %v12513_v59 = vld [vmem:[#allocation83_spill] sm:$0xff] }
 0x346   :  { %3739 = vmatmul.mubr.bf16.gmra.mrb[16].mxu1 %v12501_v50  ;;  %v9253_v50 = vld [vmem:[#allocation9 + $0x8c0] ss:$8 sps:$4 sm:$0xff]  }
 0x347   :  { %4028 = vmatpush1.bf16.msra.mxu1 %v9193_v51  ;;  %3748 = vmatprep.mubr.bf16.mxu1 %v10220_v3  ;;  %v7875_v3 = vcombine.low %v12455_v34, %v12498_v53  ;;  %v9219_v34 = vld [vmem:[#allocation9 + $0x804] ss:$8 sps:$4 sm:$0xff]   ;;  %v9250_v51 = vld [vmem:[#allocation9 + $0x8b0] ss:$8 sps:$4 sm:$0xff]  }
 0x348   :  { %4029 = vmatprep.subr.bf16.mxu1 %v9198_v17  ;;  %v9255_v17 = vld [vmem:[#allocation9 + $0x8c4] ss:$8 sps:$4 sm:$0xff]  }
 0x34b   :  { %4030 = vmatpush1.bf16.msra.mxu1 %v9196_v27  ;;  %v9258_v27 = vld [vmem:[#allocation9 + $0x8d4] ss:$8 sps:$4 sm:$0xff]  }
 0x34c   :  { %4031 = vmatprep.subr.bf16.mxu1 %v9201_v21  ;;  %v7911_v21 = vcombine.high %v10521_v58, %v12507_v2 }
 0x34e   :  { %3749 = vmatmul.mubr.bf16.gmra.mrb[20].mxu1 %v10224_v6  ;;  %v9213_v6 = vld [vmem:[#allocation9 + $0x7e4] ss:$8 sps:$4 sm:$0xff]  }
 0x34f   :  { %4032 = vmatpush1.bf16.msra.mxu1 %v9199_v13  ;;  %3758 = vmatprep.mubr.bf16.mxu1 %v10228_v14  ;;  %v7874_v14 = vcombine.low %v12460_v37, %v12498_v53  ;;  %v9225_v37 = vld [vmem:[#allocation9 + $0x824] ss:$8 sps:$4 sm:$0xff]   ;;  %v12514_v13 = vld [vmem:[#allocation84_spill] sm:$0xff] }
 0x350   :  { %4033 = vmatprep.subr.bf16.mxu1 %v9204_v15  ;;  %v9256_v15 = vld [vmem:[#allocation9 + $0x8d0] ss:$8 sps:$4 sm:$0xff]  }
 0x353   :  { %4034 = vmatpush1.bf16.msra.mxu1 %v9202_v44  ;;  %v9261_v44 = vld [vmem:[#allocation9 + $0x8e4] ss:$8 sps:$4 sm:$0xff]  }
 0x354   :  { %4035 = vmatprep.subr.bf16.mxu1 %v9207_v60  ;;  %v9259_v60 = vld [vmem:[#allocation9 + $0x8e0] ss:$8 sps:$4 sm:$0xff]  }
 0x356   :  { %3759 = vmatmul.mubr.bf16.gmra.mrb[24].mxu1 %v10232_v12  ;;  %v9217_v12 = vld [vmem:[#allocation9 + $0x800] ss:$8 sps:$4 sm:$0xff]  }
 0x357   :  { %4036 = vmatpush1.bf16.msra.mxu1 %v9205_v48  ;;  %3768 = vmatprep.mubr.bf16.mxu1 %v7875_v3  ;;  %v7910_v48 = vcombine.low %v10521_v58, %v12507_v2  ;;  %v12515_v3 = vld [vmem:[#allocation70_spill] sm:$0xff]  ;;  %v12518_v58 = vcombine.high %v10505_v43, %v10545_v41 }
 0x358   :  { %4037 = vmatprep.subr.bf16.mxu1 %v9210_v57  ;;  %v9264_v57 = vld [vmem:[#allocation9 + $0x8f4] ss:$8 sps:$4 sm:$0xff]  }
 0x35b   :  { %4038 = vmatpush1.bf16.msra.mxu1 %v9208_v22  ;;  %v9262_v22 = vld [vmem:[#allocation9 + $0x8f0] ss:$8 sps:$4 sm:$0xff]  }
 0x35c   :  { %4039 = vmatprep.subr.bf16.mxu1 %v9213_v6  ;;  %v12516_v6 = vld [vmem:[#allocation44_spill] sm:$0xff] }
 0x35e   :  { %3769 = vmatmul.mubr.bf16.gmra.mrb[28].mxu1 %v7874_v14  ;;  %v12519_v14 = vcombine.low %v10505_v43, %v10545_v41  ;;  %v12526_v43 = vcombine.low %v10536_v38, %v10545_v41 }
 0x35f   :  { %4040 = vmatpush1.bf16.msra.mxu1 %v9211_v28  ;;  %4043 = vmatprep.mubr.bf16.mxu1 %v12502_v45  ;;  %v12517_v28 = vld [vmem:[#allocation86_spill] sm:$0xff]  ;;  %v12521_v45 = vld [vmem:[#allocation87_spill] sm:$0xff] }
 0x360   :  { %4041 = vmatprep.subr.bf16.mxu1 %v9216_v20  ;;  %v12520_v20 = vld [vmem:[#allocation63_spill] sm:$0xff] }
 0x363   :  { %4042 = vmatpush1.bf16.msra.mxu1 %v9214_v1  ;;  %v12522_v1 = vld [vmem:[#allocation88_spill] sm:$0xff] }
 0x364   :  { %4356 = vmatprep.subr.bf16.mxu1 %v9219_v34  ;;  %v4501_v34 = vld [vmem:[#allocation11] sm:$0x3] }
 0x366   :  { %4044 = vmatmul.mubr.bf16.vlgmr.msra.gmra.mrb[0].mxu1 %v12503_v54  ;;  %v12528_v54 = vld [vmem:[#allocation25_spill] sm:$0xff] }
 0x367   :  { %4357 = vmatpush1.bf16.msra.mxu1 %v9217_v12  ;;  %4053 = vmatprep.mubr.bf16.mxu1 %v12504_v47  ;;  %v12527_v12 = vld [vmem:[#allocation23_spill] sm:$0xff]  ;;  %v10804_v47 = vrot.slane %v4501_v34, %v12528_v54 }
 0x368   :  { %4358 = vmatprep.subr.bf16.mxu1 %v9222_v18  ;;  %v10801_v18 = vrot.slane %v4501_v34, %v12527_v12 }
 0x36b   :  { %4359 = vmatpush1.bf16.msra.mxu1 %v9220_v30 }
 0x36c   :  { %4360 = vmatprep.subr.bf16.mxu1 %v9225_v37 }
 0x36e   :  { %4054 = vmatmul.mubr.bf16.gmra.mrb[4].mxu1 %v12505_v55 }
 0x36f   :  { %4361 = vmatpush1.bf16.msra.mxu1 %v9223_v24  ;;  %4063 = vmatprep.mubr.bf16.mxu1 %v12506_v23 }
 0x370   :  { %4362 = vmatprep.subr.bf16.mxu1 %v9228_v0 }
 0x373   :  { %4363 = vmatpush1.bf16.msra.mxu1 %v9226_v39 }
 0x374   :  { %4364 = vmatprep.subr.bf16.mxu1 %v9231_v5 }
 0x376   :  { %4064 = vmatmul.mubr.bf16.gmra.mrb[8].mxu1 %v12508_v36 }
 0x377   :  { %4365 = vmatpush1.bf16.msra.mxu1 %v9229_v7  ;;  %4073 = vmatprep.mubr.bf16.mxu1 %v7909_v62 }
 0x378   :  { %4366 = vmatprep.subr.bf16.mxu1 %v9234_v29 }
 0x37b   :  { %4367 = vmatpush1.bf16.msra.mxu1 %v9232_v4 }
 0x37c   :  { %4368 = vmatprep.subr.bf16.mxu1 %v9237_v35 }
 0x37e   :  { %4074 = vmatmul.mubr.bf16.gmra.mrb[12].mxu1 %v7908_v25 }
 0x37f   :  { %4369 = vmatpush1.bf16.msra.mxu1 %v9235_v8  ;;  %4083 = vmatprep.mubr.bf16.mxu1 %v12509_v61 }
 0x380   :  { %4370 = vmatprep.subr.bf16.mxu1 %v9240_v40 }
 0x383   :  { %4371 = vmatpush1.bf16.msra.mxu1 %v9238_v9 }
 0x384   :  { %4372 = vmatprep.subr.bf16.mxu1 %v9243_v63 }
 0x386   :  { %4084 = vmatmul.mubr.bf16.gmra.mrb[16].mxu1 %v12510_v33 }
 0x387   :  { %4373 = vmatpush1.bf16.msra.mxu1 %v9241_v56  ;;  %4093 = vmatprep.mubr.bf16.mxu1 %v12511_v19 }
 0x388   :  { %4374 = vmatprep.subr.bf16.mxu1 %v9246_v11 }
 0x38b   :  { %4375 = vmatpush1.bf16.msra.mxu1 %v9244_v52 }
 0x38c   :  { %4376 = vmatprep.subr.bf16.mxu1 %v9249_v46 }
 0x38e   :  { %4094 = vmatmul.mubr.bf16.gmra.mrb[20].mxu1 %v12512_v49 }
 0x38f   :  { %4377 = vmatpush1.bf16.msra.mxu1 %v9247_v16  ;;  %4103 = vmatprep.mubr.bf16.mxu1 %v12513_v59 }
 0x390   :  { %4378 = vmatprep.subr.bf16.mxu1 %v9252_v10 }
 0x393   :  { %4379 = vmatpush1.bf16.msra.mxu1 %v9250_v51 }
 0x394   :  { %4380 = vmatprep.subr.bf16.mxu1 %v9255_v17 }
 0x396   :  { %4104 = vmatmul.mubr.bf16.gmra.mrb[24].mxu1 %v12514_v13 }
 0x397   :  { %4381 = vmatpush1.bf16.msra.mxu1 %v9253_v50  ;;  %4113 = vmatprep.mubr.bf16.mxu1 %v7911_v21 }
 0x398   :  { %4382 = vmatprep.subr.bf16.mxu1 %v9258_v27 }
 0x39b   :  { %4383 = vmatpush1.bf16.msra.mxu1 %v9256_v15 }
 0x39c   :  { %4384 = vmatprep.subr.bf16.mxu1 %v9261_v44 }
 0x39e   :  { %4114 = vmatmul.mubr.bf16.gmra.mrb[28].mxu1 %v7910_v48 }
 0x39f   :  { %4385 = vmatpush1.bf16.msra.mxu1 %v9259_v60  ;;  %4388 = vmatprep.mubr.bf16.mxu1 %v12515_v3 }
 0x3a0   :  { %4386 = vmatprep.subr.bf16.mxu1 %v9264_v57 }
 0x3a3   :  { %4387 = vmatpush1.bf16.msra.mxu1 %v9262_v22 }
 0x3a6   :  { %4389 = vmatmul.mubr.bf16.vlgmr.msra.gmra.mrb[0].mxu1 %v12516_v6 }
 0x3a7   :  { %4398 = vmatprep.mubr.bf16.mxu1 %v10282_v26  ;;  %v12523_v26 = vld [vmem:[#allocation89_spill] sm:$0xff] }
 0x3ae   :  { %4399 = vmatmul.mubr.bf16.gmra.mrb[4].mxu1 %v10286_v42  ;;  %v12524_v42 = vld [vmem:[#allocation90_spill] sm:$0xff] }
 0x3af   :  { %4408 = vmatprep.mubr.bf16.mxu1 %v12517_v28 }
 0x3b6   :  { %4409 = vmatmul.mubr.bf16.gmra.mrb[8].mxu1 %v10311_v31  ;;  %v12525_v31 = vcombine.high %v10536_v38, %v10545_v41 }
 0x3b7   :  { %4418 = vmatprep.mubr.bf16.mxu1 %v12518_v58 }
 0x3be   :  { %4419 = vmatmul.mubr.bf16.gmra.mrb[12].mxu1 %v12519_v14 }
 0x3bf   :  { %4428 = vmatprep.mubr.bf16.mxu1 %v12520_v20 }
 0x3c6   :  { %4429 = vmatmul.mubr.bf16.gmra.mrb[16].mxu1 %v12521_v45 }
 0x3c7   :  { %4438 = vmatprep.mubr.bf16.mxu1 %v12522_v1 }
 0x3ce   :  { %4439 = vmatmul.mubr.bf16.gmra.mrb[20].mxu1 %v12523_v26 }
 0x3cf   :  { %4448 = vmatprep.mubr.bf16.mxu1 %v12524_v42 }
 0x3d6   :  { %4449 = vmatmul.mubr.bf16.gmra.mrb[24].mxu1 %v12442_v32 }
 0x3d7   :  { %4458 = vmatprep.mubr.bf16.mxu1 %v12525_v31 }
 0x3de   :  { %4459 = vmatmul.mubr.bf16.gmra.mrb[28].mxu1 %v12526_v43 }
 0x479   :  { %v4390_v30 = vpop.f32.mrb[0].mxu1 }
 0x47a   :  { %v10807_v37 = vadd.f32 %v10801_v18, %v4390_v30  ;;  %v4392_v32 = vpop.f32.mrb[1].mxu1 }
 0x47b   :  { %v10810_v24 = vadd.f32 %v10804_v47, %v4392_v32  ;;  %v4394_v0 = vpop.f32.mrb[2].mxu1 }
 0x47c   :  { %v4545_v55 = vmax.f32 %v10807_v37, 0.0  ;;  %v10814_v38 = vadd.f32 %v10801_v18, %v4394_v0  ;;  %v4396_v23 = vpop.f32.mrb[3].mxu1 }
 0x47d   :  { %v4546_v39 = vmax.f32 %v10810_v24, 0.0  ;;  %v10818_v5 = vadd.f32 %v10804_v47, %v4396_v23 }
 0x47e   :  { %v4547_v7 = vmax.f32 %v10814_v38, 0.0 }
 0x47f   :  { %v4548_v29 = vmax.f32 %v10818_v5, 0.0 }
 0x481   :  { %v4400_v62 = vpop.f32.mrb[4].mxu1 }
 0x482   :  { %v10823_v36 = vadd.f32 %v10801_v18, %v4400_v62  ;;  %v4402_v4 = vpop.f32.mrb[5].mxu1 }
 0x483   :  { %v10826_v35 = vadd.f32 %v10804_v47, %v4402_v4  ;;  %v4404_v8 = vpop.f32.mrb[6].mxu1 }
 0x484   :  { %v4549_v25 = vmax.f32 %v10823_v36, 0.0  ;;  %v10830_v40 = vadd.f32 %v10801_v18, %v4404_v8  ;;  %v4406_v61 = vpop.f32.mrb[7].mxu1 }
 0x485   :  { %v4550_v9 = vmax.f32 %v10826_v35, 0.0  ;;  %v10834_v63 = vadd.f32 %v10804_v47, %v4406_v61 }
 0x486   :  { %v4551_v56 = vmax.f32 %v10830_v40, 0.0 }
 0x487   :  { %v4552_v11 = vmax.f32 %v10834_v63, 0.0 }
 0x489   :  { %v4410_v33 = vpop.f32.mrb[8].mxu1 }
 0x48a   :  { %v10839_v19 = vadd.f32 %v10801_v18, %v4410_v33  ;;  %v4412_v52 = vpop.f32.mrb[9].mxu1 }
 0x48b   :  { %v10842_v46 = vadd.f32 %v10804_v47, %v4412_v52  ;;  %v4414_v16 = vpop.f32.mrb[10].mxu1 }
 0x48c   :  { %v4553_v10 = vmax.f32 %v10839_v19, 0.0  ;;  %v10846_v49 = vadd.f32 %v10801_v18, %v4414_v16  ;;  %v4416_v59 = vpop.f32.mrb[11].mxu1 }
 0x48d   :  { %v4554_v51 = vmax.f32 %v10842_v46, 0.0  ;;  %v10850_v17 = vadd.f32 %v10804_v47, %v4416_v59 }
 0x48e   :  { %v4555_v50 = vmax.f32 %v10846_v49, 0.0 }
 0x48f   :  { %v4556_v27 = vmax.f32 %v10850_v17, 0.0 }
 0x491   :  { %v4420_v21 = vpop.f32.mrb[12].mxu1 }
 0x492   :  { %v10855_v13 = vadd.f32 %v10801_v18, %v4420_v21  ;;  %v4422_v15 = vpop.f32.mrb[13].mxu1 }
 0x493   :  { %v10858_v44 = vadd.f32 %v10804_v47, %v4422_v15  ;;  %v4424_v60 = vpop.f32.mrb[14].mxu1 }
 0x494   :  { %v10862_v57 = vadd.f32 %v10801_v18, %v4424_v60  ;;  %v4426_v3 = vpop.f32.mrb[15].mxu1 }
 0x495   :  { %v10866_v6 = vadd.f32 %v10804_v47, %v4426_v3 }
 0x496   :  { %12529 = vst [vmem:[#allocation39_spill] sm:$0xff] %v10862_v57 }
 0x497   :  { %12530 = vst [vmem:[#allocation50_spill] sm:$0xff] %v10866_v6 }
 0x499   :  { %v4430_v14 = vpop.f32.mrb[16].mxu1 }
 0x49a   :  { %v10871_v20 = vadd.f32 %v10801_v18, %v4430_v14  ;;  %v4432_v45 = vpop.f32.mrb[17].mxu1 }
 0x49b   :  { %v10874_v1 = vadd.f32 %v10804_v47, %v4432_v45  ;;  %v4434_v26 = vpop.f32.mrb[18].mxu1 }
 0x49c   :  { %v10878_v31 = vadd.f32 %v10801_v18, %v4434_v26  ;;  %v4436_v43 = vpop.f32.mrb[19].mxu1 }
 0x49d   :  { %v10882_v30 = vadd.f32 %v10804_v47, %v4436_v43 }
 0x4a1   :  { %v4440_v23 = vpop.f32.mrb[20].mxu1 }
 0x4a2   :  { %v10887_v62 = vadd.f32 %v10801_v18, %v4440_v23  ;;  %v4442_v4 = vpop.f32.mrb[21].mxu1 }
 0x4a3   :  { %v10890_v8 = vadd.f32 %v10804_v47, %v4442_v4  ;;  %v4444_v61 = vpop.f32.mrb[22].mxu1 }
 0x4a4   :  { %v10894_v52 = vadd.f32 %v10801_v18, %v4444_v61  ;;  %v4446_v16 = vpop.f32.mrb[23].mxu1 }
 0x4a5   :  { %v10898_v21 = vadd.f32 %v10804_v47, %v4446_v16 }
 0x4a9   :  { %v4450_v3 = vpop.f32.mrb[24].mxu1 }
 0x4aa   :  { %v10903_v14 = vadd.f32 %v10801_v18, %v4450_v3  ;;  %v4452_v45 = vpop.f32.mrb[25].mxu1 }
 0x4ab   :  { %v10906_v26 = vadd.f32 %v10804_v47, %v4452_v45  ;;  %v4454_v43 = vpop.f32.mrb[26].mxu1 }
 0x4ac   :  { %v10910_v4 = vadd.f32 %v10801_v18, %v4454_v43  ;;  %v4456_v61 = vpop.f32.mrb[27].mxu1 }
 0x4ad   :  { %v10914_v28 = vadd.f32 %v10804_v47, %v4456_v61 }
 0x4b1   :  { %v4460_v60 = vpop.f32.mrb[28].mxu1 }
 0x4b2   :  { %v10919_v45 = vadd.f32 %v10801_v18, %v4460_v60  ;;  %v4462_v15 = vpop.f32.mrb[29].mxu1 }
 0x4b3   :  { %v10922_v23 = vadd.f32 %v10804_v47, %v4462_v15  ;;  %v4464_v43 = vpop.f32.mrb[30].mxu1 }
 0x4b4   :  { %v10926_v16 = vadd.f32 %v10801_v18, %v4464_v43  ;;  %v4466_v61 = vpop.f32.mrb[31].mxu1 }
 0x4b5   :  { %v10930_v58 = vadd.f32 %v10804_v47, %v4466_v61 }
 0x4b6   :  { %12531 = vst [vmem:[#allocation47_spill] sm:$0xff] %v10926_v16 }
 0x4b7   :  { %12532 = vst [vmem:[#allocation49_spill] sm:$0xff] %v10930_v58 }
 0x4b8   :  { %9427 = dma.done.wait [#allocation3], 36864 }
 0x4b9   :  { %9428 = vsyncadd [#allocation3], 4294930432  ;;  %v8202_v15 = vpack.c.bf16 %v4545_v55, %v4545_v55  ;;  %v8203_v18 = vpack.c.bf16 %v4546_v39, %v4546_v39  ;;  %v8204_v43 = vpack.c.bf16 %v4547_v7, %v4547_v7  ;;  %v8205_v47 = vpack.c.bf16 %v4548_v29, %v4548_v29  ;;  %v5340_v42 = vld [vmem:[#allocation2 + $0x118] sm:$0xff]  ;;  %v5339_v35 = vld [vmem:[#allocation2 + $0x110] sm:$0xff] }
 0x4ba   :  { %v8206_v24 = vpack.c.bf16 %v4549_v25, %v4549_v25  ;;  %v8207_v29 = vpack.c.bf16 %v4550_v9, %v4550_v9  ;;  %v8209_v40 = vpack.c.bf16 %v4552_v11, %v4552_v11  ;;  %v8210_v63 = vpack.c.bf16 %v4553_v10, %v4553_v10  ;;  %v5346_v22 = vld [vmem:[#allocation2 + $0x148] sm:$0xff] }
 0x4bb   :  { %v4678_v61 = vshrl.u32 %v8202_v15, 16  ;;  %v4681_v3 = vshll.u32 %v8202_v15, 16  ;;  %v4685_v60 = vshrl.u32 %v8203_v18, 16  ;;  %v4688_v33 = vshll.u32 %v8203_v18, 16  ;;  %v5338_v15 = vld [vmem:[#allocation2 + $0x108] sm:$0xff]  ;;  %v5337_v18 = vld [vmem:[#allocation2 + $0x100] sm:$0xff] }
 0x4bc   :  { %v4692_v59 = vshrl.u32 %v8204_v43, 16  ;;  %v4699_v37 = vshrl.u32 %v8205_v47, 16  ;;  %v4695_v32 = vshll.u32 %v8204_v43, 16  ;;  %v4702_v7 = vshll.u32 %v8205_v47, 16  ;;  %5429 = vmatprep.subr.bf16.mxu0 %v5338_v15  ;;  %v5350_v48 = vld [vmem:[#allocation2 + $0x168] sm:$0xff] }
 0x4bd   :  { %v4680_v0 = vrot.slane %v4678_v61, 7  ;;  %v4687_v55 = vrot.slane %v4685_v60, 7  ;;  %v4706_v25 = vshrl.u32 %v8206_v24, 16  ;;  %5430 = vmatpush1.bf16.msra.mxu0 %v5337_v18  ;;  %v5341_v18 = vld [vmem:[#allocation2 + $0x120] sm:$0xff]  ;;  %v8211_v19 = vpack.c.bf16 %v4554_v51, %v4554_v51  ;;  %v5354_v12 = vld [vmem:[#allocation2 + $0x188] sm:$0xff] }
 0x4be   :  { %v4694_v38 = vrot.slane %v4692_v59, 7  ;;  %v4701_v39 = vrot.slane %v4699_v37, 7  ;;  %5431 = vmatprep.subr.bf16.mxu0 %v5340_v42  ;;  %v4709_v42 = vshll.u32 %v8206_v24, 16  ;;  %v5344_v24 = vld [vmem:[#allocation2 + $0x138] sm:$0xff]  ;;  %v4730_v46 = vshll.u32 %v8209_v40, 16 }
 0x4bf   :  { %v4683_v34 = vor.u32 %v4681_v3, %v4680_v0  ;;  %v4690_v5 = vor.u32 %v4688_v33, %v4687_v55  ;;  %v5342_v3 = vld [vmem:[#allocation2 + $0x128] sm:$0xff]  ;;  %v4708_v55 = vrot.slane %v4706_v25, 7  ;;  %v8213_v49 = vpack.c.bf16 %v4556_v27, %v4556_v27 }
 0x4c0   :  { %v4697_v61 = vor.u32 %v4695_v32, %v4694_v38  ;;  %v4704_v59 = vor.u32 %v4702_v7, %v4701_v39  ;;  %v4713_v32 = vshrl.u32 %v8207_v29, 16  ;;  %v8208_v38 = vpack.c.bf16 %v4551_v56, %v4551_v56 }
 0x4c1   :  { %v4933_v43 = vsel %vm9625_vm3, 0, %v4683_v34  ;;  %v4934_v36 = vsel %vm9625_vm3, 0, %v4690_v5  ;;  %5432 = vmatpush1.bf16.msra.mxu0 %v5339_v35  ;;  %v4711_v35 = vor.u32 %v4709_v42, %v4708_v55  ;;  %v12543_v27 = vmax.f32 %v10858_v44, 0.0 }
 0x4c2   :  { %v10958_v33 = vsel %vm9633_vm6, %v4933_v43, 0  ;;  %v10962_v9 = vsel %vm9633_vm6, %v4934_v36, 0  ;;  %v4935_v37 = vsel %vm9625_vm3, 0, %v4697_v61  ;;  %v4936_v39 = vsel %vm9625_vm3, 0, %v4704_v59  ;;  %5433 = vmatprep.subr.bf16.mxu0 %v5342_v3 }
 0x4c3   :  { %v10966_v34 = vcombine.low %v10958_v33, %v10962_v9  ;;  %v10970_v47 = vcombine.high %v10958_v33, %v10962_v9  ;;  %v4715_v43 = vrot.slane %v4713_v32, 7  ;;  %v4716_v61 = vshll.u32 %v8207_v29, 16  ;;  %v5343_v29 = vld [vmem:[#allocation2 + $0x130] sm:$0xff] }
 0x4c4   :  { %v10987_v25 = vsel %vm9633_vm6, %v4935_v37, 0  ;;  %v10991_v59 = vsel %vm9633_vm6, %v4936_v39, 0  ;;  %v4720_v11 = vshrl.u32 %v8208_v38, 16  ;;  %v4937_v55 = vsel %vm9625_vm3, 0, %v4711_v35  ;;  %v5348_v35 = vld [vmem:[#allocation2 + $0x158] sm:$0xff] }
 0x4c5   :  { %12535 = vst [vmem:[#allocation46_spill] sm:$0xff] %v10966_v34  ;;  %12536 = vst [vmem:[#allocation54_spill] sm:$0xff] %v10970_v47  ;;  %v5142_v7 = vshrl.u32 %v10966_v34, 16  ;;  %v5145_v5 = vshll.u32 %v10966_v34, 16  ;;  %v5151_v15 = vshll.u32 %v10970_v47, 16  ;;  %5434 = vmatpush1.bf16.msra.mxu0 %v5341_v18  ;;  %v10998_v37 = vcombine.low %v10987_v25, %v10991_v59 }
 0x4c6   :  { %5435 = vmatprep.subr.bf16.mxu0 %v5344_v24  ;;  %v4723_v18 = vshll.u32 %v8208_v38, 16  ;;  %v11017_v38 = vsel %vm9633_vm6, %v4937_v55, 0  ;;  %v4744_v55 = vshll.u32 %v8211_v19, 16  ;;  %v12545_v44 = vmax.f32 %v10871_v20, 0.0 }
 0x4c7   :  { %v5144_v56 = vrot.slane %v5142_v7, 4  ;;  %v5147_v36 = vrot.slane %v5145_v5, 5  ;;  %v5153_v32 = vrot.slane %v5151_v15, 5  ;;  %v4718_v7 = vor.u32 %v4716_v61, %v4715_v43  ;;  %12537 = vst [vmem:[#allocation52_spill] sm:$0xff] %v10998_v37  ;;  %v5345_v61 = vld [vmem:[#allocation2 + $0x140] sm:$0xff] }
 0x4c8   :  { %v4727_v5 = vshrl.u32 %v8209_v40, 16  ;;  %v4722_v15 = vrot.slane %v4720_v11, 7  ;;  %v4734_v43 = vshrl.u32 %v8210_v63, 16  ;;  %v5156_v51 = vshrl.u32 %v10998_v37, 16 }
 0x4c9   :  { %v5148_v3 = vor.u32 %v5147_v36, %v5144_v56  ;;  %5436 = vmatpush1.bf16.msra.mxu0 %v5343_v29  ;;  %v4938_v56 = vsel %vm9625_vm3, 0, %v4718_v7  ;;  %v4737_v7 = vshll.u32 %v8210_v63, 16  ;;  %v12542_v63 = vmax.f32 %v10855_v13, 0.0 }
 0x4ca   :  { %5437 = vmatprep.subr.bf16.mxu0 %v5346_v22  ;;  %v4729_v36 = vrot.slane %v4727_v5, 7  ;;  %v4741_v22 = vshrl.u32 %v8211_v19, 16  ;;  %v11026_v40 = vsel %vm9633_vm6, %v4938_v56, 0  ;;  %v4725_v11 = vor.u32 %v4723_v18, %v4722_v15  ;;  %v5347_v5 = vld [vmem:[#allocation2 + $0x150] sm:$0xff] }
 0x4cb   :  { %v5149_v39 = vrot.slane %v5148_v3, 4  ;;  %v5159_v3 = vshll.u32 %v10998_v37, 16  ;;  %v4736_v29 = vrot.slane %v4734_v43, 7  ;;  %v11037_v15 = vcombine.low %v11017_v38, %v11026_v40 }
 0x4cc   :  { %v8214_v18 = vpack.c.bf16 %v12542_v63, %v12542_v63  ;;  %v4939_v17 = vsel %vm9625_vm3, 0, %v4725_v11  ;;  %v8215_v43 = vpack.c.bf16 %v12543_v27, %v12543_v27  ;;  %v4755_v13 = vshrl.u32 %v8213_v49, 16  ;;  %v5351_v63 = vld [vmem:[#allocation2 + $0x170] sm:$0xff] }
 0x4cd   :  { %v11007_v42 = vsel %vm9678_vm9, %v5149_v39, %v5153_v32  ;;  %v11022_v32 = vpack.c.bf16 %v4555_v50, %v4555_v50  ;;  %5438 = vmatpush1.bf16.msra.mxu0 %v5345_v61  ;;  %v4732_v39 = vor.u32 %v4730_v46, %v4729_v36  ;;  %v11033_v50 = vcombine.high %v10987_v25, %v10991_v59  ;;  %v5349_v36 = vld [vmem:[#allocation2 + $0x160] sm:$0xff] }
 0x4ce   :  { %12539 = vst [vmem:[#allocation74_spill] sm:$0xff] %v11007_v42  ;;  %v8041_v24 = vcombine.high %v12507_v2, %v11007_v42  ;;  %5439 = vmatprep.subr.bf16.mxu0 %v5348_v35  ;;  %v5158_v61 = vrot.slane %v5156_v51, 4  ;;  %v5161_v56 = vrot.slane %v5159_v3, 5  ;;  %12541 = vst [vmem:[#allocation73_spill] sm:$0xff] %v11037_v15  ;;  %v4739_v19 = vor.u32 %v4737_v7, %v4736_v29  ;;  %v5352_v3 = vld [vmem:[#allocation2 + $0x178] sm:$0xff] }
 0x4cf   :  { %12540 = vst [vmem:[#allocation58_spill] sm:$0xff] %v11033_v50  ;;  %v4940_v35 = vsel %vm9625_vm3, 0, %v4732_v39  ;;  %v4748_v51 = vshrl.u32 %v11022_v32, 16  ;;  %v5165_v29 = vshll.u32 %v11033_v50, 16  ;;  %v11053_v11 = vcombine.high %v11017_v38, %v11026_v40 }
 0x4d0   :  { %5461 = vmatprep.mubr.bf16.mxu0 %v8041_v24  ;;  %v4743_v24 = vrot.slane %v4741_v22, 7  ;;  %v5162_v22 = vor.u32 %v5161_v56, %v5158_v61  ;;  %v5170_v7 = vshrl.u32 %v11037_v15, 16  ;;  %v11064_v39 = vsel %vm9633_vm6, %v4939_v17, 0 }
 0x4d1   :  { %5440 = vmatpush1.bf16.msra.mxu0 %v5347_v5  ;;  %12544 = vst [vmem:[#allocation57_spill] sm:$0xff] %v11053_v11  ;;  %v5173_v5 = vshll.u32 %v11037_v15, 16  ;;  %12546 = vst [vmem:[#allocation32_spill] sm:$0xff] %v11064_v39  ;;  %v11070_v61 = vsel %vm9633_vm6, %v4940_v35, 0  ;;  %v4751_v20 = vshll.u32 %v11022_v32, 16  ;;  %v4769_v56 = vshrl.u32 %v8215_v43, 16 }
 0x4d2   :  { %5441 = vmatprep.subr.bf16.mxu0 %v5350_v48  ;;  %v4746_v46 = vor.u32 %v4744_v55, %v4743_v24  ;;  %v11058_v48 = vpack.c.bf16 %v12545_v44, %v12545_v44  ;;  %v4762_v24 = vshrl.u32 %v8214_v18, 16  ;;  %v4941_v55 = vsel %vm9625_vm3, 0, %v4739_v19  ;;  %12547 = vst [vmem:[#allocation30_spill] sm:$0xff] %v11070_v61 }
 0x4d3   :  { %v4750_v44 = vrot.slane %v4748_v51, 7  ;;  %v4757_v17 = vrot.slane %v4755_v13, 7  ;;  %v4758_v54 = vshll.u32 %v8213_v49, 16  ;;  %v4765_v16 = vshll.u32 %v8214_v18, 16  ;;  %v5353_v51 = vld [vmem:[#allocation2 + $0x180] sm:$0xff] }
 0x4d4   :  { %v4942_v27 = vsel %vm9625_vm3, 0, %v4746_v46  ;;  %v4771_v58 = vrot.slane %v4769_v56, 7  ;;  %v4772_v19 = vshll.u32 %v8215_v43, 16  ;;  %v5172_v57 = vrot.slane %v5170_v7, 4 }
 0x4d5   :  { %5442 = vmatpush1.bf16.msra.mxu0 %v5349_v36  ;;  %v4764_v36 = vrot.slane %v4762_v24, 7  ;;  %v5175_v6 = vrot.slane %v5173_v5, 5  ;;  %v11077_v35 = vcombine.low %v11064_v39, %v11070_v61  ;;  %v5163_v32 = vrot.slane %v5162_v22, 4  ;;  %v5356_v22 = vld [vmem:[#allocation2 + $0x198] sm:$0xff] }
 0x4d6   :  { %5443 = vmatprep.subr.bf16.mxu0 %v5352_v3  ;;  %v5167_v3 = vrot.slane %v5165_v29, 5  ;;  %v5179_v15 = vshll.u32 %v11053_v11, 16  ;;  %v12549_v46 = vmax.f32 %v10874_v1, 0.0  ;;  %v11085_v18 = vsel %vm9633_vm6, %v4941_v55, 0 }
 0x4d7   :  { %12548 = vst [vmem:[#allocation91_spill] sm:$0xff] %v11077_v35  ;;  %12550 = vst [vmem:[#allocation29_spill] sm:$0xff] %v11085_v18  ;;  %v11089_v43 = vsel %vm9633_vm6, %v4942_v27, 0  ;;  %v4753_v13 = vor.u32 %v4751_v20, %v4750_v44  ;;  %v4760_v7 = vor.u32 %v4758_v54, %v4757_v17  ;;  %v4767_v29 = vor.u32 %v4765_v16, %v4764_v36  ;;  %v5358_v27 = vld [vmem:[#allocation2 + $0x1a8] sm:$0xff] }
 0x4d8   :  { %v8219_v49 = vpack.c.bf16 %v12549_v46, %v12549_v46  ;;  %v4774_v5 = vor.u32 %v4772_v19, %v4771_v58  ;;  %v4790_v24 = vshrl.u32 %v11058_v48, 16  ;;  %v5176_v1 = vor.u32 %v5175_v6, %v5172_v57  ;;  %v5355_v58 = vld [vmem:[#allocation2 + $0x190] sm:$0xff] }
 0x4d9   :  { %5444 = vmatpush1.bf16.msra.mxu0 %v5351_v63  ;;  %v5184_v56 = vshrl.u32 %v11077_v35, 16  ;;  %v11096_v55 = vsel %vm9678_vm9, %v5163_v32, %v5167_v3  ;;  %v11102_v54 = vcombine.low %v11085_v18, %v11089_v43  ;;  %v5181_v16 = vrot.slane %v5179_v15, 5 }
 0x4da   :  { %5445 = vmatprep.subr.bf16.mxu0 %v5354_v12  ;;  %v5187_v12 = vshll.u32 %v11077_v35, 16  ;;  %12551 = vst [vmem:[#allocation38_spill] sm:$0xff] %v11096_v55  ;;  %v4943_v57 = vsel %vm9625_vm3, 0, %v4753_v13  ;;  %v4944_v6 = vsel %vm9625_vm3, 0, %v4760_v7  ;;  %v4797_v20 = vshrl.u32 %v8219_v49, 16 }
 0x4db   :  { %v4945_v44 = vsel %vm9625_vm3, 0, %v4767_v29  ;;  %v4946_v17 = vsel %vm9625_vm3, 0, %v4774_v5  ;;  %v4792_v36 = vrot.slane %v4790_v24, 7  ;;  %v4793_v19 = vshll.u32 %v11058_v48, 16  ;;  %v5357_v29 = vld [vmem:[#allocation2 + $0x1a0] sm:$0xff] }
 0x4dc   :  { %v5177_v32 = vrot.slane %v5176_v1, 4  ;;  %v11115_v15 = vcombine.high %v11064_v39, %v11070_v61  ;;  %v11117_v3 = vrot.slane %v5184_v56, 4  ;;  %v11119_v46 = vrot.slane %v5187_v12, 5  ;;  %v5360_v56 = vld [vmem:[#allocation2 + $0x1b8] sm:$0xff]  ;;  %v5363_v39 = vld [vmem:[#allocation2 + $0x1d0] sm:$0xff] }
 0x4dd   :  { %5446 = vmatpush1.bf16.msra.mxu0 %v5353_v51  ;;  %v5198_v51 = vshrl.u32 %v11102_v54, 16  ;;  %v5201_v13 = vshll.u32 %v11102_v54, 16  ;;  %v4799_v7 = vrot.slane %v4797_v20, 7  ;;  %v11125_v48 = vsel %vm9633_vm6, %v4943_v57, 0  ;;  %v5056_v61 = vld [vmem:[#allocation2 + $0x18] sm:$0xff] }
 0x4de   :  { %5447 = vmatprep.subr.bf16.mxu0 %v5356_v22  ;;  %12552 = vst [vmem:[#allocation34_spill] sm:$0xff] %v11115_v15  ;;  %v4800_v22 = vshll.u32 %v8219_v49, 16  ;;  %12553 = vst [vmem:[#allocation41_spill] sm:$0xff] %v11125_v48  ;;  %v11129_v5 = vsel %vm9633_vm6, %v4944_v6, 0  ;;  %v11133_v24 = vsel %vm9633_vm6, %v4945_v44, 0  ;;  %v11137_v1 = vsel %vm9633_vm6, %v4946_v17, 0 }
 0x4df   :  { %12554 = vst [vmem:[#allocation61_spill] sm:$0xff] %v11129_v5  ;;  %12555 = vst [vmem:[#allocation60_spill] sm:$0xff] %v11133_v24  ;;  %v4795_v49 = vor.u32 %v4793_v19, %v4792_v36  ;;  %v12558_v20 = vmax.f32 %v10882_v30, 0.0  ;;  %v5193_v44 = vshll.u32 %v11115_v15, 16  ;;  %v12560_v17 = vmax.f32 %v10887_v62, 0.0 }
 0x4e0   :  { %12556 = vst [vmem:[#allocation68_spill] sm:$0xff] %v11137_v1  ;;  %v4802_v12 = vor.u32 %v4800_v22, %v4799_v7  ;;  %v12561_v36 = vmax.f32 %v10890_v8, 0.0  ;;  %v11158_v30 = vcombine.high %v11085_v18, %v11089_v43  ;;  %v11162_v19 = vcombine.low %v11125_v48, %v11129_v5 }
 0x4e1   :  { %5448 = vmatpush1.bf16.msra.mxu0 %v5355_v58  ;;  %v12557_v58 = vmax.f32 %v10878_v31, 0.0  ;;  %v8221_v6 = vpack.c.bf16 %v12558_v20, %v12558_v20  ;;  %v8222_v63 = vpack.c.bf16 %v12560_v17, %v12560_v17  ;;  %v5190_v8 = vor.u32 %v11119_v46, %v11117_v3 }
 0x4e2   :  { %5449 = vmatprep.subr.bf16.mxu0 %v5358_v27  ;;  %v11147_v27 = vsel %vm9678_vm9, %v5177_v32, %v5181_v16  ;;  %v8223_v31 = vpack.c.bf16 %v12561_v36, %v12561_v36  ;;  %v11166_v16 = vcombine.low %v11133_v24, %v11137_v1  ;;  %v5359_v32 = vld [vmem:[#allocation2 + $0x1b0] sm:$0xff]  ;;  %v5200_v7 = vrot.slane %v5198_v51, 4 }
 0x4e3   :  { %v8220_v57 = vpack.c.bf16 %v12557_v58, %v12557_v58  ;;  %12559 = vst [vmem:[#allocation66_spill] sm:$0xff] %v11147_v27  ;;  %v5203_v22 = vrot.slane %v5201_v13, 5  ;;  %v5362_v58 = vld [vmem:[#allocation2 + $0x1c8] sm:$0xff]  ;;  %v4949_v20 = vsel %vm9625_vm3, 0, %v4795_v49  ;;  %v4950_v17 = vsel %vm9625_vm3, 0, %v4802_v12  ;;  %v5361_v13 = vld [vmem:[#allocation2 + $0x1c0] sm:$0xff] }
 0x4e4   :  { %v4818_v15 = vshrl.u32 %v8222_v63, 16  ;;  %v4814_v50 = vshll.u32 %v8221_v6, 16  ;;  %v5212_v37 = vshrl.u32 %v11162_v19, 16  ;;  %v5215_v3 = vshll.u32 %v11162_v19, 16 }
 0x4e5   :  { %5450 = vmatpush1.bf16.msra.mxu0 %v5357_v29  ;;  %v4804_v62 = vshrl.u32 %v8220_v57, 16  ;;  %v4811_v29 = vshrl.u32 %v8221_v6, 16  ;;  %v4807_v36 = vshll.u32 %v8220_v57, 16  ;;  %v5226_v46 = vshrl.u32 %v11166_v16, 16 }
 0x4e6   :  { %5451 = vmatprep.subr.bf16.mxu0 %v5360_v56  ;;  %v4825_v56 = vshrl.u32 %v8223_v31, 16  ;;  %v5229_v51 = vshll.u32 %v11166_v16, 16  ;;  %v5204_v49 = vor.u32 %v5203_v22, %v5200_v7  ;;  %v5207_v12 = vshll.u32 %v11158_v30, 16 }
 0x4e7   :  { %v4806_v35 = vrot.slane %v4804_v62, 7  ;;  %v4813_v11 = vrot.slane %v4811_v29, 7  ;;  %v11181_v57 = vcombine.high %v11125_v48, %v11129_v5  ;;  %v11185_v6 = vcombine.high %v11133_v24, %v11137_v1  ;;  %v5364_v62 = vld [vmem:[#allocation2 + $0x1d8] sm:$0xff] }
 0x4e8   :  { %v11193_v29 = vsel %vm9633_vm6, %v4950_v17, 0  ;;  %v4820_v7 = vrot.slane %v4818_v15, 7  ;;  %v4821_v22 = vshll.u32 %v8222_v63, 16  ;;  %v4827_v47 = vrot.slane %v4825_v56, 7 }
 0x4e9   :  { %5452 = vmatpush1.bf16.msra.mxu0 %v5359_v32  ;;  %v11189_v32 = vsel %vm9633_vm6, %v4949_v20, 0  ;;  %12563 = vst [vmem:[#allocation76_spill] sm:$0xff] %v11193_v29  ;;  %v4816_v41 = vor.u32 %v4814_v50, %v4813_v11  ;;  %v4828_v34 = vshll.u32 %v8223_v31, 16  ;;  %v5214_v48 = vrot.slane %v5212_v37, 4  ;;  %v5366_v50 = vld [vmem:[#allocation2 + $0x1e8] sm:$0xff] }
 0x4ea   :  { %5453 = vmatprep.subr.bf16.mxu0 %v5362_v58  ;;  %12562 = vst [vmem:[#allocation67_spill] sm:$0xff] %v11189_v32  ;;  %v4809_v58 = vor.u32 %v4807_v36, %v4806_v35  ;;  %v5217_v5 = vrot.slane %v5215_v3, 5  ;;  %v5228_v24 = vrot.slane %v5226_v46, 4  ;;  %v5231_v1 = vrot.slane %v5229_v51, 5 }
 0x4eb   :  { %v11197_v20 = vcombine.high %v11096_v55, %v11147_v27  ;;  %v5191_v18 = vrot.slane %v5190_v8, 4  ;;  %v5195_v17 = vrot.slane %v5193_v44, 5  ;;  %v11201_v63 = vcombine.low %v11189_v32, %v11193_v29 }
 0x4ec   :  { %v5205_v11 = vrot.slane %v5204_v49, 4  ;;  %v5209_v35 = vrot.slane %v5207_v12, 5  ;;  %v4823_v15 = vor.u32 %v4821_v22, %v4820_v7  ;;  %v12565_v37 = vmax.f32 %v10894_v52, 0.0  ;;  %v5365_v49 = vld [vmem:[#allocation2 + $0x1e0] sm:$0xff] }
 0x4ed   :  { %5454 = vmatpush1.bf16.msra.mxu0 %v5361_v13  ;;  %12564 = vst [vmem:[#allocation35_spill] sm:$0xff] %v11197_v20  ;;  %v4830_v36 = vor.u32 %v4828_v34, %v4827_v47  ;;  %v4951_v56 = vsel %vm9625_vm3, 0, %v4809_v58  ;;  %v4952_v8 = vsel %vm9625_vm3, 0, %v4816_v41  ;;  %v12566_v44 = vmax.f32 %v10898_v21, 0.0 }
 0x4ee   :  { %5455 = vmatprep.subr.bf16.mxu0 %v5364_v62  ;;  %v8224_v31 = vpack.c.bf16 %v12565_v37, %v12565_v37  ;;  %v5218_v46 = vor.u32 %v5217_v5, %v5214_v48  ;;  %v5221_v51 = vshll.u32 %v11181_v57, 16  ;;  %v5232_v13 = vor.u32 %v5231_v1, %v5228_v24  ;;  %v5368_v48 = vld [vmem:[#allocation2 + $0x1f8] sm:$0xff] }
 0x4ef   :  { %v8225_v3 = vpack.c.bf16 %v12566_v44, %v12566_v44  ;;  %v5235_v52 = vshll.u32 %v11185_v6, 16  ;;  %v11217_v34 = vsel %vm9678_vm9, %v5191_v18, %v5195_v17  ;;  %v5240_v47 = vshrl.u32 %v11201_v63, 16 }
 0x4f0   :  { %12567 = vst [vmem:[#allocation51_spill] sm:$0xff] %v11217_v34  ;;  %v5243_v41 = vshll.u32 %v11201_v63, 16  ;;  %v12568_v21 = vmax.f32 %v10903_v14, 0.0  ;;  %v11226_v5 = vsel %vm9678_vm9, %v5205_v11, %v5209_v35  ;;  %v11230_v24 = vsel %vm9633_vm6, %v4951_v56, 0  ;;  %v5367_v35 = vld [vmem:[#allocation2 + $0x1f0] sm:$0xff] }
 0x4f1   :  { %5456 = vmatpush1.bf16.msra.mxu0 %v5363_v39  ;;  %12569 = vst [vmem:[#allocation48_spill] sm:$0xff] %v11226_v5  ;;  %v11234_v18 = vsel %vm9633_vm6, %v4952_v8, 0  ;;  %v12570_v1 = vmax.f32 %v10906_v26, 0.0  ;;  %v4953_v14 = vsel %vm9625_vm3, 0, %v4823_v15  ;;  %v4954_v62 = vsel %vm9625_vm3, 0, %v4830_v36  ;;  %v5054_v8 = vld [vmem:[#allocation2 + $0x8] sm:$0xff] }
 0x4f2   :  { %5457 = vmatprep.subr.bf16.mxu0 %v5366_v50  ;;  %v8226_v39 = vpack.c.bf16 %v12568_v21, %v12568_v21  ;;  %v4832_v7 = vshrl.u32 %v8224_v31, 16  ;;  %v4839_v22 = vshrl.u32 %v8225_v3, 16  ;;  %v5219_v58 = vrot.slane %v5218_v46, 4 }
 0x4f3   :  { %v8227_v12 = vpack.c.bf16 %v12570_v1, %v12570_v1  ;;  %v5223_v17 = vrot.slane %v5221_v51, 5  ;;  %v5233_v50 = vrot.slane %v5232_v13, 4  ;;  %v5237_v11 = vrot.slane %v5235_v52, 5 }
 0x4f4   :  { %v11245_v26 = vcombine.high %v11189_v32, %v11193_v29  ;;  %v11247_v37 = vrot.slane %v5240_v47, 4  ;;  %v11249_v56 = vrot.slane %v5243_v41, 5  ;;  %v4846_v15 = vshrl.u32 %v8226_v39, 16 }
 0x4f5   :  { %5458 = vmatpush1.bf16.msra.mxu0 %v5365_v49  ;;  %v11253_v36 = vsel %vm9633_vm6, %v4953_v14, 0  ;;  %v11257_v44 = vsel %vm9633_vm6, %v4954_v62, 0  ;;  %v11261_v46 = vcombine.low %v11230_v24, %v11234_v18  ;;  %v4853_v51 = vshrl.u32 %v8227_v12, 16  ;;  %v5053_v14 = vld [vmem:[#allocation2] sm:$0xff] }
 0x4f6   :  { %5459 = vmatprep.subr.bf16.mxu0 %v5368_v48  ;;  %v4834_v13 = vrot.slane %v4832_v7, 7  ;;  %v4835_v52 = vshll.u32 %v8224_v31, 16  ;;  %v4841_v49 = vrot.slane %v4839_v22, 7  ;;  %v4842_v47 = vshll.u32 %v8225_v3, 16 }
 0x4f7   :  { %v4848_v41 = vrot.slane %v4846_v15, 7  ;;  %v4849_v21 = vshll.u32 %v8226_v39, 16  ;;  %v4855_v48 = vrot.slane %v4853_v51, 7  ;;  %v4856_v1 = vshll.u32 %v8227_v12, 16 }
 0x4f8   :  { %v11265_v62 = vcombine.low %v11253_v36, %v11257_v44  ;;  %v12571_v32 = vmax.f32 %v10910_v4, 0.0  ;;  %v11272_v31 = vcombine.low %v11096_v55, %v11147_v27  ;;  %v11276_v3 = vcombine.high %v11217_v34, %v11226_v5  ;;  %v5060_v55 = vld [vmem:[#allocation2 + $0x38] sm:$0xff] }
 0x4f9   :  { %5460 = vmatpush1.bf16.msra.mxu0 %v5367_v35  ;;  %v11280_v39 = vsel %vm9678_vm9, %v5219_v58, %v5223_v17  ;;  %v5254_v12 = vshrl.u32 %v11261_v46, 16  ;;  %v12575_v4 = vcombine.low %v12507_v2, %v11007_v42  ;;  %v4837_v7 = vor.u32 %v4835_v52, %v4834_v13  ;;  %v5058_v52 = vld [vmem:[#allocation2 + $0x28] sm:$0xff] }
 0x4fa   :  { %5574 = vmatprep.subr.bf16.mxu0 %v5054_v8  ;;  %v8228_v29 = vpack.c.bf16 %v12571_v32, %v12571_v32  ;;  %12572 = vst [vmem:[#allocation75_spill] sm:$0xff] %v11272_v31  ;;  %12573 = vst [vmem:[#allocation43_spill] sm:$0xff] %v11276_v3  ;;  %v11288_v32 = vsel %vm9678_vm9, %v5233_v50, %v5237_v11  ;;  %v4844_v22 = vor.u32 %v4842_v47, %v4841_v49  ;;  %vm7398_vm13 = vcmask 1041409  }
 0x4fb   :  { %12574 = vst [vmem:[#allocation59_spill] sm:$0xff] %v11280_v39  ;;  %12576 = vst [vmem:[#allocation53_spill] sm:$0xff] %v11288_v32  ;;  %v12577_v35 = vmax.f32 %v10914_v28, 0.0  ;;  %v5246_v58 = vor.u32 %v11249_v56, %v11247_v37  ;;  %v5249_v17 = vshll.u32 %v11245_v26, 16  ;;  %v4851_v8 = vor.u32 %v4849_v21, %v4848_v41 }
 0x4fc   :  { %5462 = vmatmul.mubr.bf16.vlgmr.msra.gmra.mrb[32].mxu0 %v12575_v4  ;;  %v4858_v51 = vor.u32 %v4856_v1, %v4855_v48  ;;  %v5055_v4 = vld [vmem:[#allocation2 + $0x10] sm:$0xff]  ;;  %v11299_v50 = vcombine.high %v11230_v24, %v11234_v18  ;;  %v5257_v28 = vshll.u32 %v11261_v46, 16  ;;  %v5268_v11 = vshrl.u32 %v11265_v62, 16 }
 0x4fd   :  { %v8229_v15 = vpack.c.bf16 %v12577_v35, %v12577_v35  ;;  %5575 = vmatpush1.bf16.msra.mxu0 %v5053_v14  ;;  %5471 = vmatprep.mubr.bf16.mxu0 %v11197_v20  ;;  %v4860_v13 = vshrl.u32 %v8228_v29, 16  ;;  %v11305_v49 = vcombine.high %v11253_v36, %v11257_v44  ;;  %v11307_v37 = vrot.slane %v5254_v12, 4  ;;  %v5057_v20 = vld [vmem:[#allocation2 + $0x20] sm:$0xff] }
 0x4fe   :  { %5576 = vmatprep.subr.bf16.mxu0 %v5056_v61  ;;  %v5271_v56 = vshll.u32 %v11265_v62, 16  ;;  %v12578_v61 = vmax.f32 %v10919_v45, 0.0  ;;  %v4955_v41 = vsel %vm9625_vm3, 0, %v4837_v7  ;;  %v4956_v21 = vsel %vm9625_vm3, 0, %v4844_v22 }
 0x4ff   :  { %v12579_v48 = vmax.f32 %v10922_v23, 0.0  ;;  %v4867_v14 = vshrl.u32 %v8229_v15, 16  ;;  %v4957_v12 = vsel %vm9625_vm3, 0, %v4851_v8  ;;  %v4958_v45 = vsel %vm9625_vm3, 0, %v4858_v51 }
 0x500   :  { %v8230_v47 = vpack.c.bf16 %v12578_v61, %v12578_v61  ;;  %v4862_v35 = vrot.slane %v4860_v13, 7  ;;  %v4863_v61 = vshll.u32 %v8228_v29, 16  ;;  %v5259_v7 = vrot.slane %v5257_v28, 5 }
 0x501   :  { %v8231_v1 = vpack.c.bf16 %v12579_v48, %v12579_v48  ;;  %5577 = vmatpush1.bf16.msra.mxu0 %v5055_v4  ;;  %v5270_v27 = vrot.slane %v5268_v11, 4  ;;  %v4869_v42 = vrot.slane %v4867_v14, 7  ;;  %v4870_v22 = vshll.u32 %v8229_v15, 16 }
 0x502   :  { %5578 = vmatprep.subr.bf16.mxu0 %v5058_v52  ;;  %v5273_v23 = vrot.slane %v5271_v56, 5  ;;  %v11326_v48 = vsel %vm9633_vm6, %v4955_v41, 0  ;;  %v11330_v8 = vsel %vm9633_vm6, %v4956_v21, 0  ;;  %v4874_v4 = vshrl.u32 %v8230_v47, 16  ;;  %v5059_v41 = vld [vmem:[#allocation2 + $0x30] sm:$0xff] }
 0x503   :  { %v11335_v29 = vsel %vm9633_vm6, %v4957_v12, 0  ;;  %v11339_v15 = vsel %vm9633_vm6, %v4958_v45, 0  ;;  %v4877_v51 = vshll.u32 %v8230_v47, 16  ;;  %v4881_v28 = vshrl.u32 %v8231_v1, 16 }
 0x504   :  { %5472 = vmatmul.mubr.bf16.gmra.mrb[36].mxu0 %v11272_v31  ;;  %v4865_v11 = vor.u32 %v4863_v61, %v4862_v35  ;;  %v4872_v13 = vor.u32 %v4870_v22, %v4869_v42  ;;  %v4876_v52 = vrot.slane %v4874_v4, 7  ;;  %v4884_v56 = vshll.u32 %v8231_v1, 16 }
 0x505   :  { %5579 = vmatpush1.bf16.msra.mxu0 %v5057_v20  ;;  %5481 = vmatprep.mubr.bf16.mxu0 %v11276_v3  ;;  %v5247_v21 = vrot.slane %v5246_v58, 4  ;;  %v5251_v14 = vrot.slane %v5249_v17, 5  ;;  %v11344_v12 = vcombine.low %v11326_v48, %v11330_v8  ;;  %v4883_v31 = vrot.slane %v4881_v28, 7  ;;  %v5062_v20 = vld [vmem:[#allocation2 + $0x48] sm:$0xff] }
 0x506   :  { %5580 = vmatprep.subr.bf16.mxu0 %v5060_v55  ;;  %v11348_v47 = vcombine.low %v11217_v34, %v11226_v5  ;;  %v11352_v45 = vcombine.low %v11335_v29, %v11339_v15  ;;  %v4879_v42 = vor.u32 %v4877_v51, %v4876_v52  ;;  %v11356_v55 = vcombine.high %v11280_v39, %v11288_v32  ;;  %v5061_v51 = vld [vmem:[#allocation2 + $0x40] sm:$0xff] }
 0x507   :  { %v5263_v58 = vshll.u32 %v11299_v50, 16  ;;  %v5277_v17 = vshll.u32 %v11305_v49, 16  ;;  %v4886_v1 = vor.u32 %v4884_v56, %v4883_v31  ;;  %v5260_v35 = vor.u32 %v5259_v7, %v11307_v37  ;;  %v5064_v56 = vld [vmem:[#allocation2 + $0x58] sm:$0xff] }
 0x508   :  { %12580 = vst [vmem:[#allocation69_spill] sm:$0xff] %v11348_v47  ;;  %12581 = vst [vmem:[#allocation62_spill] sm:$0xff] %v11356_v55  ;;  %v5274_v61 = vor.u32 %v5273_v23, %v5270_v27  ;;  %v4959_v22 = vsel %vm9625_vm3, 0, %v4865_v11  ;;  %v4960_v4 = vsel %vm9625_vm3, 0, %v4872_v13  ;;  %v11367_v28 = vsel %vm9678_vm9, %v5247_v21, %v5251_v14 }
 0x509   :  { %5581 = vmatpush1.bf16.msra.mxu0 %v5059_v41  ;;  %12582 = vst [vmem:[#allocation82_spill] sm:$0xff] %v11367_v28  ;;  %v5282_v52 = vshrl.u32 %v11344_v12, 16  ;;  %v5285_v31 = vshll.u32 %v11344_v12, 16  ;;  %v5296_v37 = vshrl.u32 %v11352_v45, 16  ;;  %v5299_v27 = vshll.u32 %v11352_v45, 16 }
 0x50a   :  { %5582 = vmatprep.subr.bf16.mxu0 %v5062_v20  ;;  %v4961_v7 = vsel %vm9625_vm3, 0, %v4879_v42  ;;  %v4962_v23 = vsel %vm9625_vm3, 0, %v4886_v1  ;;  %v5265_v11 = vrot.slane %v5263_v58, 5  ;;  %v5279_v13 = vrot.slane %v5277_v17, 5  ;;  %v5063_v17 = vld [vmem:[#allocation2 + $0x50] sm:$0xff] }
 0x50b   :  { %v11380_v41 = vsel %vm9633_vm6, %v4959_v22, 0  ;;  %v11384_v21 = vsel %vm9633_vm6, %v4960_v4, 0  ;;  %v5261_v14 = vrot.slane %v5260_v35, 4  ;;  %v5275_v20 = vrot.slane %v5274_v61, 4  ;;  %v5066_v61 = vld [vmem:[#allocation2 + $0x68] sm:$0xff] }
 0x50c   :  { %5482 = vmatmul.mubr.bf16.gmra.mrb[40].mxu0 %v11348_v47  ;;  %12583 = vst [vmem:[#allocation92_spill] sm:$0xff] %v11380_v41  ;;  %v11389_v42 = vcombine.high %v11326_v48, %v11330_v8  ;;  %v11393_v58 = vcombine.high %v11335_v29, %v11339_v15  ;;  %v5284_v1 = vrot.slane %v5282_v52, 4  ;;  %v5287_v22 = vrot.slane %v5285_v31, 5 }
 0x50d   :  { %5583 = vmatpush1.bf16.msra.mxu0 %v5061_v51  ;;  %5491 = vmatprep.mubr.bf16.mxu0 %v11356_v55  ;;  %v11397_v4 = vsel %vm9633_vm6, %v4961_v7, 0  ;;  %v11401_v35 = vsel %vm9633_vm6, %v4962_v23, 0  ;;  %v5298_v51 = vrot.slane %v5296_v37, 4  ;;  %v5301_v55 = vrot.slane %v5299_v27, 5  ;;  %v5065_v37 = vld [vmem:[#allocation2 + $0x60] sm:$0xff] }
 0x50e   :  { %5584 = vmatprep.subr.bf16.mxu0 %v5064_v56  ;;  %12584 = vst [vmem:[#allocation36_spill] sm:$0xff] %v11397_v4  ;;  %v11405_v47 = vcombine.low %v11380_v41, %v11384_v21  ;;  %v11409_v56 = vcombine.low %v11280_v39, %v11288_v32  ;;  %v8049_v52 = vcombine.high %v12507_v2, %v11367_v28  ;;  %v5291_v31 = vshll.u32 %v11389_v42, 16  ;;  %v5068_v32 = vld [vmem:[#allocation2 + $0x78] sm:$0xff] }
 0x50f   :  { %v11416_v7 = vcombine.low %v11397_v4, %v11401_v35  ;;  %v11420_v27 = vsel %vm9678_vm9, %v5261_v14, %v5265_v11  ;;  %v11424_v23 = vsel %vm9678_vm9, %v5275_v20, %v5279_v13  ;;  %v5305_v3 = vshll.u32 %v11393_v58, 16  ;;  %v5067_v20 = vld [vmem:[#allocation2 + $0x70] sm:$0xff] }
 0x510   :  { %12585 = vst [vmem:[#allocation42_spill] sm:$0xff] %v11409_v56  ;;  %v5302_v5 = vor.u32 %v5301_v55, %v5298_v51  ;;  %v5310_v39 = vshrl.u32 %v11405_v47, 16  ;;  %v5313_v34 = vshll.u32 %v11405_v47, 16  ;;  %v11434_v11 = vcombine.high %v11420_v27, %v11424_v23 }
 0x511   :  { %5585 = vmatpush1.bf16.msra.mxu0 %v5063_v17  ;;  %v5288_v17 = vor.u32 %v5287_v22, %v5284_v1  ;;  %v5293_v13 = vrot.slane %v5291_v31, 5  ;;  %v5324_v14 = vshrl.u32 %v11416_v7, 16  ;;  %v5327_v55 = vshll.u32 %v11416_v7, 16 }
 0x512   :  { %5586 = vmatprep.subr.bf16.mxu0 %v5066_v61  ;;  %v8048_v61 = vcombine.low %v12507_v2, %v11367_v28  ;;  %12586 = vst [vmem:[#allocation27_spill] sm:$0xff] %v11434_v11  ;;  %v5307_v22 = vrot.slane %v5305_v3, 5  ;;  %v8076_v51 = vrot.slane %v11102_v54, 9  ;;  %v5070_v2 = vld [vmem:[#allocation2 + $0x88] sm:$0xff]  ;;  %v11446_v31 = vcombine.high %v11397_v4, %v11401_v35  ;;  %v5069_v4 = vld [vmem:[#allocation2 + $0x80] sm:$0xff] }
 0x513   :  { %v5289_v1 = vrot.slane %v5288_v17, 4  ;;  %v5312_v28 = vrot.slane %v5310_v39, 4  ;;  %v5315_v0 = vrot.slane %v5313_v34, 5  ;;  %v8077_v54 = vrot.slane %v11162_v19, 9  ;;  %v5072_v19 = vld [vmem:[#allocation2 + $0x98] sm:$0xff] }
 0x514   :  { %5492 = vmatmul.mubr.bf16.gmra.mrb[44].mxu0 %v11409_v56  ;;  %v5705_v56 = vrot.slane %v11158_v30, 5  ;;  %v5709_v30 = vrot.slane %v11181_v57, 5  ;;  %v5329_v3 = vrot.slane %v5327_v55, 5  ;;  %v8078_v60 = vrot.slane %v11166_v16, 9 }
 0x515   :  { %5587 = vmatpush1.bf16.msra.mxu0 %v5065_v37  ;;  %5501 = vmatprep.mubr.bf16.mxu0 %v8049_v52  ;;  %v5303_v37 = vrot.slane %v5302_v5, 4  ;;  %v11442_v52 = vcombine.high %v11380_v41, %v11384_v21  ;;  %v5326_v5 = vrot.slane %v5324_v14, 4  ;;  %v5713_v41 = vrot.slane %v11185_v6, 5 }
 0x516   :  { %5588 = vmatprep.subr.bf16.mxu0 %v5068_v32  ;;  %v11450_v17 = vsel %vm10260_vm12, %v8076_v51, %v5705_v56  ;;  %v11458_v34 = vsel %vm10260_vm12, %v8077_v54, %v5709_v30  ;;  %v8079_v39 = vrot.slane %v11201_v63, 9  ;;  %v5717_v56 = vrot.slane %v11245_v26, 5  ;;  %v5073_v51 = vld [vmem:[#allocation2 + $0xa0] sm:$0xff] }
 0x517   :  { %v11464_v57 = vsel %vm10260_vm12, %v8078_v60, %v5713_v41  ;;  %v11468_v16 = vsel %vm9678_vm9, %v5289_v1, %v5293_v13  ;;  %v5316_v63 = vor.u32 %v5315_v0, %v5312_v28  ;;  %v5319_v60 = vshll.u32 %v11442_v52, 16  ;;  %v5074_v1 = vld [vmem:[#allocation2 + $0xa8] sm:$0xff] }
 0x518   :  { %v11476_v6 = vsel %vm10260_vm12, %v8079_v39, %v5717_v56  ;;  %v5330_v26 = vor.u32 %v5329_v3, %v5326_v5  ;;  %v5333_v41 = vshll.u32 %v11446_v31, 16  ;;  %v8080_v13 = vrot.slane %v11261_v46, 9  ;;  %v5075_v5 = vld [vmem:[#allocation2 + $0xb0] sm:$0xff] }
 0x519   :  { %5589 = vmatpush1.bf16.msra.mxu0 %v5067_v20  ;;  %v5721_v14 = vrot.slane %v11299_v50, 5  ;;  %v8081_v55 = vrot.slane %v11265_v62, 9  ;;  %v5725_v20 = vrot.slane %v11305_v49, 5  ;;  %v5317_v62 = vrot.slane %v5316_v63, 4  ;;  %v5078_v63 = vld [vmem:[#allocation2 + $0xc8] sm:$0xff] }
 0x51a   :  { %5590 = vmatprep.subr.bf16.mxu0 %v5070_v2  ;;  %v11472_v2 = vsel %vm9678_vm9, %v5303_v37, %v5307_v22  ;;  %v5321_v50 = vrot.slane %v5319_v60, 5  ;;  %v5331_v49 = vrot.slane %v5330_v26, 4  ;;  %v5335_v22 = vrot.slane %v5333_v41, 5  ;;  %v5076_v37 = vld [vmem:[#allocation2 + $0xb8] sm:$0xff] }
 0x51b   :  { %v11491_v0 = vcombine.high %v11468_v16, %v11472_v2  ;;  %v11495_v28 = vsel %vm10260_vm12, %v8080_v13, %v5721_v14  ;;  %v11499_v46 = vsel %vm10260_vm12, %v8081_v55, %v5725_v20  ;;  %v8082_v3 = vrot.slane %v11344_v12, 9  ;;  %v5082_v20 = vld [vmem:[#allocation2 + $0xe8] sm:$0xff] }
 0x51c   :  { %5502 = vmatmul.mubr.bf16.gmra.mrb[48].mxu0 %v8048_v61  ;;  %v5071_v61 = vld [vmem:[#allocation2 + $0x90] sm:$0xff]  ;;  %v11505_v54 = vsel %vm9678_vm9, %v5317_v62, %v5321_v50  ;;  %v11509_v30 = vsel %vm9678_vm9, %v5331_v49, %v5335_v22  ;;  %v5729_v39 = vrot.slane %v11389_v42, 5  ;;  %v8083_v56 = vrot.slane %v11352_v45, 9  ;;  %v5077_v45 = vld [vmem:[#allocation2 + $0xc0] sm:$0xff]  ;;  %v5080_v42 = vld [vmem:[#allocation2 + $0xd8] sm:$0xff] }
 0x51d   :  { %5591 = vmatpush1.bf16.msra.mxu0 %v5069_v4  ;;  %5511 = vmatprep.mubr.bf16.mxu0 %v11434_v11  ;;  %v11487_v4 = vcombine.low %v11420_v27, %v11424_v23  ;;  %12589 = vst [vmem:[#allocation45_spill] sm:$0xff] %v11491_v0  ;;  %v11517_v60 = vcombine.low %v11468_v16, %v11472_v2  ;;  %v5737_v13 = vrot.slane %v11442_v52, 5  ;;  %v8085_v14 = vrot.slane %v11416_v7, 9  ;;  %v5081_v7 = vld [vmem:[#allocation2 + $0xe0] sm:$0xff]  ;;  %v5084_v52 = vld [vmem:[#allocation2 + $0xf8] sm:$0xff]  ;;  %v5744_v49 = vld [vmem:[#allocation2 + $0x208] sm:$0xff] }
 0x51e   :  { %5592 = vmatprep.subr.bf16.mxu0 %v5072_v19  ;;  %v5733_v19 = vrot.slane %v11393_v58, 5  ;;  %v11521_v26 = vsel %vm10260_vm12, %v8082_v3, %v5729_v39  ;;  %v11529_v12 = vcombine.high %v11505_v54, %v11509_v30  ;;  %v5079_v58 = vld [vmem:[#allocation2 + $0xd0] sm:$0xff]  ;;  %v5741_v55 = vrot.slane %v11446_v31, 5  ;;  %v5748_v39 = vld [vmem:[#allocation2 + $0x228] sm:$0xff]  ;;  %v12613_v11 = vld [vmem:[#allocation54_spill] sm:$0xff] }
 0x51f   :  { %12588 = vst [vmem:[#allocation37_spill] sm:$0xff] %v11487_v4  ;;  %12590 = vst [vmem:[#allocation40_spill] sm:$0xff] %v11517_v60  ;;  %v5083_v31 = vld [vmem:[#allocation2 + $0xf0] sm:$0xff]  ;;  %v8056_v22 = vcombine.low %v12498_v53, %v10958_v33  ;;  %vm7473_vm14 = vcmask 41984  }
 0x520   :  { %v11525_v41 = vsel %vm10260_vm12, %v8083_v56, %v5733_v19  ;;  %12591 = vst [vmem:[#allocation77_spill] sm:$0xff] %v11529_v12  ;;  %v11547_v50 = vsel %vm10260_vm12, %v8085_v14, %v5741_v55  ;;  %v5745_v3 = vld [vmem:[#allocation2 + $0x210] sm:$0xff]  ;;  %v11561_v56 = vcombine.low %v10987_v25, %v11017_v38  ;;  %v12594_v19 = vld [vmem:[#allocation30_spill] sm:$0xff]  ;;  %v12597_v14 = vld [vmem:[#allocation32_spill] sm:$0xff] }
 0x521   :  { %5593 = vmatpush1.bf16.msra.mxu0 %v5071_v61  ;;  %v8084_v61 = vrot.slane %v11405_v47, 9  ;;  %v8057_v47 = vcombine.low %v12498_v53, %v10962_v9 }
 0x522   :  { %5594 = vmatprep.subr.bf16.mxu0 %v5074_v1  ;;  %v11539_v1 = vcombine.low %v11505_v54, %v11509_v30  ;;  %12593 = vst [vmem:[#allocation56_spill] sm:$0xff] %v11561_v56 }
 0x523   :  { %v11543_v62 = vsel %vm10260_vm12, %v8084_v61, %v5737_v13  ;;  %v5752_v61 = vld [vmem:[#allocation2 + $0x248] sm:$0xff]  ;;  %v12596_v13 = vld [vmem:[#allocation29_spill] sm:$0xff] }
 0x524   :  { %5512 = vmatmul.mubr.bf16.gmra.mrb[52].mxu0 %v11487_v4  ;;  %12592 = vst [vmem:[#allocation55_spill] sm:$0xff] %v11539_v1  ;;  %v11571_v55 = vcombine.low %v12597_v14, %v12596_v13 }
 0x525   :  { %5595 = vmatpush1.bf16.msra.mxu0 %v5073_v51  ;;  %5521 = vmatprep.mubr.bf16.mxu0 %v11491_v0  ;;  %v11556_v51 = vcombine.low %v10991_v59, %v11026_v40  ;;  %v12612_v0 = vld [vmem:[#allocation46_spill] sm:$0xff] }
 0x526   :  { %5596 = vmatprep.subr.bf16.mxu0 %v5076_v37  ;;  %v5743_v37 = vld [vmem:[#allocation2 + $0x200] sm:$0xff]  ;;  %12598 = vst [vmem:[#allocation65_spill] sm:$0xff] %v11571_v55  ;;  %v8072_v4 = vrot.slane %v12612_v0, 9 }
 0x529   :  { %5597 = vmatpush1.bf16.msra.mxu0 %v5075_v5  ;;  %v5746_v5 = vld [vmem:[#allocation2 + $0x218] sm:$0xff] }
 0x52a   :  { %5598 = vmatprep.subr.bf16.mxu0 %v5078_v63  ;;  %v11565_v63 = vcombine.low %v12594_v19, %v11089_v43 }
 0x52c   :  { %5522 = vmatmul.mubr.bf16.gmra.mrb[56].mxu0 %v11517_v60  ;;  %12595 = vst [vmem:[#allocation64_spill] sm:$0xff] %v11565_v63  ;;  %v5766_v60 = vld [vmem:[#allocation2 + $0x2b8] sm:$0xff] }
 0x52d   :  { %5599 = vmatpush1.bf16.msra.mxu0 %v5077_v45  ;;  %5531 = vmatprep.mubr.bf16.mxu0 %v11529_v12  ;;  %v5747_v45 = vld [vmem:[#allocation2 + $0x220] sm:$0xff] }
 0x52e   :  { %5600 = vmatprep.subr.bf16.mxu0 %v5080_v42  ;;  %v5750_v42 = vld [vmem:[#allocation2 + $0x238] sm:$0xff]  ;;  %v5759_v12 = vld [vmem:[#allocation2 + $0x280] sm:$0xff] }
 0x531   :  { %5601 = vmatpush1.bf16.msra.mxu0 %v5079_v58  ;;  %v5749_v58 = vld [vmem:[#allocation2 + $0x230] sm:$0xff] }
 0x532   :  { %5602 = vmatprep.subr.bf16.mxu0 %v5082_v20  ;;  %v12599_v20 = vld [vmem:[#allocation68_spill] sm:$0xff] }
 0x534   :  { %5532 = vmatmul.mubr.bf16.gmra.mrb[60].mxu0 %v11539_v1 }
 0x535   :  { %5603 = vmatpush1.bf16.msra.mxu0 %v5081_v7  ;;  %5606 = vmatprep.mubr.bf16.mxu0 %v8057_v47  ;;  %v12600_v47 = vld [vmem:[#allocation61_spill] sm:$0xff] }
 0x536   :  { %5604 = vmatprep.subr.bf16.mxu0 %v5084_v52  ;;  %v11575_v7 = vcombine.low %v12600_v47, %v12599_v20  ;;  %v5751_v52 = vld [vmem:[#allocation2 + $0x240] sm:$0xff] }
 0x538   :  { %12601 = vst [vmem:[#allocation71_spill] sm:$0xff] %v11575_v7 }
 0x539   :  { %5605 = vmatpush1.bf16.msra.mxu0 %v5083_v31  ;;  %v5754_v31 = vld [vmem:[#allocation2 + $0x258] sm:$0xff] }
 0x53a   :  { %5835 = vmatprep.subr.bf16.mxu0 %v5744_v49  ;;  %v5753_v49 = vld [vmem:[#allocation2 + $0x250] sm:$0xff] }
 0x53c   :  { %5607 = vmatmul.mubr.bf16.vlgmr.msra.gmra.mrb[32].mxu0 %v8056_v22  ;;  %v5756_v22 = vld [vmem:[#allocation2 + $0x268] sm:$0xff] }
 0x53d   :  { %5836 = vmatpush1.bf16.msra.mxu0 %v5743_v37  ;;  %5616 = vmatprep.mubr.bf16.mxu0 %v11556_v51  ;;  %v12602_v37 = vld [vmem:[#allocation60_spill] sm:$0xff] }
 0x53e   :  { %5837 = vmatprep.subr.bf16.mxu0 %v5746_v5  ;;  %v12603_v5 = vld [vmem:[#allocation41_spill] sm:$0xff] }
 0x541   :  { %5838 = vmatpush1.bf16.msra.mxu0 %v5745_v3  ;;  %v11581_v3 = vcombine.low %v12603_v5, %v12602_v37 }
 0x542   :  { %5839 = vmatprep.subr.bf16.mxu0 %v5748_v39  ;;  %v12605_v39 = vld [vmem:[#allocation76_spill] sm:$0xff] }
 0x543   :  { %12604 = vst [vmem:[#allocation72_spill] sm:$0xff] %v11581_v3 }
 0x544   :  { %5617 = vmatmul.mubr.bf16.gmra.mrb[36].mxu0 %v11561_v56 }
 0x545   :  { %5840 = vmatpush1.bf16.msra.mxu0 %v5747_v45  ;;  %5626 = vmatprep.mubr.bf16.mxu0 %v11565_v63  ;;  %v8065_v45 = vcombine.low %v12498_v53, %v12605_v39  ;;  %v12621_v63 = vld [vmem:[#allocation57_spill] sm:$0xff] }
 0x546   :  { %5841 = vmatprep.subr.bf16.mxu0 %v5750_v42  ;;  %v5755_v42 = vld [vmem:[#allocation2 + $0x260] sm:$0xff] }
 0x549   :  { %5842 = vmatpush1.bf16.msra.mxu0 %v5749_v58  ;;  %v5758_v58 = vld [vmem:[#allocation2 + $0x278] sm:$0xff] }
 0x54a   :  { %5843 = vmatprep.subr.bf16.mxu0 %v5752_v61  ;;  %v5757_v61 = vld [vmem:[#allocation2 + $0x270] sm:$0xff] }
 0x54c   :  { %5627 = vmatmul.mubr.bf16.gmra.mrb[40].mxu0 %v11571_v55 }
 0x54d   :  { %5844 = vmatpush1.bf16.msra.mxu0 %v5751_v52  ;;  %5636 = vmatprep.mubr.bf16.mxu0 %v11575_v7  ;;  %v5760_v52 = vld [vmem:[#allocation2 + $0x288] sm:$0xff]  ;;  %v12620_v7 = vld [vmem:[#allocation73_spill] sm:$0xff] }
 0x54e   :  { %5845 = vmatprep.subr.bf16.mxu0 %v5754_v31  ;;  %v12606_v31 = vld [vmem:[#allocation67_spill] sm:$0xff]  ;;  %v8074_v55 = vrot.slane %v12620_v7, 9 }
 0x54f   :  { %v8064_v1 = vcombine.low %v12498_v53, %v12606_v31 }
 0x551   :  { %5846 = vmatpush1.bf16.msra.mxu0 %v5753_v49  ;;  %v11590_v49 = vcombine.low %v11234_v18, %v11257_v44 }
 0x552   :  { %5847 = vmatprep.subr.bf16.mxu0 %v5756_v22  ;;  %v5762_v22 = vld [vmem:[#allocation2 + $0x298] sm:$0xff] }
 0x553   :  { %12607 = vst [vmem:[#allocation78_spill] sm:$0xff] %v11590_v49 }
 0x554   :  { %5637 = vmatmul.mubr.bf16.gmra.mrb[44].mxu0 %v11581_v3 }
 0x555   :  { %5848 = vmatpush1.bf16.msra.mxu0 %v5755_v42  ;;  %5646 = vmatprep.mubr.bf16.mxu0 %v8065_v45  ;;  %v5761_v45 = vld [vmem:[#allocation2 + $0x290] sm:$0xff]  ;;  %v5764_v42 = vld [vmem:[#allocation2 + $0x2a8] sm:$0xff] }
 0x556   :  { %5849 = vmatprep.subr.bf16.mxu0 %v5758_v58  ;;  %v11595_v58 = vcombine.low %v11230_v24, %v11253_v36 }
 0x558   :  { %12608 = vst [vmem:[#allocation79_spill] sm:$0xff] %v11595_v58 }
 0x559   :  { %5850 = vmatpush1.bf16.msra.mxu0 %v5757_v61  ;;  %v11599_v61 = vcombine.low %v11330_v8, %v11339_v15 }
 0x55a   :  { %5851 = vmatprep.subr.bf16.mxu0 %v5760_v52  ;;  %v5763_v52 = vld [vmem:[#allocation2 + $0x2a0] sm:$0xff] }
 0x55b   :  { %12609 = vst [vmem:[#allocation80_spill] sm:$0xff] %v11599_v61 }
 0x55c   :  { %5647 = vmatmul.mubr.bf16.gmra.mrb[48].mxu0 %v8064_v1  ;;  %v5768_v1 = vld [vmem:[#allocation2 + $0x2c8] sm:$0xff] }
 0x55d   :  { %5852 = vmatpush1.bf16.msra.mxu0 %v5759_v12  ;;  %5656 = vmatprep.mubr.bf16.mxu0 %v11590_v49  ;;  %v5765_v12 = vld [vmem:[#allocation2 + $0x2b0] sm:$0xff]  ;;  %v12614_v49 = vld [vmem:[#allocation36_spill] sm:$0xff] }
 0x55e   :  { %5853 = vmatprep.subr.bf16.mxu0 %v5762_v22  ;;  %v11605_v22 = vcombine.low %v11326_v48, %v11335_v29 }
 0x560   :  { %12610 = vst [vmem:[#allocation81_spill] sm:$0xff] %v11605_v22 }
 0x561   :  { %5854 = vmatpush1.bf16.msra.mxu0 %v5761_v45  ;;  %v11609_v45 = vcombine.low %v11384_v21, %v11401_v35 }
 0x562   :  { %5855 = vmatprep.subr.bf16.mxu0 %v5764_v42  ;;  %v5767_v42 = vld [vmem:[#allocation2 + $0x2c0] sm:$0xff] }
 0x563   :  { %12611 = vst [vmem:[#allocation83_spill] sm:$0xff] %v11609_v45 }
 0x564   :  { %5657 = vmatmul.mubr.bf16.gmra.mrb[52].mxu0 %v11595_v58  ;;  %v5770_v58 = vld [vmem:[#allocation2 + $0x2d8] sm:$0xff] }
 0x565   :  { %5856 = vmatpush1.bf16.msra.mxu0 %v5763_v52  ;;  %5666 = vmatprep.mubr.bf16.mxu0 %v11599_v61  ;;  %v5689_v52 = vrot.slane %v12613_v11, 5  ;;  %v5772_v61 = vld [vmem:[#allocation2 + $0x2e8] sm:$0xff]  ;;  %v12617_v11 = vld [vmem:[#allocation31_spill] sm:$0xff] }
 0x566   :  { %5857 = vmatprep.subr.bf16.mxu0 %v5766_v60  ;;  %v5769_v60 = vld [vmem:[#allocation2 + $0x2d0] sm:$0xff] }
 0x569   :  { %5858 = vmatpush1.bf16.msra.mxu0 %v5765_v12  ;;  %v11617_v12 = vsel %vm10260_vm12, %v8072_v4, %v5689_v52  ;;  %v5697_v4 = vrot.slane %v12621_v63, 5  ;;  %v5774_v52 = vld [vmem:[#allocation2 + $0x2f8] sm:$0xff] }
 0x56a   :  { %5859 = vmatprep.subr.bf16.mxu0 %v5768_v1  ;;  %v12615_v1 = vld [vmem:[#allocation92_spill] sm:$0xff]  ;;  %v8087_v0 = vcombine.high %v12617_v11, %v11617_v12  ;;  %v8086_v7 = vcombine.low %v12617_v11, %v11617_v12 }
 0x56b   :  { %v11621_v3 = vcombine.low %v12615_v1, %v12614_v49 }
 0x56c   :  { %5667 = vmatmul.mubr.bf16.gmra.mrb[56].mxu0 %v11605_v22  ;;  %v5771_v22 = vld [vmem:[#allocation2 + $0x2e0] sm:$0xff] }
 0x56d   :  { %5860 = vmatpush1.bf16.msra.mxu0 %v5767_v42  ;;  %5676 = vmatprep.mubr.bf16.mxu0 %v11609_v45  ;;  %12616 = vst [vmem:[#allocation84_spill] sm:$0xff] %v11621_v3  ;;  %v12618_v42 = vld [vmem:[#allocation52_spill] sm:$0xff]  ;;  %v12619_v45 = vld [vmem:[#allocation58_spill] sm:$0xff] }
 0x56e   :  { %5861 = vmatprep.subr.bf16.mxu0 %v5770_v58  ;;  %v8073_v53 = vrot.slane %v12618_v42, 9  ;;  %v5693_v58 = vrot.slane %v12619_v45, 5  ;;  %v5989_v45 = vld [vmem:[#allocation2 + $0x308] sm:$0xff] }
 0x570   :  { %v11632_v56 = vsel %vm10260_vm12, %v8073_v53, %v5693_v58  ;;  %v5991_v58 = vld [vmem:[#allocation2 + $0x318] sm:$0xff] }
 0x571   :  { %5862 = vmatpush1.bf16.msra.mxu0 %v5769_v60  ;;  %v5773_v60 = vld [vmem:[#allocation2 + $0x2f0] sm:$0xff] }
 0x572   :  { %5863 = vmatprep.subr.bf16.mxu0 %v5772_v61  ;;  %v11636_v61 = vsel %vm10260_vm12, %v8074_v55, %v5697_v4  ;;  %v5990_v55 = vld [vmem:[#allocation2 + $0x310] sm:$0xff] }
 0x573   :  { %v11642_v63 = vcombine.high %v11632_v56, %v11636_v61 }
 0x574   :  { %5677 = vmatmul.mubr.bf16.gmra.mrb[60].mxu0 %v11621_v3 }
 0x575   :  { %5864 = vmatpush1.bf16.msra.mxu0 %v5771_v22  ;;  %5867 = vmatprep.mubr.bf16.mxu0 %v8087_v0  ;;  %12622 = vst [vmem:[#allocation70_spill] sm:$0xff] %v11642_v63  ;;  %v5988_v22 = vld [vmem:[#allocation2 + $0x300] sm:$0xff] }
 0x576   :  { %5865 = vmatprep.subr.bf16.mxu0 %v5774_v52  ;;  %v12623_v0 = vld [vmem:[#allocation91_spill] sm:$0xff]  ;;  %v12624_v52 = vld [vmem:[#allocation34_spill] sm:$0xff] }
 0x577   :  { %v8075_v42 = vrot.slane %v12623_v0, 9  ;;  %v5701_v53 = vrot.slane %v12624_v52, 5  ;;  %v5997_v52 = vld [vmem:[#allocation2 + $0x348] sm:$0xff] }
 0x579   :  { %5866 = vmatpush1.bf16.msra.mxu0 %v5773_v60  ;;  %v11649_v4 = vsel %vm10260_vm12, %v8075_v42, %v5701_v53  ;;  %v5993_v60 = vld [vmem:[#allocation2 + $0x328] sm:$0xff]  ;;  %v5994_v42 = vld [vmem:[#allocation2 + $0x330] sm:$0xff] }
 0x57a   :  { %6052 = vmatprep.subr.bf16.mxu0 %v5989_v45  ;;  %v11653_v45 = vcombine.low %v11632_v56, %v11636_v61  ;;  %v11657_v0 = vcombine.high %v11649_v4, %v11450_v17  ;;  %v11663_v53 = vcombine.low %v11649_v4, %v11450_v17 }
 0x57c   :  { %5868 = vmatmul.mubr.bf16.vlgmr.msra.gmra.mrb[32].mxu0 %v8086_v7  ;;  %12625 = vst [vmem:[#allocation44_spill] sm:$0xff] %v11653_v45  ;;  %12626 = vst [vmem:[#allocation86_spill] sm:$0xff] %v11657_v0  ;;  %v5992_v7 = vld [vmem:[#allocation2 + $0x320] sm:$0xff] }
 0x57d   :  { %6053 = vmatpush1.bf16.msra.mxu0 %v5988_v22  ;;  %5877 = vmatprep.mubr.bf16.mxu0 %v11642_v63  ;;  %v5995_v22 = vld [vmem:[#allocation2 + $0x338] sm:$0xff]  ;;  %12627 = vst [vmem:[#allocation63_spill] sm:$0xff] %v11663_v53 }
 0x57e   :  { %6054 = vmatprep.subr.bf16.mxu0 %v5991_v58  ;;  %v11667_v58 = vcombine.high %v11458_v34, %v11464_v57 }
 0x580   :  { %12628 = vst [vmem:[#allocation87_spill] sm:$0xff] %v11667_v58 }
 0x581   :  { %6055 = vmatpush1.bf16.msra.mxu0 %v5990_v55  ;;  %v5996_v55 = vld [vmem:[#allocation2 + $0x340] sm:$0xff] }
 0x582   :  { %6056 = vmatprep.subr.bf16.mxu0 %v5993_v60  ;;  %v5999_v60 = vld [vmem:[#allocation2 + $0x358] sm:$0xff] }
 0x584   :  { %5878 = vmatmul.mubr.bf16.gmra.mrb[36].mxu0 %v11653_v45  ;;  %v6003_v45 = vld [vmem:[#allocation2 + $0x378] sm:$0xff] }
 0x585   :  { %6057 = vmatpush1.bf16.msra.mxu0 %v5992_v7  ;;  %5887 = vmatprep.mubr.bf16.mxu0 %v11657_v0  ;;  %v5998_v7 = vld [vmem:[#allocation2 + $0x350] sm:$0xff]  ;;  %v11673_v0 = vcombine.low %v11458_v34, %v11464_v57 }
 0x586   :  { %6058 = vmatprep.subr.bf16.mxu0 %v5995_v22  ;;  %v6001_v22 = vld [vmem:[#allocation2 + $0x368] sm:$0xff] }
 0x587   :  { %12629 = vst [vmem:[#allocation88_spill] sm:$0xff] %v11673_v0 }
 0x589   :  { %6059 = vmatpush1.bf16.msra.mxu0 %v5994_v42  ;;  %v8095_v42 = vcombine.high %v12617_v11, %v11476_v6 }
 0x58a   :  { %6060 = vmatprep.subr.bf16.mxu0 %v5997_v52  ;;  %v6000_v52 = vld [vmem:[#allocation2 + $0x360] sm:$0xff] }
 0x58c   :  { %5888 = vmatmul.mubr.bf16.gmra.mrb[40].mxu0 %v11663_v53  ;;  %v6004_v53 = vld [vmem:[#allocation2 + $0x380] sm:$0xff] }
 0x58d   :  { %6061 = vmatpush1.bf16.msra.mxu0 %v5996_v55  ;;  %5897 = vmatprep.mubr.bf16.mxu0 %v11667_v58  ;;  %v6002_v55 = vld [vmem:[#allocation2 + $0x370] sm:$0xff]  ;;  %v8094_v58 = vcombine.low %v12617_v11, %v11476_v6  ;;  %v12636_v11 = vld [vmem:[#allocation50_spill] sm:$0xff] }
 0x58e   :  { %6062 = vmatprep.subr.bf16.mxu0 %v5999_v60  ;;  %v6005_v60 = vld [vmem:[#allocation2 + $0x388] sm:$0xff]  ;;  %v12637_v63 = vmax.f32 %v12636_v11, 0.0  ;;  %v12638_v11 = vld [vmem:[#allocation39_spill] sm:$0xff] }
 0x591   :  { %6063 = vmatpush1.bf16.msra.mxu0 %v5998_v7  ;;  %v11682_v7 = vcombine.high %v11495_v28, %v11499_v46 }
 0x592   :  { %6064 = vmatprep.subr.bf16.mxu0 %v6001_v22  ;;  %v6007_v22 = vld [vmem:[#allocation2 + $0x398] sm:$0xff] }
 0x593   :  { %12630 = vst [vmem:[#allocation89_spill] sm:$0xff] %v11682_v7 }
 0x594   :  { %5898 = vmatmul.mubr.bf16.gmra.mrb[44].mxu0 %v11673_v0  ;;  %v6011_v0 = vld [vmem:[#allocation2 + $0x3b8] sm:$0xff] }
 0x595   :  { %6065 = vmatpush1.bf16.msra.mxu0 %v6000_v52  ;;  %5907 = vmatprep.mubr.bf16.mxu0 %v8095_v42  ;;  %v6006_v42 = vld [vmem:[#allocation2 + $0x390] sm:$0xff]  ;;  %v11687_v52 = vcombine.low %v11495_v28, %v11499_v46 }
 0x596   :  { %6066 = vmatprep.subr.bf16.mxu0 %v6003_v45  ;;  %v6009_v45 = vld [vmem:[#allocation2 + $0x3a8] sm:$0xff] }
 0x597   :  { %12631 = vst [vmem:[#allocation90_spill] sm:$0xff] %v11687_v52 }
 0x599   :  { %6067 = vmatpush1.bf16.msra.mxu0 %v6002_v55  ;;  %v11691_v55 = vcombine.high %v11521_v26, %v11525_v41 }
 0x59a   :  { %6068 = vmatprep.subr.bf16.mxu0 %v6005_v60  ;;  %v6008_v60 = vld [vmem:[#allocation2 + $0x3a0] sm:$0xff] }
 0x59b   :  { %12632 = vst [vmem:[#allocation28_spill] sm:$0xff] %v11691_v55 }
 0x59c   :  { %5908 = vmatmul.mubr.bf16.gmra.mrb[48].mxu0 %v8094_v58  ;;  %v6013_v58 = vld [vmem:[#allocation2 + $0x3c8] sm:$0xff] }
 0x59d   :  { %6069 = vmatpush1.bf16.msra.mxu0 %v6004_v53  ;;  %5917 = vmatprep.mubr.bf16.mxu0 %v11682_v7  ;;  %v6010_v53 = vld [vmem:[#allocation2 + $0x3b0] sm:$0xff]  ;;  %v6015_v7 = vld [vmem:[#allocation2 + $0x3d8] sm:$0xff] }
 0x59e   :  { %6070 = vmatprep.subr.bf16.mxu0 %v6007_v22  ;;  %v11697_v22 = vcombine.low %v11521_v26, %v11525_v41 }
 0x5a0   :  { %12633 = vst [vmem:[#allocation85_spill] sm:$0xff] %v11697_v22 }
 0x5a1   :  { %6071 = vmatpush1.bf16.msra.mxu0 %v6006_v42  ;;  %v11701_v42 = vcombine.high %v11543_v62, %v11547_v50 }
 0x5a2   :  { %6072 = vmatprep.subr.bf16.mxu0 %v6009_v45  ;;  %v6012_v45 = vld [vmem:[#allocation2 + $0x3c0] sm:$0xff] }
 0x5a3   :  { %12634 = vst [vmem:[#allocation30_spill] sm:$0xff] %v11701_v42 }
 0x5a4   :  { %5918 = vmatmul.mubr.bf16.gmra.mrb[52].mxu0 %v11687_v52  ;;  %v6019_v52 = vld [vmem:[#allocation2 + $0x3f8] sm:$0xff] }
 0x5a5   :  { %6073 = vmatpush1.bf16.msra.mxu0 %v6008_v60  ;;  %5927 = vmatprep.mubr.bf16.mxu0 %v11691_v55  ;;  %v6017_v60 = vld [vmem:[#allocation2 + $0x3e8] sm:$0xff]  ;;  %v11707_v55 = vcombine.low %v11543_v62, %v11547_v50 }
 0x5a6   :  { %6074 = vmatprep.subr.bf16.mxu0 %v6011_v0  ;;  %v6014_v0 = vld [vmem:[#allocation2 + $0x3d0] sm:$0xff] }
 0x5a7   :  { %12635 = vst [vmem:[#allocation29_spill] sm:$0xff] %v11707_v55 }
 0x5a9   :  { %6075 = vmatpush1.bf16.msra.mxu0 %v6010_v53  ;;  %v8103_v53 = vcombine.low %v10962_v9, %v10991_v59  ;;  %v8105_v9 = vcombine.low %v11026_v40, %v12594_v19  ;;  %v6233_v59 = vld [vmem:[#allocation2 + $0x400] sm:$0xff]  ;;  %v8104_v40 = vcombine.low %v11017_v38, %v12597_v14  ;;  %v8107_v19 = vcombine.low %v11089_v43, %v12600_v47 }
 0x5aa   :  { %6076 = vmatprep.subr.bf16.mxu0 %v6013_v58  ;;  %v6016_v58 = vld [vmem:[#allocation2 + $0x3e0] sm:$0xff]  ;;  %v8106_v43 = vcombine.low %v12596_v13, %v12603_v5  ;;  %v6246_v13 = vld [vmem:[#allocation2 + $0x468] sm:$0xff] }
 0x5ac   :  { %5928 = vmatmul.mubr.bf16.gmra.mrb[56].mxu0 %v11697_v22 }
 0x5ad   :  { %6077 = vmatpush1.bf16.msra.mxu0 %v6012_v45  ;;  %5937 = vmatprep.mubr.bf16.mxu0 %v11701_v42  ;;  %v8217_v45 = vpack.c.bf16 %v12637_v63, %v12637_v63  ;;  %v6234_v42 = vld [vmem:[#allocation2 + $0x408] sm:$0xff] }
 0x5ae   :  { %6078 = vmatprep.subr.bf16.mxu0 %v6015_v7  ;;  %v6018_v7 = vld [vmem:[#allocation2 + $0x3f0] sm:$0xff] }
 0x5af   :  { %v4783_v22 = vshrl.u32 %v8217_v45, 16 }
 0x5b1   :  { %6079 = vmatpush1.bf16.msra.mxu0 %v6014_v0  ;;  %v8102_v0 = vcombine.low %v10958_v33, %v10987_v25  ;;  %v6238_v33 = vld [vmem:[#allocation2 + $0x428] sm:$0xff] }
 0x5b2   :  { %6080 = vmatprep.subr.bf16.mxu0 %v6017_v60  ;;  %v12639_v60 = vmax.f32 %v12638_v11, 0.0  ;;  %v6242_v11 = vld [vmem:[#allocation2 + $0x448] sm:$0xff] }
 0x5b4   :  { %5938 = vmatmul.mubr.bf16.gmra.mrb[60].mxu0 %v11707_v55  ;;  %v8216_v63 = vpack.c.bf16 %v12639_v60, %v12639_v60  ;;  %v6236_v55 = vld [vmem:[#allocation2 + $0x418] sm:$0xff] }
 0x5b5   :  { %6081 = vmatpush1.bf16.msra.mxu0 %v6016_v58  ;;  %6084 = vmatprep.mubr.bf16.mxu0 %v8103_v53  ;;  %v4785_v58 = vrot.slane %v4783_v22, 7  ;;  %v4786_v53 = vshll.u32 %v8217_v45, 16  ;;  %v6240_v45 = vld [vmem:[#allocation2 + $0x438] sm:$0xff] }
 0x5b6   :  { %6082 = vmatprep.subr.bf16.mxu0 %v6019_v52  ;;  %v6235_v52 = vld [vmem:[#allocation2 + $0x410] sm:$0xff]  ;;  %v4776_v3 = vshrl.u32 %v8216_v63, 16  ;;  %v4779_v22 = vshll.u32 %v8216_v63, 16  ;;  %v6244_v63 = vld [vmem:[#allocation2 + $0x458] sm:$0xff] }
 0x5b7   :  { %v4788_v25 = vor.u32 %v4786_v53, %v4785_v58  ;;  %v6243_v53 = vld [vmem:[#allocation2 + $0x450] sm:$0xff] }
 0x5b9   :  { %6083 = vmatpush1.bf16.msra.mxu0 %v6018_v7  ;;  %v4778_v7 = vrot.slane %v4776_v3, 7  ;;  %v6241_v3 = vld [vmem:[#allocation2 + $0x440] sm:$0xff] }
 0x5ba   :  { %6301 = vmatprep.subr.bf16.mxu0 %v6234_v42  ;;  %v6237_v42 = vld [vmem:[#allocation2 + $0x420] sm:$0xff] }
 0x5bb   :  { %v4781_v14 = vor.u32 %v4779_v22, %v4778_v7  ;;  %v6250_v7 = vld [vmem:[#allocation2 + $0x488] sm:$0xff] }
 0x5bc   :  { %6085 = vmatmul.mubr.bf16.vlgmr.msra.gmra.mrb[32].mxu0 %v8102_v0 }
 0x5bd   :  { %6302 = vmatpush1.bf16.msra.mxu0 %v6233_v59  ;;  %6094 = vmatprep.mubr.bf16.mxu0 %v8105_v9  ;;  %v4948_v9 = vsel %vm9625_vm3, 0, %v4788_v25  ;;  %v4947_v60 = vsel %vm9625_vm3, 0, %v4781_v14  ;;  %v12642_v25 = vld [vmem:[#allocation49_spill] sm:$0xff]  ;;  %v6252_v14 = vld [vmem:[#allocation2 + $0x498] sm:$0xff] }
 0x5be   :  { %6303 = vmatprep.subr.bf16.mxu0 %v6236_v55  ;;  %v6239_v55 = vld [vmem:[#allocation2 + $0x430] sm:$0xff]  ;;  %v11730_v38 = vsel %vm9633_vm6, %v4948_v9, 0  ;;  %v11740_v58 = vsel %vm9633_vm6, %v4947_v60, 0  ;;  %v6253_v60 = vld [vmem:[#allocation2 + $0x4a0] sm:$0xff] }
 0x5bf   :  { %v8109_v47 = vcombine.low %v12599_v20, %v11730_v38  ;;  %v8108_v5 = vcombine.low %v12602_v37, %v11740_v58  ;;  %v8111_v20 = vcombine.low %v12605_v39, %v11234_v18  ;;  %v8110_v37 = vcombine.low %v12606_v31, %v11230_v24  ;;  %v6249_v39 = vld [vmem:[#allocation2 + $0x480] sm:$0xff]  ;;  %v6254_v24 = vld [vmem:[#allocation2 + $0x4a8] sm:$0xff]  ;;  %v6263_v59 = vld [vmem:[#allocation2 + $0x4f0] sm:$0xff] }
 0x5c0   :  { %v8113_v18 = vcombine.low %v11257_v44, %v11330_v8  ;;  %v8112_v44 = vcombine.low %v11253_v36, %v11326_v48  ;;  %v8115_v8 = vcombine.low %v11339_v15, %v11384_v21  ;;  %v8114_v15 = vcombine.low %v11335_v29, %v12615_v1  ;;  %v6262_v29 = vld [vmem:[#allocation2 + $0x4e8] sm:$0xff] }
 0x5c1   :  { %6304 = vmatpush1.bf16.msra.mxu0 %v6235_v52  ;;  %v6245_v52 = vld [vmem:[#allocation2 + $0x460] sm:$0xff]  ;;  %v11782_v0 = vcombine.low %v11740_v58, %v11730_v38 }
 0x5c2   :  { %6305 = vmatprep.subr.bf16.mxu0 %v6238_v33  ;;  %v6248_v33 = vld [vmem:[#allocation2 + $0x478] sm:$0xff] }
 0x5c4   :  { %6095 = vmatmul.mubr.bf16.gmra.mrb[36].mxu0 %v8104_v40  ;;  %v12643_v40 = vmax.f32 %v12642_v25, 0.0 }
 0x5c5   :  { %6306 = vmatpush1.bf16.msra.mxu0 %v6237_v42  ;;  %6104 = vmatprep.mubr.bf16.mxu0 %v8107_v19  ;;  %v6247_v42 = vld [vmem:[#allocation2 + $0x470] sm:$0xff] }
 0x5c6   :  { %6307 = vmatprep.subr.bf16.mxu0 %v6240_v45  ;;  %v8233_v19 = vpack.c.bf16 %v12643_v40, %v12643_v40  ;;  %v12644_v45 = vld [vmem:[#allocation47_spill] sm:$0xff]  ;;  %v6260_v40 = vld [vmem:[#allocation2 + $0x4d8] sm:$0xff] }
 0x5c7   :  { %v12645_v9 = vmax.f32 %v12644_v45, 0.0  ;;  %v6455_v45 = vld [vmem:[#allocation2 + $0x508] sm:$0xff] }
 0x5c8   :  { %v4895_v22 = vshrl.u32 %v8233_v19, 16 }
 0x5c9   :  { %6308 = vmatpush1.bf16.msra.mxu0 %v6239_v55  ;;  %v8232_v55 = vpack.c.bf16 %v12645_v9, %v12645_v9 }
 0x5ca   :  { %6309 = vmatprep.subr.bf16.mxu0 %v6242_v11  ;;  %v4897_v11 = vrot.slane %v4895_v22, 7 }
 0x5cc   :  { %6105 = vmatmul.mubr.bf16.gmra.mrb[40].mxu0 %v8106_v43  ;;  %v4898_v43 = vshll.u32 %v8233_v19, 16 }
 0x5cd   :  { %6310 = vmatpush1.bf16.msra.mxu0 %v6241_v3  ;;  %6114 = vmatprep.mubr.bf16.mxu0 %v8109_v47  ;;  %v6251_v47 = vld [vmem:[#allocation2 + $0x490] sm:$0xff]  ;;  %v4888_v3 = vshrl.u32 %v8232_v55, 16 }
 0x5ce   :  { %6311 = vmatprep.subr.bf16.mxu0 %v6244_v63  ;;  %v4900_v31 = vor.u32 %v4898_v43, %v4897_v11  ;;  %v11792_v43 = vcombine.high %v11740_v58, %v11730_v38 }
 0x5cf   :  { %v4890_v63 = vrot.slane %v4888_v3, 7 }
 0x5d1   :  { %6312 = vmatpush1.bf16.msra.mxu0 %v6243_v53  ;;  %v4891_v53 = vshll.u32 %v8232_v55, 16  ;;  %v12648_v55 = vld [vmem:[#allocation51_spill] sm:$0xff] }
 0x5d2   :  { %6313 = vmatprep.subr.bf16.mxu0 %v6246_v13  ;;  %v6256_v13 = vld [vmem:[#allocation2 + $0x4b8] sm:$0xff] }
 0x5d3   :  { %v4893_v48 = vor.u32 %v4891_v53, %v4890_v63  ;;  %v6459_v63 = vld [vmem:[#allocation2 + $0x528] sm:$0xff] }
 0x5d4   :  { %6115 = vmatmul.mubr.bf16.gmra.mrb[44].mxu0 %v8108_v5  ;;  %v4964_v5 = vsel %vm9625_vm3, 0, %v4900_v31  ;;  %v6457_v31 = vld [vmem:[#allocation2 + $0x518] sm:$0xff] }
 0x5d5   :  { %6314 = vmatpush1.bf16.msra.mxu0 %v6245_v52  ;;  %6124 = vmatprep.mubr.bf16.mxu0 %v8111_v20  ;;  %v6255_v20 = vld [vmem:[#allocation2 + $0x4b0] sm:$0xff]  ;;  %v11764_v36 = vsel %vm9633_vm6, %v4964_v5, 0  ;;  %v6258_v52 = vld [vmem:[#allocation2 + $0x4c8] sm:$0xff]  ;;  %v4963_v25 = vsel %vm9625_vm3, 0, %v4893_v48  ;;  %v6458_v48 = vld [vmem:[#allocation2 + $0x520] sm:$0xff] }
 0x5d6   :  { %6315 = vmatprep.subr.bf16.mxu0 %v6248_v33  ;;  %v8117_v21 = vcombine.low %v11401_v35, %v11764_v36  ;;  %v6257_v33 = vld [vmem:[#allocation2 + $0x4c0] sm:$0xff]  ;;  %v11774_v19 = vsel %vm9633_vm6, %v4963_v25, 0  ;;  %v12646_v35 = vld [vmem:[#allocation38_spill] sm:$0xff]  ;;  %v12651_v5 = vld [vmem:[#allocation48_spill] sm:$0xff] }
 0x5d7   :  { %v8116_v1 = vcombine.low %v12614_v49, %v11774_v19  ;;  %v6209_v49 = vshll.u32 %v11782_v0, 16 }
 0x5d9   :  { %6316 = vmatpush1.bf16.msra.mxu0 %v6247_v42  ;;  %v6259_v42 = vld [vmem:[#allocation2 + $0x4d0] sm:$0xff] }
 0x5da   :  { %6317 = vmatprep.subr.bf16.mxu0 %v6250_v7  ;;  %v12647_v7 = vld [vmem:[#allocation74_spill] sm:$0xff] }
 0x5db   :  { %v8123_v22 = vcombine.high %v12647_v7, %v12646_v35  ;;  %v8122_v9 = vcombine.low %v12647_v7, %v12646_v35  ;;  %v6462_v35 = vld [vmem:[#allocation2 + $0x540] sm:$0xff]  ;;  %v6465_v7 = vld [vmem:[#allocation2 + $0x558] sm:$0xff] }
 0x5dc   :  { %6125 = vmatmul.mubr.bf16.gmra.mrb[48].mxu0 %v8110_v37  ;;  %v6261_v37 = vld [vmem:[#allocation2 + $0x4e0] sm:$0xff] }
 0x5dd   :  { %6318 = vmatpush1.bf16.msra.mxu0 %v6249_v39  ;;  %6134 = vmatprep.mubr.bf16.mxu0 %v8113_v18  ;;  %v6264_v18 = vld [vmem:[#allocation2 + $0x4f8] sm:$0xff]  ;;  %v6206_v39 = vshrl.u32 %v11782_v0, 16 }
 0x5de   :  { %6319 = vmatprep.subr.bf16.mxu0 %v6252_v14  ;;  %v12649_v14 = vld [vmem:[#allocation66_spill] sm:$0xff] }
 0x5df   :  { %v8125_v11 = vcombine.high %v12649_v14, %v12648_v55  ;;  %v6208_v3 = vrot.slane %v6206_v39, 4  ;;  %v8124_v53 = vcombine.low %v12649_v14, %v12648_v55  ;;  %v6468_v55 = vld [vmem:[#allocation2 + $0x570] sm:$0xff] }
 0x5e1   :  { %6320 = vmatpush1.bf16.msra.mxu0 %v6251_v47  ;;  %v6454_v47 = vld [vmem:[#allocation2 + $0x500] sm:$0xff] }
 0x5e2   :  { %6321 = vmatprep.subr.bf16.mxu0 %v6254_v24  ;;  %v6211_v24 = vrot.slane %v6209_v49, 5  ;;  %v11813_v49 = vcombine.low %v11774_v19, %v11764_v36 }
 0x5e4   :  { %6135 = vmatmul.mubr.bf16.gmra.mrb[52].mxu0 %v8112_v44  ;;  %v6456_v44 = vld [vmem:[#allocation2 + $0x510] sm:$0xff]  ;;  %v6220_v14 = vshrl.u32 %v11813_v49, 16 }
 0x5e5   :  { %6322 = vmatpush1.bf16.msra.mxu0 %v6253_v60  ;;  %6144 = vmatprep.mubr.bf16.mxu0 %v8115_v8  ;;  %v6212_v8 = vor.u32 %v6211_v24, %v6208_v3  ;;  %v6215_v60 = vshll.u32 %v11792_v43, 16  ;;  %v8133_v24 = vcombine.high %v11424_v23, %v11468_v16 }
 0x5e6   :  { %6323 = vmatprep.subr.bf16.mxu0 %v6256_v13  ;;  %v12650_v13 = vld [vmem:[#allocation59_spill] sm:$0xff] }
 0x5e9   :  { %6324 = vmatpush1.bf16.msra.mxu0 %v6255_v20  ;;  %v8127_v20 = vcombine.high %v12651_v5, %v12650_v13 }
 0x5ea   :  { %6325 = vmatprep.subr.bf16.mxu0 %v6258_v52  ;;  %v6213_v52 = vrot.slane %v6212_v8, 4  ;;  %v6222_v8 = vrot.slane %v6220_v14, 4  ;;  %v6672_v14 = vld [vmem:[#allocation2 + $0x628] sm:$0xff] }
 0x5ec   :  { %6145 = vmatmul.mubr.bf16.gmra.mrb[56].mxu0 %v8114_v15  ;;  %v6217_v15 = vrot.slane %v6215_v60, 5 }
 0x5ed   :  { %6326 = vmatpush1.bf16.msra.mxu0 %v6257_v33  ;;  %6154 = vmatprep.mubr.bf16.mxu0 %v8117_v21  ;;  %v6461_v21 = vld [vmem:[#allocation2 + $0x538] sm:$0xff]  ;;  %v6460_v33 = vld [vmem:[#allocation2 + $0x530] sm:$0xff] }
 0x5ee   :  { %6327 = vmatprep.subr.bf16.mxu0 %v6260_v40  ;;  %v11801_v25 = vsel %vm9678_vm9, %v6213_v52, %v6217_v15  ;;  %v6463_v40 = vld [vmem:[#allocation2 + $0x548] sm:$0xff]  ;;  %v6474_v52 = vld [vmem:[#allocation2 + $0x5a0] sm:$0xff] }
 0x5f1   :  { %6328 = vmatpush1.bf16.msra.mxu0 %v6259_v42  ;;  %v8126_v42 = vcombine.low %v12651_v5, %v12650_v13  ;;  %v6475_v5 = vld [vmem:[#allocation2 + $0x5a8] sm:$0xff] }
 0x5f2   :  { %6329 = vmatprep.subr.bf16.mxu0 %v6262_v29  ;;  %v12652_v29 = vld [vmem:[#allocation53_spill] sm:$0xff] }
 0x5f4   :  { %6155 = vmatmul.mubr.bf16.gmra.mrb[60].mxu0 %v8116_v1  ;;  %v8129_v1 = vcombine.high %v12652_v29, %v11801_v25 }
 0x5f5   :  { %6330 = vmatpush1.bf16.msra.mxu0 %v6261_v37  ;;  %6333 = vmatprep.mubr.bf16.mxu0 %v8123_v22  ;;  %v6464_v22 = vld [vmem:[#allocation2 + $0x550] sm:$0xff]  ;;  %v6467_v37 = vld [vmem:[#allocation2 + $0x568] sm:$0xff] }
 0x5f6   :  { %6331 = vmatprep.subr.bf16.mxu0 %v6264_v18  ;;  %v8128_v18 = vcombine.low %v12652_v29, %v11801_v25  ;;  %v6479_v29 = vld [vmem:[#allocation2 + $0x5c8] sm:$0xff] }
 0x5f9   :  { %6332 = vmatpush1.bf16.msra.mxu0 %v6263_v59  ;;  %v12653_v59 = vld [vmem:[#allocation82_spill] sm:$0xff] }
 0x5fa   :  { %6522 = vmatprep.subr.bf16.mxu0 %v6455_v45  ;;  %v8131_v39 = vcombine.high %v12653_v59, %v11420_v27  ;;  %v6466_v45 = vld [vmem:[#allocation2 + $0x560] sm:$0xff]  ;;  %v8130_v3 = vcombine.low %v12653_v59, %v11420_v27  ;;  %v6668_v59 = vld [vmem:[#allocation2 + $0x608] sm:$0xff] }
 0x5fc   :  { %6334 = vmatmul.mubr.bf16.vlgmr.msra.gmra.mrb[32].mxu0 %v8122_v9  ;;  %v6469_v9 = vld [vmem:[#allocation2 + $0x578] sm:$0xff] }
 0x5fd   :  { %6523 = vmatpush1.bf16.msra.mxu0 %v6454_v47  ;;  %6343 = vmatprep.mubr.bf16.mxu0 %v8125_v11  ;;  %v6223_v11 = vshll.u32 %v11813_v49, 16  ;;  %v6471_v47 = vld [vmem:[#allocation2 + $0x588] sm:$0xff] }
 0x5fe   :  { %6524 = vmatprep.subr.bf16.mxu0 %v6457_v31  ;;  %v11823_v31 = vcombine.high %v11774_v19, %v11764_v36 }
 0x5ff   :  { %v6225_v60 = vrot.slane %v6223_v11, 5  ;;  %v8142_v11 = vcombine.low %v11636_v61, %v11649_v4 }
 0x600   :  { %v6229_v27 = vshll.u32 %v11823_v31, 16 }
 0x601   :  { %6525 = vmatpush1.bf16.msra.mxu0 %v6456_v44  ;;  %v6470_v44 = vld [vmem:[#allocation2 + $0x580] sm:$0xff]  ;;  %v6226_v13 = vor.u32 %v6225_v60, %v6222_v8  ;;  %v6678_v60 = vld [vmem:[#allocation2 + $0x658] sm:$0xff] }
 0x602   :  { %6526 = vmatprep.subr.bf16.mxu0 %v6459_v63  ;;  %v6473_v63 = vld [vmem:[#allocation2 + $0x598] sm:$0xff] }
 0x603   :  { %v6227_v15 = vrot.slane %v6226_v13, 4 }
 0x604   :  { %6344 = vmatmul.mubr.bf16.gmra.mrb[36].mxu0 %v8124_v53  ;;  %v6472_v53 = vld [vmem:[#allocation2 + $0x590] sm:$0xff] }
 0x605   :  { %6527 = vmatpush1.bf16.msra.mxu0 %v6458_v48  ;;  %6353 = vmatprep.mubr.bf16.mxu0 %v8127_v20  ;;  %v8132_v20 = vcombine.low %v11424_v23, %v11468_v16  ;;  %v8135_v48 = vcombine.high %v11472_v2, %v11505_v54  ;;  %v8134_v23 = vcombine.low %v11472_v2, %v11505_v54  ;;  %v6482_v54 = vld [vmem:[#allocation2 + $0x5e0] sm:$0xff] }
 0x606   :  { %6528 = vmatprep.subr.bf16.mxu0 %v6461_v21  ;;  %v6231_v21 = vrot.slane %v6229_v27, 5  ;;  %v8141_v2 = vcombine.high %v11617_v12, %v11632_v56  ;;  %v6682_v27 = vld [vmem:[#allocation2 + $0x678] sm:$0xff] }
 0x609   :  { %6529 = vmatpush1.bf16.msra.mxu0 %v6460_v33  ;;  %v6477_v33 = vld [vmem:[#allocation2 + $0x5b8] sm:$0xff] }
 0x60a   :  { %6530 = vmatprep.subr.bf16.mxu0 %v6463_v40  ;;  %v6476_v40 = vld [vmem:[#allocation2 + $0x5b0] sm:$0xff] }
 0x60c   :  { %6354 = vmatmul.mubr.bf16.gmra.mrb[40].mxu0 %v8126_v42  ;;  %v11832_v42 = vsel %vm9678_vm9, %v6227_v15, %v6231_v21  ;;  %v6686_v15 = vld [vmem:[#allocation2 + $0x698] sm:$0xff]  ;;  %v6685_v21 = vld [vmem:[#allocation2 + $0x690] sm:$0xff] }
 0x60d   :  { %6531 = vmatpush1.bf16.msra.mxu0 %v6462_v35  ;;  %6363 = vmatprep.mubr.bf16.mxu0 %v8129_v1  ;;  %v8137_v16 = vcombine.high %v11509_v30, %v11832_v42  ;;  %v6478_v1 = vld [vmem:[#allocation2 + $0x5c0] sm:$0xff]  ;;  %v6481_v35 = vld [vmem:[#allocation2 + $0x5d8] sm:$0xff]  ;;  %v8136_v10 = vcombine.low %v11509_v30, %v11832_v42  ;;  %v8143_v30 = vcombine.high %v11636_v61, %v11649_v4  ;;  %v6676_v61 = vld [vmem:[#allocation2 + $0x648] sm:$0xff] }
 0x60e   :  { %6532 = vmatprep.subr.bf16.mxu0 %v6465_v7  ;;  %v6480_v7 = vld [vmem:[#allocation2 + $0x5d0] sm:$0xff]  ;;  %v8144_v4 = vcombine.low %v11450_v17, %v11458_v34 }
 0x611   :  { %6533 = vmatpush1.bf16.msra.mxu0 %v6464_v22  ;;  %v6483_v22 = vld [vmem:[#allocation2 + $0x5e8] sm:$0xff] }
 0x612   :  { %6534 = vmatprep.subr.bf16.mxu0 %v6467_v37  ;;  %v6485_v37 = vld [vmem:[#allocation2 + $0x5f8] sm:$0xff] }
 0x614   :  { %6364 = vmatmul.mubr.bf16.gmra.mrb[44].mxu0 %v8128_v18  ;;  %v6484_v18 = vld [vmem:[#allocation2 + $0x5f0] sm:$0xff] }
 0x615   :  { %6535 = vmatpush1.bf16.msra.mxu0 %v6466_v45  ;;  %6373 = vmatprep.mubr.bf16.mxu0 %v8131_v39  ;;  %v8140_v39 = vcombine.low %v11617_v12, %v11632_v56  ;;  %v6667_v45 = vld [vmem:[#allocation2 + $0x600] sm:$0xff]  ;;  %v8145_v56 = vcombine.high %v11450_v17, %v11458_v34  ;;  %v8149_v17 = vcombine.high %v11476_v6, %v11495_v28 }
 0x616   :  { %6536 = vmatprep.subr.bf16.mxu0 %v6469_v9  ;;  %v6670_v9 = vld [vmem:[#allocation2 + $0x618] sm:$0xff]  ;;  %v6671_v12 = vld [vmem:[#allocation2 + $0x620] sm:$0xff] }
 0x617   :  { %v6679_v34 = vld [vmem:[#allocation2 + $0x660] sm:$0xff] }
 0x619   :  { %6537 = vmatpush1.bf16.msra.mxu0 %v6468_v55  ;;  %v6669_v55 = vld [vmem:[#allocation2 + $0x610] sm:$0xff] }
 0x61a   :  { %6538 = vmatprep.subr.bf16.mxu0 %v6471_v47  ;;  %v8138_v47 = vrot.slane %v11782_v0, 9 }
 0x61c   :  { %6374 = vmatmul.mubr.bf16.gmra.mrb[48].mxu0 %v8130_v3  ;;  %v6448_v3 = vrot.slane %v11792_v43, 5  ;;  %v6675_v43 = vld [vmem:[#allocation2 + $0x640] sm:$0xff] }
 0x61d   :  { %6539 = vmatpush1.bf16.msra.mxu0 %v6470_v44  ;;  %6383 = vmatprep.mubr.bf16.mxu0 %v8133_v24  ;;  %v6674_v24 = vld [vmem:[#allocation2 + $0x638] sm:$0xff]  ;;  %v6673_v44 = vld [vmem:[#allocation2 + $0x630] sm:$0xff] }
 0x61e   :  { %6540 = vmatprep.subr.bf16.mxu0 %v6473_v63  ;;  %v11854_v8 = vsel %vm10260_vm12, %v8138_v47, %v6448_v3  ;;  %v6677_v63 = vld [vmem:[#allocation2 + $0x650] sm:$0xff]  ;;  %v6860_v47 = vld [vmem:[#allocation2 + $0x740] sm:$0xff]  ;;  %v6863_v3 = vld [vmem:[#allocation2 + $0x758] sm:$0xff] }
 0x61f   :  { %v8147_v0 = vcombine.high %v11464_v57, %v11854_v8  ;;  %v8146_v13 = vcombine.low %v11464_v57, %v11854_v8  ;;  %v8151_v57 = vcombine.high %v11499_v46, %v11521_v26 }
 0x621   :  { %6541 = vmatpush1.bf16.msra.mxu0 %v6472_v53  ;;  %v6680_v53 = vld [vmem:[#allocation2 + $0x668] sm:$0xff] }
 0x622   :  { %6542 = vmatprep.subr.bf16.mxu0 %v6475_v5  ;;  %v6681_v5 = vld [vmem:[#allocation2 + $0x670] sm:$0xff] }
 0x624   :  { %6384 = vmatmul.mubr.bf16.gmra.mrb[52].mxu0 %v8132_v20  ;;  %v6684_v20 = vld [vmem:[#allocation2 + $0x688] sm:$0xff] }
 0x625   :  { %6543 = vmatpush1.bf16.msra.mxu0 %v6474_v52  ;;  %6393 = vmatprep.mubr.bf16.mxu0 %v8135_v48  ;;  %v8148_v48 = vcombine.low %v11476_v6, %v11495_v28  ;;  %v6683_v52 = vld [vmem:[#allocation2 + $0x680] sm:$0xff]  ;;  %v8153_v6 = vcombine.high %v11525_v41, %v11543_v62 }
 0x626   :  { %6544 = vmatprep.subr.bf16.mxu0 %v6477_v33  ;;  %v6688_v33 = vld [vmem:[#allocation2 + $0x6a8] sm:$0xff]  ;;  %v6687_v28 = vld [vmem:[#allocation2 + $0x6a0] sm:$0xff] }
 0x629   :  { %6545 = vmatpush1.bf16.msra.mxu0 %v6476_v40  ;;  %v8150_v40 = vcombine.low %v11499_v46, %v11521_v26  ;;  %v6692_v46 = vld [vmem:[#allocation2 + $0x6c8] sm:$0xff]  ;;  %v8152_v26 = vcombine.low %v11525_v41, %v11543_v62  ;;  %v6698_v41 = vld [vmem:[#allocation2 + $0x6f8] sm:$0xff]  ;;  %v6697_v62 = vld [vmem:[#allocation2 + $0x6f0] sm:$0xff] }
 0x62a   :  { %6546 = vmatprep.subr.bf16.mxu0 %v6479_v29  ;;  %v8139_v29 = vrot.slane %v11813_v49, 9 }
 0x62c   :  { %6394 = vmatmul.mubr.bf16.gmra.mrb[56].mxu0 %v8134_v23  ;;  %v6452_v23 = vrot.slane %v11823_v31, 5  ;;  %v6691_v31 = vld [vmem:[#allocation2 + $0x6c0] sm:$0xff] }
 0x62d   :  { %6547 = vmatpush1.bf16.msra.mxu0 %v6478_v1  ;;  %6403 = vmatprep.mubr.bf16.mxu0 %v8137_v16  ;;  %v6690_v16 = vld [vmem:[#allocation2 + $0x6b8] sm:$0xff]  ;;  %v6689_v1 = vld [vmem:[#allocation2 + $0x6b0] sm:$0xff] }
 0x62e   :  { %6548 = vmatprep.subr.bf16.mxu0 %v6481_v35  ;;  %v11876_v35 = vsel %vm10260_vm12, %v8139_v29, %v6452_v23  ;;  %v6881_v29 = vld [vmem:[#allocation2 + $0x7e8] sm:$0xff] }
 0x62f   :  { %v8155_v49 = vcombine.high %v11547_v50, %v11876_v35  ;;  %v8154_v32 = vcombine.low %v11547_v50, %v11876_v35  ;;  %v6854_v50 = vld [vmem:[#allocation2 + $0x710] sm:$0xff] }
 0x631   :  { %6549 = vmatpush1.bf16.msra.mxu0 %v6480_v7  ;;  %v6694_v7 = vld [vmem:[#allocation2 + $0x6d8] sm:$0xff] }
 0x632   :  { %6550 = vmatprep.subr.bf16.mxu0 %v6483_v22  ;;  %v6693_v22 = vld [vmem:[#allocation2 + $0x6d0] sm:$0xff] }
 0x634   :  { %6404 = vmatmul.mubr.bf16.gmra.mrb[60].mxu0 %v8136_v10  ;;  %v6696_v10 = vld [vmem:[#allocation2 + $0x6e8] sm:$0xff] }
 0x635   :  { %6551 = vmatpush1.bf16.msra.mxu0 %v6482_v54  ;;  %6554 = vmatprep.mubr.bf16.mxu0 %v8141_v2  ;;  %v6695_v2 = vld [vmem:[#allocation2 + $0x6e0] sm:$0xff]  ;;  %v6853_v54 = vld [vmem:[#allocation2 + $0x708] sm:$0xff] }
 0x636   :  { %6552 = vmatprep.subr.bf16.mxu0 %v6485_v37  ;;  %v6852_v37 = vld [vmem:[#allocation2 + $0x700] sm:$0xff] }
 0x639   :  { %6553 = vmatpush1.bf16.msra.mxu0 %v6484_v18  ;;  %v6855_v18 = vld [vmem:[#allocation2 + $0x718] sm:$0xff] }
 0x63a   :  { %6707 = vmatprep.subr.bf16.mxu0 %v6668_v59  ;;  %v12654_v59 = vld [vmem:[#allocation56_spill] sm:$0xff] }
 0x63c   :  { %6555 = vmatmul.mubr.bf16.vlgmr.msra.gmra.mrb[32].mxu0 %v8140_v39  ;;  %v12655_v39 = vld [vmem:[#allocation64_spill] sm:$0xff] }
 0x63d   :  { %6708 = vmatpush1.bf16.msra.mxu0 %v6667_v45  ;;  %6564 = vmatprep.mubr.bf16.mxu0 %v8143_v30  ;;  %v6857_v30 = vld [vmem:[#allocation2 + $0x728] sm:$0xff]  ;;  %v6856_v45 = vld [vmem:[#allocation2 + $0x720] sm:$0xff] }
 0x63e   :  { %6709 = vmatprep.subr.bf16.mxu0 %v6670_v9  ;;  %v6859_v9 = vld [vmem:[#allocation2 + $0x738] sm:$0xff] }
 0x641   :  { %6710 = vmatpush1.bf16.msra.mxu0 %v6669_v55  ;;  %v12657_v55 = vld [vmem:[#allocation71_spill] sm:$0xff] }
 0x642   :  { %6711 = vmatprep.subr.bf16.mxu0 %v6672_v14  ;;  %v6858_v14 = vld [vmem:[#allocation2 + $0x730] sm:$0xff] }
 0x644   :  { %6565 = vmatmul.mubr.bf16.gmra.mrb[36].mxu0 %v8142_v11  ;;  %v6861_v11 = vld [vmem:[#allocation2 + $0x748] sm:$0xff] }
 0x645   :  { %6712 = vmatpush1.bf16.msra.mxu0 %v6671_v12  ;;  %6574 = vmatprep.mubr.bf16.mxu0 %v8145_v56  ;;  %v12658_v56 = vld [vmem:[#allocation26_spill] sm:$0xff] }
 0x646   :  { %6713 = vmatprep.subr.bf16.mxu0 %v6674_v24  ;;  %v8157_v12 = vcombine.low %v11730_v38, %v12658_v56  ;;  %v12659_v24 = vld [vmem:[#allocation72_spill] sm:$0xff]  ;;  %v12660_v38 = vld [vmem:[#allocation78_spill] sm:$0xff]  ;;  %v8158_v23 = vcombine.low %v11774_v19, %v12658_v56  ;;  %v7039_v19 = vld [vmem:[#allocation2 + $0x810] sm:$0xff] }
 0x649   :  { %6714 = vmatpush1.bf16.msra.mxu0 %v6673_v44  ;;  %v6862_v44 = vld [vmem:[#allocation2 + $0x750] sm:$0xff] }
 0x64a   :  { %6715 = vmatprep.subr.bf16.mxu0 %v6676_v61  ;;  %v6865_v61 = vld [vmem:[#allocation2 + $0x768] sm:$0xff] }
 0x64c   :  { %6575 = vmatmul.mubr.bf16.gmra.mrb[40].mxu0 %v8144_v4  ;;  %v8156_v4 = vcombine.low %v11740_v58, %v12658_v56  ;;  %v6870_v58 = vld [vmem:[#allocation2 + $0x790] sm:$0xff] }
 0x64d   :  { %6716 = vmatpush1.bf16.msra.mxu0 %v6675_v43  ;;  %6584 = vmatprep.mubr.bf16.mxu0 %v8147_v0  ;;  %v6864_v0 = vld [vmem:[#allocation2 + $0x760] sm:$0xff]  ;;  %v6867_v43 = vld [vmem:[#allocation2 + $0x778] sm:$0xff] }
 0x64e   :  { %6717 = vmatprep.subr.bf16.mxu0 %v6678_v60  ;;  %v6866_v60 = vld [vmem:[#allocation2 + $0x770] sm:$0xff] }
 0x651   :  { %6718 = vmatpush1.bf16.msra.mxu0 %v6677_v63  ;;  %v6869_v63 = vld [vmem:[#allocation2 + $0x788] sm:$0xff] }
 0x652   :  { %6719 = vmatprep.subr.bf16.mxu0 %v6680_v53  ;;  %v6868_v53 = vld [vmem:[#allocation2 + $0x780] sm:$0xff] }
 0x654   :  { %6585 = vmatmul.mubr.bf16.gmra.mrb[44].mxu0 %v8146_v13  ;;  %v6871_v13 = vld [vmem:[#allocation2 + $0x798] sm:$0xff] }
 0x655   :  { %6720 = vmatpush1.bf16.msra.mxu0 %v6679_v34  ;;  %6594 = vmatprep.mubr.bf16.mxu0 %v8149_v17  ;;  %v12661_v17 = vld [vmem:[#allocation79_spill] sm:$0xff]  ;;  %v12662_v34 = vld [vmem:[#allocation80_spill] sm:$0xff] }
 0x656   :  { %6721 = vmatprep.subr.bf16.mxu0 %v6682_v27  ;;  %v6873_v27 = vld [vmem:[#allocation2 + $0x7a8] sm:$0xff] }
 0x659   :  { %6722 = vmatpush1.bf16.msra.mxu0 %v6681_v5  ;;  %v6872_v5 = vld [vmem:[#allocation2 + $0x7a0] sm:$0xff] }
 0x65a   :  { %6723 = vmatprep.subr.bf16.mxu0 %v6684_v20  ;;  %v6875_v20 = vld [vmem:[#allocation2 + $0x7b8] sm:$0xff] }
 0x65c   :  { %6595 = vmatmul.mubr.bf16.gmra.mrb[48].mxu0 %v8148_v48  ;;  %v12663_v48 = vld [vmem:[#allocation81_spill] sm:$0xff] }
 0x65d   :  { %6724 = vmatpush1.bf16.msra.mxu0 %v6683_v52  ;;  %6604 = vmatprep.mubr.bf16.mxu0 %v8151_v57  ;;  %v12664_v57 = vld [vmem:[#allocation83_spill] sm:$0xff]  ;;  %v6874_v52 = vld [vmem:[#allocation2 + $0x7b0] sm:$0xff] }
 0x65e   :  { %6725 = vmatprep.subr.bf16.mxu0 %v6686_v15  ;;  %v6877_v15 = vld [vmem:[#allocation2 + $0x7c8] sm:$0xff] }
 0x661   :  { %6726 = vmatpush1.bf16.msra.mxu0 %v6685_v21  ;;  %v8159_v21 = vcombine.low %v11764_v36, %v12658_v56  ;;  %v12666_v36 = vld [vmem:[#allocation35_spill] sm:$0xff]  ;;  %v7051_v56 = vld [vmem:[#allocation2 + $0x870] sm:$0xff] }
 0x662   :  { %6727 = vmatprep.subr.bf16.mxu0 %v6688_v33  ;;  %v6876_v33 = vld [vmem:[#allocation2 + $0x7c0] sm:$0xff] }
 0x664   :  { %6605 = vmatmul.mubr.bf16.gmra.mrb[52].mxu0 %v8150_v40  ;;  %v6879_v40 = vld [vmem:[#allocation2 + $0x7d8] sm:$0xff] }
 0x665   :  { %6728 = vmatpush1.bf16.msra.mxu0 %v6687_v28  ;;  %6614 = vmatprep.mubr.bf16.mxu0 %v8153_v6  ;;  %v12665_v6 = vld [vmem:[#allocation84_spill] sm:$0xff]  ;;  %v6878_v28 = vld [vmem:[#allocation2 + $0x7d0] sm:$0xff] }
 0x666   :  { %6729 = vmatprep.subr.bf16.mxu0 %v6690_v16  ;;  %v6880_v16 = vld [vmem:[#allocation2 + $0x7e0] sm:$0xff] }
 0x669   :  { %6730 = vmatpush1.bf16.msra.mxu0 %v6689_v1  ;;  %v6883_v1 = vld [vmem:[#allocation2 + $0x7f8] sm:$0xff] }
 0x66a   :  { %6731 = vmatprep.subr.bf16.mxu0 %v6692_v46  ;;  %v6882_v46 = vld [vmem:[#allocation2 + $0x7f0] sm:$0xff] }
 0x66c   :  { %6615 = vmatmul.mubr.bf16.gmra.mrb[56].mxu0 %v8152_v26  ;;  %v7038_v26 = vld [vmem:[#allocation2 + $0x808] sm:$0xff] }
 0x66d   :  { %6732 = vmatpush1.bf16.msra.mxu0 %v6691_v31  ;;  %6624 = vmatprep.mubr.bf16.mxu0 %v8155_v49  ;;  %v7037_v49 = vld [vmem:[#allocation2 + $0x800] sm:$0xff]  ;;  %v7040_v31 = vld [vmem:[#allocation2 + $0x818] sm:$0xff] }
 0x66e   :  { %6733 = vmatprep.subr.bf16.mxu0 %v6694_v7  ;;  %v12667_v7 = vld [vmem:[#allocation75_spill] sm:$0xff] }
 0x671   :  { %6734 = vmatpush1.bf16.msra.mxu0 %v6693_v22  ;;  %v12668_v22 = vld [vmem:[#allocation43_spill] sm:$0xff] }
 0x672   :  { %6735 = vmatprep.subr.bf16.mxu0 %v6696_v10  ;;  %v7042_v10 = vld [vmem:[#allocation2 + $0x828] sm:$0xff] }
 0x674   :  { %6625 = vmatmul.mubr.bf16.gmra.mrb[60].mxu0 %v8154_v32  ;;  %v7041_v32 = vld [vmem:[#allocation2 + $0x820] sm:$0xff] }
 0x675   :  { %6736 = vmatpush1.bf16.msra.mxu0 %v6695_v2  ;;  %6739 = vmatprep.mubr.bf16.mxu0 %v11556_v51  ;;  %v12656_v51 = vld [vmem:[#allocation65_spill] sm:$0xff]  ;;  %v7044_v2 = vld [vmem:[#allocation2 + $0x838] sm:$0xff] }
 0x676   :  { %6737 = vmatprep.subr.bf16.mxu0 %v6698_v41  ;;  %v12669_v41 = vld [vmem:[#allocation69_spill] sm:$0xff] }
 0x679   :  { %6738 = vmatpush1.bf16.msra.mxu0 %v6697_v62  ;;  %v12670_v62 = vld [vmem:[#allocation62_spill] sm:$0xff] }
 0x67a   :  { %6892 = vmatprep.subr.bf16.mxu0 %v6853_v54  ;;  %v7043_v54 = vld [vmem:[#allocation2 + $0x830] sm:$0xff] }
 0x67c   :  { %6740 = vmatmul.mubr.bf16.vlgmr.msra.gmra.mrb[32].mxu0 %v12654_v59 }
 0x67d   :  { %6893 = vmatpush1.bf16.msra.mxu0 %v6852_v37  ;;  %6749 = vmatprep.mubr.bf16.mxu0 %v12655_v39  ;;  %v7046_v37 = vld [vmem:[#allocation2 + $0x848] sm:$0xff]  ;;  %v7045_v39 = vld [vmem:[#allocation2 + $0x840] sm:$0xff] }
 0x67e   :  { %6894 = vmatprep.subr.bf16.mxu0 %v6855_v18  ;;  %v12671_v18 = vld [vmem:[#allocation33_spill] sm:$0xff] }
 0x67f   :  { %v8161_v59 = vcombine.high %v11801_v25, %v12671_v18 }
 0x681   :  { %6895 = vmatpush1.bf16.msra.mxu0 %v6854_v50  ;;  %v7048_v50 = vld [vmem:[#allocation2 + $0x858] sm:$0xff] }
 0x682   :  { %6896 = vmatprep.subr.bf16.mxu0 %v6857_v30  ;;  %v12672_v30 = vld [vmem:[#allocation42_spill] sm:$0xff] }
 0x684   :  { %6750 = vmatmul.mubr.bf16.gmra.mrb[36].mxu0 %v12656_v51  ;;  %v8160_v51 = vcombine.low %v11801_v25, %v12671_v18  ;;  %v7055_v25 = vld [vmem:[#allocation2 + $0x890] sm:$0xff] }
 0x685   :  { %6897 = vmatpush1.bf16.msra.mxu0 %v6856_v45  ;;  %6759 = vmatprep.mubr.bf16.mxu0 %v12657_v55  ;;  %v7047_v45 = vld [vmem:[#allocation2 + $0x850] sm:$0xff]  ;;  %v7049_v55 = vld [vmem:[#allocation2 + $0x860] sm:$0xff] }
 0x686   :  { %6898 = vmatprep.subr.bf16.mxu0 %v6859_v9  ;;  %v7050_v9 = vld [vmem:[#allocation2 + $0x868] sm:$0xff] }
 0x689   :  { %6899 = vmatpush1.bf16.msra.mxu0 %v6858_v14  ;;  %v7052_v14 = vld [vmem:[#allocation2 + $0x878] sm:$0xff] }
 0x68a   :  { %6900 = vmatprep.subr.bf16.mxu0 %v6861_v11  ;;  %v12673_v11 = vld [vmem:[#allocation27_spill] sm:$0xff] }
 0x68c   :  { %6760 = vmatmul.mubr.bf16.gmra.mrb[40].mxu0 %v12659_v24  ;;  %v12674_v24 = vld [vmem:[#allocation37_spill] sm:$0xff] }
 0x68d   :  { %6901 = vmatpush1.bf16.msra.mxu0 %v6860_v47  ;;  %6769 = vmatprep.mubr.bf16.mxu0 %v8157_v12  ;;  %v7054_v12 = vld [vmem:[#allocation2 + $0x888] sm:$0xff]  ;;  %v7053_v47 = vld [vmem:[#allocation2 + $0x880] sm:$0xff] }
 0x68e   :  { %6902 = vmatprep.subr.bf16.mxu0 %v6863_v3  ;;  %v7056_v3 = vld [vmem:[#allocation2 + $0x898] sm:$0xff] }
 0x691   :  { %6903 = vmatpush1.bf16.msra.mxu0 %v6862_v44  ;;  %v12675_v44 = vld [vmem:[#allocation45_spill] sm:$0xff] }
 0x692   :  { %6904 = vmatprep.subr.bf16.mxu0 %v6865_v61  ;;  %v7058_v61 = vld [vmem:[#allocation2 + $0x8a8] sm:$0xff] }
 0x694   :  { %6770 = vmatmul.mubr.bf16.gmra.mrb[44].mxu0 %v8156_v4  ;;  %v7057_v4 = vld [vmem:[#allocation2 + $0x8a0] sm:$0xff] }
 0x695   :  { %6905 = vmatpush1.bf16.msra.mxu0 %v6864_v0  ;;  %6779 = vmatprep.mubr.bf16.mxu0 %v12660_v38  ;;  %v7060_v0 = vld [vmem:[#allocation2 + $0x8b8] sm:$0xff]  ;;  %v12677_v38 = vld [vmem:[#allocation77_spill] sm:$0xff] }
 0x696   :  { %6906 = vmatprep.subr.bf16.mxu0 %v6867_v43  ;;  %v12676_v43 = vld [vmem:[#allocation40_spill] sm:$0xff] }
 0x699   :  { %6907 = vmatpush1.bf16.msra.mxu0 %v6866_v60  ;;  %v7059_v60 = vld [vmem:[#allocation2 + $0x8b0] sm:$0xff] }
 0x69a   :  { %6908 = vmatprep.subr.bf16.mxu0 %v6869_v63  ;;  %v7062_v63 = vld [vmem:[#allocation2 + $0x8c8] sm:$0xff] }
 0x69c   :  { %6780 = vmatmul.mubr.bf16.gmra.mrb[48].mxu0 %v12661_v17  ;;  %v7064_v17 = vld [vmem:[#allocation2 + $0x8d8] sm:$0xff] }
 0x69d   :  { %6909 = vmatpush1.bf16.msra.mxu0 %v6868_v53  ;;  %6789 = vmatprep.mubr.bf16.mxu0 %v12662_v34  ;;  %v8163_v53 = vcombine.high %v11832_v42, %v12671_v18  ;;  %v12678_v34 = vld [vmem:[#allocation55_spill] sm:$0xff] }
 0x69e   :  { %6910 = vmatprep.subr.bf16.mxu0 %v6871_v13  ;;  %v7061_v13 = vld [vmem:[#allocation2 + $0x8c0] sm:$0xff] }
 0x6a1   :  { %6911 = vmatpush1.bf16.msra.mxu0 %v6870_v58  ;;  %v7063_v58 = vld [vmem:[#allocation2 + $0x8d0] sm:$0xff] }
 0x6a2   :  { %6912 = vmatprep.subr.bf16.mxu0 %v6873_v27  ;;  %v7066_v27 = vld [vmem:[#allocation2 + $0x8e8] sm:$0xff] }
 0x6a4   :  { %6790 = vmatmul.mubr.bf16.gmra.mrb[52].mxu0 %v12663_v48  ;;  %v7068_v48 = vld [vmem:[#allocation2 + $0x8f8] sm:$0xff] }
 0x6a5   :  { %6913 = vmatpush1.bf16.msra.mxu0 %v6872_v5  ;;  %6799 = vmatprep.mubr.bf16.mxu0 %v12664_v57  ;;  %v8162_v5 = vcombine.low %v11832_v42, %v12671_v18  ;;  %v12679_v57 = vld [vmem:[#allocation70_spill] sm:$0xff]  ;;  %v12684_v42 = vld [vmem:[#allocation31_spill] sm:$0xff] }
 0x6a6   :  { %6914 = vmatprep.subr.bf16.mxu0 %v6875_v20  ;;  %v7065_v20 = vld [vmem:[#allocation2 + $0x8e0] sm:$0xff] }
 0x6a7   :  { %v7375_v18 = vld [vmem:[%s12088_s7 + $0xa0] sm:$0xff] }
 0x6a9   :  { %6915 = vmatpush1.bf16.msra.mxu0 %v6874_v52  ;;  %v7067_v52 = vld [vmem:[#allocation2 + $0x8f0] sm:$0xff] }
 0x6aa   :  { %6916 = vmatprep.subr.bf16.mxu0 %v6877_v15  ;;  %v12680_v15 = vld [vmem:[#allocation44_spill] sm:$0xff] }
 0x6ac   :  { %6800 = vmatmul.mubr.bf16.gmra.mrb[56].mxu0 %v12665_v6  ;;  %v8165_v6 = vcombine.high %v11854_v8, %v12684_v42 }
 0x6ad   :  { %6917 = vmatpush1.bf16.msra.mxu0 %v6876_v33  ;;  %6809 = vmatprep.mubr.bf16.mxu0 %v8159_v21  ;;  %v12681_v21 = vld [vmem:[#allocation86_spill] sm:$0xff]  ;;  %v12682_v33 = vld [vmem:[#allocation63_spill] sm:$0xff] }
 0x6ae   :  { %6918 = vmatprep.subr.bf16.mxu0 %v6879_v40  ;;  %v12683_v40 = vld [vmem:[#allocation87_spill] sm:$0xff] }
 0x6b1   :  { %6919 = vmatpush1.bf16.msra.mxu0 %v6878_v28  ;;  %v12685_v28 = vld [vmem:[#allocation88_spill] sm:$0xff] }
 0x6b2   :  { %6920 = vmatprep.subr.bf16.mxu0 %v6881_v29  ;;  %v8164_v29 = vcombine.low %v11854_v8, %v12684_v42  ;;  %v8166_v8 = vcombine.low %v11876_v35, %v12684_v42 }
 0x6b4   :  { %6810 = vmatmul.mubr.bf16.gmra.mrb[60].mxu0 %v8158_v23  ;;  %v12686_v23 = vld [vmem:[#allocation89_spill] sm:$0xff] }
 0x6b5   :  { %6921 = vmatpush1.bf16.msra.mxu0 %v6880_v16  ;;  %6924 = vmatprep.mubr.bf16.mxu0 %v12666_v36  ;;  %v12687_v16 = vld [vmem:[#allocation90_spill] sm:$0xff]  ;;  %v12689_v36 = vld [vmem:[#allocation85_spill] sm:$0xff] }
 0x6b6   :  { %6922 = vmatprep.subr.bf16.mxu0 %v6883_v1  ;;  %v12688_v1 = vld [vmem:[#allocation28_spill] sm:$0xff] }
 0x6b9   :  { %6923 = vmatpush1.bf16.msra.mxu0 %v6882_v46  ;;  %v12690_v46 = vld [vmem:[#allocation30_spill] sm:$0xff] }
 0x6ba   :  { %7077 = vmatprep.subr.bf16.mxu0 %v7038_v26  ;;  %v8167_v26 = vcombine.high %v11876_v35, %v12684_v42  ;;  %v7373_v35 = vld [vmem:[%s12088_s7 + $0x90] sm:$0xff] }
 0x6bc   :  { %6925 = vmatmul.mubr.bf16.vlgmr.msra.gmra.mrb[32].mxu0 %v12667_v7  ;;  %v7372_v7 = vld [vmem:[%s12088_s7 + $0x88] sm:$0xff] }
 0x6bd   :  { %7078 = vmatpush1.bf16.msra.mxu0 %v7037_v49  ;;  %6934 = vmatprep.mubr.bf16.mxu0 %v12668_v22  ;;  %v12691_v49 = vld [vmem:[#allocation29_spill] sm:$0xff] }
 0x6be   :  { %7079 = vmatprep.subr.bf16.mxu0 %v7040_v31  ;;  %v7371_v31 = vld [vmem:[%s12088_s7 + $0x80] sm:$0xff] }
 0x6bf   :  { %v8269_v22 = vpack.c.bf16 %v7372_v7, %v7371_v31 }
 0x6c1   :  { %7080 = vmatpush1.bf16.msra.mxu0 %v7039_v19  ;;  %v7355_v19 = vld [vmem:[%s12088_s7] sm:$0xff]  ;;  %8270 = vmatprep.subr.bf16.mxu1 %v8269_v22 }
 0x6c2   :  { %7081 = vmatprep.subr.bf16.mxu0 %v7042_v10  ;;  %v7356_v10 = vld [vmem:[%s12088_s7 + $0x8] sm:$0xff] }
 0x6c4   :  { %6935 = vmatmul.mubr.bf16.gmra.mrb[36].mxu0 %v12669_v41 }
 0x6c5   :  { %7082 = vmatpush1.bf16.msra.mxu0 %v7041_v32  ;;  %6944 = vmatprep.mubr.bf16.mxu0 %v12670_v62  ;;  %v8271_v32 = vpack.c.bf16 %v7356_v10, %v7355_v19  ;;  %v7357_v62 = vld [vmem:[%s12088_s7 + $0x10] sm:$0xff] }
 0x6c6   :  { %7083 = vmatprep.subr.bf16.mxu0 %v7044_v2  ;;  %v7374_v2 = vld [vmem:[%s12088_s7 + $0x98] sm:$0xff] }
 0x6c7   :  { %8272 = vmatpush3.bf16.msra.mxu1 %v8271_v32  ;;  %v8273_v41 = vpack.c.bf16 %v7374_v2, %v7373_v35 }
 0x6c9   :  { %7084 = vmatpush1.bf16.msra.mxu0 %v7043_v54  ;;  %v7358_v54 = vld [vmem:[%s12088_s7 + $0x18] sm:$0xff]  ;;  %8274 = vmatprep.subr.bf16.mxu1 %v8273_v41 }
 0x6ca   :  { %7085 = vmatprep.subr.bf16.mxu0 %v7046_v37  ;;  %v8275_v37 = vpack.c.bf16 %v7358_v54, %v7357_v62 }
 0x6cc   :  { %6945 = vmatmul.mubr.bf16.gmra.mrb[40].mxu0 %v12672_v30  ;;  %8276 = vmatpush3.bf16.msra.mxu1 %v8275_v37  ;;  %v7360_v30 = vld [vmem:[%s12088_s7 + $0x28] sm:$0xff] }
 0x6cd   :  { %7086 = vmatpush1.bf16.msra.mxu0 %v7045_v39  ;;  %6954 = vmatprep.mubr.bf16.mxu0 %v8161_v59  ;;  %v7376_v59 = vld [vmem:[%s12088_s7 + $0xa8] sm:$0xff] }
 0x6ce   :  { %7087 = vmatprep.subr.bf16.mxu0 %v7048_v50  ;;  %v8277_v39 = vpack.c.bf16 %v7376_v59, %v7375_v18  ;;  %v7359_v50 = vld [vmem:[%s12088_s7 + $0x20] sm:$0xff] }
 0x6d0   :  { %8278 = vmatprep.subr.bf16.mxu1 %v8277_v39 }
 0x6d1   :  { %7088 = vmatpush1.bf16.msra.mxu0 %v7047_v45  ;;  %v8279_v45 = vpack.c.bf16 %v7360_v30, %v7359_v50 }
 0x6d2   :  { %7089 = vmatprep.subr.bf16.mxu0 %v7050_v9  ;;  %v7377_v9 = vld [vmem:[%s12088_s7 + $0xb0] sm:$0xff] }
 0x6d3   :  { %8280 = vmatpush3.bf16.msra.mxu1 %v8279_v45 }
 0x6d4   :  { %6955 = vmatmul.mubr.bf16.gmra.mrb[44].mxu0 %v8160_v51  ;;  %v7378_v51 = vld [vmem:[%s12088_s7 + $0xb8] sm:$0xff] }
 0x6d5   :  { %7090 = vmatpush1.bf16.msra.mxu0 %v7049_v55  ;;  %6964 = vmatprep.mubr.bf16.mxu0 %v12673_v11  ;;  %v8281_v55 = vpack.c.bf16 %v7378_v51, %v7377_v9  ;;  %v7362_v11 = vld [vmem:[%s12088_s7 + $0x38] sm:$0xff] }
 0x6d6   :  { %7091 = vmatprep.subr.bf16.mxu0 %v7052_v14  ;;  %v7361_v14 = vld [vmem:[%s12088_s7 + $0x30] sm:$0xff] }
 0x6d7   :  { %8282 = vmatprep.subr.bf16.mxu1 %v8281_v55 }
 0x6d9   :  { %7092 = vmatpush1.bf16.msra.mxu0 %v7051_v56  ;;  %v8283_v56 = vpack.c.bf16 %v7362_v11, %v7361_v14 }
 0x6da   :  { %7093 = vmatprep.subr.bf16.mxu0 %v7054_v12  ;;  %v7379_v12 = vld [vmem:[%s12088_s7 + $0xc0] sm:$0xff] }
 0x6db   :  { %8284 = vmatpush3.bf16.msra.mxu1 %v8283_v56 }
 0x6dc   :  { %6965 = vmatmul.mubr.bf16.gmra.mrb[48].mxu0 %v12674_v24  ;;  %v7363_v24 = vld [vmem:[%s12088_s7 + $0x40] sm:$0xff] }
 0x6dd   :  { %7094 = vmatpush1.bf16.msra.mxu0 %v7053_v47  ;;  %6974 = vmatprep.mubr.bf16.mxu0 %v12675_v44  ;;  %v7380_v47 = vld [vmem:[%s12088_s7 + $0xc8] sm:$0xff] }
 0x6de   :  { %7095 = vmatprep.subr.bf16.mxu0 %v7056_v3  ;;  %v8285_v3 = vpack.c.bf16 %v7380_v47, %v7379_v12  ;;  %v7364_v44 = vld [vmem:[%s12088_s7 + $0x48] sm:$0xff] }
 0x6e0   :  { %8286 = vmatprep.subr.bf16.mxu1 %v8285_v3 }
 0x6e1   :  { %7096 = vmatpush1.bf16.msra.mxu0 %v7055_v25  ;;  %v8287_v25 = vpack.c.bf16 %v7364_v44, %v7363_v24 }
 0x6e2   :  { %7097 = vmatprep.subr.bf16.mxu0 %v7058_v61  ;;  %v7381_v61 = vld [vmem:[%s12088_s7 + $0xd0] sm:$0xff] }
 0x6e3   :  { %8288 = vmatpush3.bf16.msra.mxu1 %v8287_v25 }
 0x6e4   :  { %6975 = vmatmul.mubr.bf16.gmra.mrb[52].mxu0 %v12676_v43  ;;  %v7365_v43 = vld [vmem:[%s12088_s7 + $0x50] sm:$0xff] }
 0x6e5   :  { %7098 = vmatpush1.bf16.msra.mxu0 %v7057_v4  ;;  %6984 = vmatprep.mubr.bf16.mxu0 %v12677_v38  ;;  %v7382_v4 = vld [vmem:[%s12088_s7 + $0xd8] sm:$0xff] }
 0x6e6   :  { %7099 = vmatprep.subr.bf16.mxu0 %v7060_v0  ;;  %v8289_v0 = vpack.c.bf16 %v7382_v4, %v7381_v61  ;;  %v7366_v38 = vld [vmem:[%s12088_s7 + $0x58] sm:$0xff] }
 0x6e8   :  { %8290 = vmatprep.subr.bf16.mxu1 %v8289_v0 }
 0x6e9   :  { %7100 = vmatpush1.bf16.msra.mxu0 %v7059_v60  ;;  %v8291_v60 = vpack.c.bf16 %v7366_v38, %v7365_v43 }
 0x6ea   :  { %7101 = vmatprep.subr.bf16.mxu0 %v7062_v63  ;;  %v7383_v63 = vld [vmem:[%s12088_s7 + $0xe0] sm:$0xff] }
 0x6eb   :  { %8292 = vmatpush3.bf16.msra.mxu1 %v8291_v60 }
 0x6ec   :  { %6985 = vmatmul.mubr.bf16.gmra.mrb[56].mxu0 %v12678_v34  ;;  %v7368_v34 = vld [vmem:[%s12088_s7 + $0x68] sm:$0xff] }
 0x6ed   :  { %7102 = vmatpush1.bf16.msra.mxu0 %v7061_v13  ;;  %6994 = vmatprep.mubr.bf16.mxu0 %v8163_v53  ;;  %v7384_v53 = vld [vmem:[%s12088_s7 + $0xe8] sm:$0xff]  ;;  %v7367_v13 = vld [vmem:[%s12088_s7 + $0x60] sm:$0xff] }
 0x6ee   :  { %7103 = vmatprep.subr.bf16.mxu0 %v7064_v17  ;;  %v8293_v17 = vpack.c.bf16 %v7384_v53, %v7383_v63 }
 0x6f0   :  { %8294 = vmatprep.subr.bf16.mxu1 %v8293_v17 }
 0x6f1   :  { %7104 = vmatpush1.bf16.msra.mxu0 %v7063_v58  ;;  %v7385_v58 = vld [vmem:[%s12088_s7 + $0xf0] sm:$0xff] }
 0x6f2   :  { %7105 = vmatprep.subr.bf16.mxu0 %v7066_v27  ;;  %v7386_v27 = vld [vmem:[%s12088_s7 + $0xf8] sm:$0xff] }
 0x6f4   :  { %6995 = vmatmul.mubr.bf16.gmra.mrb[60].mxu0 %v8162_v5  ;;  %v8295_v5 = vpack.c.bf16 %v7368_v34, %v7367_v13 }
 0x6f5   :  { %7106 = vmatpush1.bf16.msra.mxu0 %v7065_v20  ;;  %7109 = vmatprep.mubr.bf16.mxu0 %v12679_v57  ;;  %v8297_v20 = vpack.c.bf16 %v7386_v27, %v7385_v58  ;;  %v7370_v57 = vld [vmem:[%s12088_s7 + $0x78] sm:$0xff] }
 0x6f6   :  { %7107 = vmatprep.subr.bf16.mxu0 %v7068_v48  ;;  %v7369_v48 = vld [vmem:[%s12088_s7 + $0x70] sm:$0xff]  ;;  %8296 = vmatpush3.bf16.msra.mxu1 %v8295_v5 }
 0x6f7   :  { %8298 = vmatprep.subr.bf16.mxu1 %v8297_v20 }
 0x6f9   :  { %7108 = vmatpush1.bf16.msra.mxu0 %v7067_v52  ;;  %v8299_v52 = vpack.c.bf16 %v7370_v57, %v7369_v48 }
 0x6fb   :  { %8300 = vmatpush3.bf16.msra.mxu1 %v8299_v52 }
 0x6fc   :  { %7110 = vmatmul.mubr.bf16.vlgmr.msra.gmra.mrb[32].mxu0 %v12680_v15  ;;  %v7222_v15 = vld [vmem:[#allocation12] sm:$0x3] }
 0x6fd   :  { %7119 = vmatprep.mubr.bf16.mxu0 %v12681_v21  ;;  %v12692_v21 = vld [vmem:[#allocation23_spill] sm:$0xff] }
 0x704   :  { %7120 = vmatmul.mubr.bf16.gmra.mrb[36].mxu0 %v12682_v33  ;;  %v12041_v33 = vrot.slane %v7222_v15, %v12692_v21 }
 0x705   :  { %7129 = vmatprep.mubr.bf16.mxu0 %v12683_v40  ;;  %v12693_v40 = vld [vmem:[#allocation25_spill] sm:$0xff] }
 0x706   :  { %v12044_v42 = vrot.slane %v7222_v15, %v12693_v40 }
 0x70c   :  { %7130 = vmatmul.mubr.bf16.gmra.mrb[40].mxu0 %v12685_v28 }
 0x70d   :  { %7139 = vmatprep.mubr.bf16.mxu0 %v8165_v6 }
 0x714   :  { %7140 = vmatmul.mubr.bf16.gmra.mrb[44].mxu0 %v8164_v29 }
 0x715   :  { %7149 = vmatprep.mubr.bf16.mxu0 %v12686_v23 }
 0x71c   :  { %7150 = vmatmul.mubr.bf16.gmra.mrb[48].mxu0 %v12687_v16 }
 0x71d   :  { %7159 = vmatprep.mubr.bf16.mxu0 %v12688_v1 }
 0x724   :  { %7160 = vmatmul.mubr.bf16.gmra.mrb[52].mxu0 %v12689_v36 }
 0x725   :  { %7169 = vmatprep.mubr.bf16.mxu0 %v12690_v46 }
 0x72c   :  { %7170 = vmatmul.mubr.bf16.gmra.mrb[56].mxu0 %v12691_v49 }
 0x72d   :  { %7179 = vmatprep.mubr.bf16.mxu0 %v8167_v26 }
 0x734   :  { %7180 = vmatmul.mubr.bf16.gmra.mrb[60].mxu0 %v8166_v8 }
 0x7cf   :  { %v7111_v6 = vpop.f32.mrb[32].mxu0 }
 0x7d0   :  { %v7234_v28 = vadd.f32 %v12041_v33, %v7111_v6  ;;  %v7113_v29 = vpop.f32.mrb[33].mxu0 }
 0x7d1   :  { %v7235_v23 = vadd.f32 %v12044_v42, %v7113_v29  ;;  %v7115_v16 = vpop.f32.mrb[34].mxu0 }
 0x7d2   :  { %v7236_v1 = vadd.f32 %v12041_v33, %v7115_v16  ;;  %v7117_v36 = vpop.f32.mrb[35].mxu0  ;;  %v7266_v26 = vmax.f32 %v7234_v28, 0.0 }
 0x7d3   :  { %v7237_v46 = vadd.f32 %v12044_v42, %v7117_v36  ;;  %v7267_v8 = vmax.f32 %v7235_v23, 0.0 }
 0x7d4   :  { %v7268_v49 = vmax.f32 %v7236_v1, 0.0 }
 0x7d5   :  { %v7269_v31 = vmax.f32 %v7237_v46, 0.0 }
 0x7d6   :  { %v7298_v7 = vadd.f32 %v7268_v49, %v7266_v26 }
 0x7d7   :  { %v7311_v22 = vadd.f32 %v7269_v31, %v7267_v8  ;;  %v7121_v19 = vpop.f32.mrb[36].mxu0 }
 0x7d8   :  { %v7238_v10 = vadd.f32 %v12041_v33, %v7121_v19  ;;  %v7123_v32 = vpop.f32.mrb[37].mxu0 }
 0x7d9   :  { %v7239_v35 = vadd.f32 %v12044_v42, %v7123_v32  ;;  %v7125_v2 = vpop.f32.mrb[38].mxu0 }
 0x7da   :  { %v7270_v41 = vmax.f32 %v7238_v10, 0.0  ;;  %v7240_v62 = vadd.f32 %v12041_v33, %v7125_v2  ;;  %v7127_v54 = vpop.f32.mrb[39].mxu0 }
 0x7db   :  { %v7271_v37 = vmax.f32 %v7239_v35, 0.0  ;;  %v7241_v18 = vadd.f32 %v12044_v42, %v7127_v54 }
 0x7dc   :  { %v7299_v59 = vadd.f32 %v7298_v7, %v7270_v41  ;;  %v7272_v39 = vmax.f32 %v7240_v62, 0.0 }
 0x7dd   :  { %v7312_v50 = vadd.f32 %v7311_v22, %v7271_v37  ;;  %v7273_v30 = vmax.f32 %v7241_v18, 0.0 }
 0x7de   :  { %v7300_v45 = vadd.f32 %v7299_v59, %v7272_v39 }
 0x7df   :  { %v7313_v9 = vadd.f32 %v7312_v50, %v7273_v30  ;;  %v7131_v51 = vpop.f32.mrb[40].mxu0 }
 0x7e0   :  { %v7242_v55 = vadd.f32 %v12041_v33, %v7131_v51  ;;  %v7133_v14 = vpop.f32.mrb[41].mxu0 }
 0x7e1   :  { %v7243_v11 = vadd.f32 %v12044_v42, %v7133_v14  ;;  %v7135_v56 = vpop.f32.mrb[42].mxu0 }
 0x7e2   :  { %v7274_v12 = vmax.f32 %v7242_v55, 0.0  ;;  %v7244_v47 = vadd.f32 %v12041_v33, %v7135_v56  ;;  %v7137_v3 = vpop.f32.mrb[43].mxu0 }
 0x7e3   :  { %v7275_v24 = vmax.f32 %v7243_v11, 0.0  ;;  %v7245_v44 = vadd.f32 %v12044_v42, %v7137_v3 }
 0x7e4   :  { %v7301_v25 = vadd.f32 %v7300_v45, %v7274_v12  ;;  %v7276_v61 = vmax.f32 %v7244_v47, 0.0 }
 0x7e5   :  { %v7314_v4 = vadd.f32 %v7313_v9, %v7275_v24  ;;  %v7277_v0 = vmax.f32 %v7245_v44, 0.0 }
 0x7e6   :  { %v7302_v43 = vadd.f32 %v7301_v25, %v7276_v61 }
 0x7e7   :  { %v7315_v38 = vadd.f32 %v7314_v4, %v7277_v0  ;;  %v7141_v60 = vpop.f32.mrb[44].mxu0 }
 0x7e8   :  { %v7246_v63 = vadd.f32 %v12041_v33, %v7141_v60  ;;  %v7143_v53 = vpop.f32.mrb[45].mxu0 }
 0x7e9   :  { %v7247_v13 = vadd.f32 %v12044_v42, %v7143_v53  ;;  %v7145_v17 = vpop.f32.mrb[46].mxu0 }
 0x7ea   :  { %v7278_v34 = vmax.f32 %v7246_v63, 0.0  ;;  %v7248_v58 = vadd.f32 %v12041_v33, %v7145_v17  ;;  %v7147_v27 = vpop.f32.mrb[47].mxu0 }
 0x7eb   :  { %v7279_v5 = vmax.f32 %v7247_v13, 0.0  ;;  %v7249_v20 = vadd.f32 %v12044_v42, %v7147_v27 }
 0x7ec   :  { %v7303_v48 = vadd.f32 %v7302_v43, %v7278_v34  ;;  %v7280_v57 = vmax.f32 %v7248_v58, 0.0 }
 0x7ed   :  { %v7316_v52 = vadd.f32 %v7315_v38, %v7279_v5  ;;  %v7281_v15 = vmax.f32 %v7249_v20, 0.0 }
 0x7ee   :  { %v7304_v21 = vadd.f32 %v7303_v48, %v7280_v57 }
 0x7ef   :  { %v7317_v40 = vadd.f32 %v7316_v52, %v7281_v15  ;;  %v7151_v6 = vpop.f32.mrb[48].mxu0 }
 0x7f0   :  { %v7250_v28 = vadd.f32 %v12041_v33, %v7151_v6  ;;  %v7153_v29 = vpop.f32.mrb[49].mxu0  ;;  %v7305_v25 = vrot.slane %v7304_v21, 4 }
 0x7f1   :  { %v7251_v23 = vadd.f32 %v12044_v42, %v7153_v29  ;;  %v7155_v16 = vpop.f32.mrb[50].mxu0  ;;  %v7318_v0 = vrot.slane %v7317_v40, 4 }
 0x7f2   :  { %v7252_v1 = vadd.f32 %v12041_v33, %v7155_v16  ;;  %v7157_v36 = vpop.f32.mrb[51].mxu0  ;;  %v7282_v26 = vmax.f32 %v7250_v28, 0.0  ;;  %v7306_v13 = vadd.f32 %v7305_v25, %v7304_v21 }
 0x7f3   :  { %v7253_v46 = vadd.f32 %v12044_v42, %v7157_v36  ;;  %v7283_v8 = vmax.f32 %v7251_v23, 0.0  ;;  %v7319_v58 = vadd.f32 %v7318_v0, %v7317_v40 }
 0x7f4   :  { %v7284_v49 = vmax.f32 %v7252_v1, 0.0  ;;  %v7307_v6 = vrot.slane %v7306_v13, 2 }
 0x7f5   :  { %v7285_v31 = vmax.f32 %v7253_v46, 0.0  ;;  %v7320_v23 = vrot.slane %v7319_v58, 2 }
 0x7f6   :  { %v7324_v7 = vadd.f32 %v7284_v49, %v7282_v26  ;;  %v7308_v46 = vadd.f32 %v7307_v6, %v7306_v13 }
 0x7f7   :  { %v7337_v22 = vadd.f32 %v7285_v31, %v7283_v8  ;;  %v7161_v19 = vpop.f32.mrb[52].mxu0  ;;  %v7321_v49 = vadd.f32 %v7320_v23, %v7319_v58 }
 0x7f8   :  { %v7254_v10 = vadd.f32 %v12041_v33, %v7161_v19  ;;  %v7163_v32 = vpop.f32.mrb[53].mxu0 }
 0x7f9   :  { %v7255_v35 = vadd.f32 %v12044_v42, %v7163_v32  ;;  %v7165_v2 = vpop.f32.mrb[54].mxu0  ;;  %v7322_v19 = vrot.slane %v7321_v49, 1 }
 0x7fa   :  { %v7286_v41 = vmax.f32 %v7254_v10, 0.0  ;;  %v7256_v62 = vadd.f32 %v12041_v33, %v7165_v2  ;;  %v7167_v54 = vpop.f32.mrb[55].mxu0 }
 0x7fb   :  { %v7287_v37 = vmax.f32 %v7255_v35, 0.0  ;;  %v7257_v18 = vadd.f32 %v12044_v42, %v7167_v54  ;;  %v7323_v2 = vadd.f32 %v7322_v19, %v7321_v49 }
 0x7fc   :  { %v7325_v59 = vadd.f32 %v7324_v7, %v7286_v41  ;;  %v7288_v39 = vmax.f32 %v7256_v62, 0.0 }
 0x7fd   :  { %v7338_v50 = vadd.f32 %v7337_v22, %v7287_v37  ;;  %v7289_v30 = vmax.f32 %v7257_v18, 0.0 }
 0x7fe   :  { %v7326_v45 = vadd.f32 %v7325_v59, %v7288_v39  ;;  %v7352_v59 = vmul.f32 0.015625, %v7323_v2 }
 0x7ff   :  { %v7339_v9 = vadd.f32 %v7338_v50, %v7289_v30  ;;  %v7171_v51 = vpop.f32.mrb[56].mxu0 }
 0x800   :  { %v7258_v55 = vadd.f32 %v12041_v33, %v7171_v51  ;;  %v7173_v14 = vpop.f32.mrb[57].mxu0 }
 0x801   :  { %v7259_v11 = vadd.f32 %v12044_v42, %v7173_v14  ;;  %v7175_v56 = vpop.f32.mrb[58].mxu0 }
 0x802   :  { %v7290_v12 = vmax.f32 %v7258_v55, 0.0  ;;  %v7260_v47 = vadd.f32 %v12041_v33, %v7175_v56  ;;  %v7177_v3 = vpop.f32.mrb[59].mxu0 }
 0x803   :  { %v7291_v24 = vmax.f32 %v7259_v11, 0.0  ;;  %v7261_v44 = vadd.f32 %v12044_v42, %v7177_v3 }
 0x804   :  { %v7327_v61 = vadd.f32 %v7326_v45, %v7290_v12  ;;  %v7292_v4 = vmax.f32 %v7260_v47, 0.0 }
 0x805   :  { %v7340_v43 = vadd.f32 %v7339_v9, %v7291_v24  ;;  %v7293_v38 = vmax.f32 %v7261_v44, 0.0  ;;  %v8168_v9 = vld [vmem:[#allocation14] ss:$0 sm:$0xff] }
 0x806   :  { %v7328_v60 = vadd.f32 %v7327_v61, %v7292_v4 }
 0x807   :  { %v7341_v63 = vadd.f32 %v7340_v43, %v7293_v38  ;;  %v7181_v53 = vpop.f32.mrb[60].mxu0 }
 0x808   :  { %v7262_v17 = vadd.f32 %v12041_v33, %v7181_v53  ;;  %v7183_v34 = vpop.f32.mrb[61].mxu0 }
 0x809   :  { %v7263_v27 = vadd.f32 %v12044_v42, %v7183_v34  ;;  %v7185_v5 = vpop.f32.mrb[62].mxu0 }
 0x80a   :  { %v7294_v20 = vmax.f32 %v7262_v17, 0.0  ;;  %v7264_v48 = vadd.f32 %v12041_v33, %v7185_v5  ;;  %v7187_v57 = vpop.f32.mrb[63].mxu0  ;;  %v7309_v33 = vrot.slane %v7308_v46, 1 }
 0x80b   :  { %v7295_v52 = vmax.f32 %v7263_v27, 0.0  ;;  %v7265_v15 = vadd.f32 %v12044_v42, %v7187_v57 }
 0x80c   :  { %v7329_v28 = vadd.f32 %v7328_v60, %v7294_v20  ;;  %v7296_v29 = vmax.f32 %v7264_v48, 0.0  ;;  %v7310_v32 = vadd.f32 %v7309_v33, %v7308_v46 }
 0x80d   :  { %v7342_v16 = vadd.f32 %v7341_v63, %v7295_v52  ;;  %v7297_v21 = vmax.f32 %v7265_v15, 0.0 }
 0x80e   :  { %v7330_v1 = vadd.f32 %v7329_v28, %v7296_v29  ;;  %v7351_v37 = vmul.f32 0.015625, %v7310_v32 }
 0x80f   :  { %v7343_v36 = vadd.f32 %v7342_v16, %v7297_v21 }
 0x810   :  { %v7331_v40 = vrot.slane %v7330_v1, 4 }
 0x811   :  { %v7344_v26 = vrot.slane %v7343_v36, 4 }
 0x812   :  { %v7332_v8 = vadd.f32 %v7331_v40, %v7330_v1 }
 0x813   :  { %v7345_v31 = vadd.f32 %v7344_v26, %v7343_v36 }
 0x814   :  { %v7333_v7 = vrot.slane %v7332_v8, 2 }
 0x815   :  { %v7346_v22 = vrot.slane %v7345_v31, 2 }
 0x816   :  { %v7334_v10 = vadd.f32 %v7333_v7, %v7332_v8 }
 0x817   :  { %v7347_v42 = vadd.f32 %v7346_v22, %v7345_v31 }
 0x818   :  { %v7335_v35 = vrot.slane %v7334_v10, 1 }
 0x819   :  { %v7348_v41 = vrot.slane %v7347_v42, 1 }
 0x81a   :  { %v7336_v62 = vadd.f32 %v7335_v35, %v7334_v10 }
 0x81b   :  { %v7349_v54 = vadd.f32 %v7348_v41, %v7347_v42 }
 0x81c   :  { %v7353_v18 = vmul.f32 0.015625, %v7336_v62 }
 0x81d   :  { %v7354_v39 = vmul.f32 0.015625, %v7349_v54 }
 0x81e   :  { %v7399_v50 = vsel %vm7398_vm13, %v7353_v18, %v7351_v37 }
 0x81f   :  { %v7400_v30 = vsel %vm7398_vm13, %v7354_v39, %v7352_v59 }
 0x820   :  { %7467 = vmatprep.mubr.f32.mxu1 %v7400_v30 }
 0x821   :  { %7468 = vmatmul.mubr.f32.vlgmr.msra.gmra.mrb[32].mxu1 %v7399_v50 }
 0x8f4   :  { %v8266_v45 = vpop.f32.mrb[32].mxu1 }
 0x8f5   :  { %v8267_v51 = vpop.f32.mrb[33].mxu1 }
 0x8f6   :  { %v8268_v55 = vadd.f32 %v8267_v51, %v8266_v45 }
 0x8f8   :  { %v7470_v14 = vadd.f32 %v8268_v55, %v8168_v9 }
 0x8fa   :  { %7474 = vst.msk [vmem:[%s12090_s9] sm:$0x3] %vm7473_vm14, %v7470_v14 }
 0x8fb   :  { %7479 = vsyncpa [#allocation5], 1 }
 0x8fc   :  { %7480 = vsyncpa [#allocation7], 1 }
 0x8fd   :  { %7481 = vsyncpa [#allocation10], 1 }
 0x8fe   :  { %7482 = vsyncpa [#allocation13], 1 }
 0x8ff   :  { %7483 = vsyncmov [#allocation3] }
 0x902   :  { %s7484_s23 = vpop.sfrf %7483 }
 0x903   :  { %p8169_p0 = scmp.ne.s32.totalorder %s7484_s23, 0 }
 0x905   :  { %7488 = shalt.err (%p8169_p0)  }

</bundles_post_ra>
